<compile_context>
chip_gen: v7x
topology: tpu7x:2x2x1
jax: 0.10.0
libtpu: 0.0.40
codegen_flags: <defaults>
</compile_context>

<pallas_src>
import functools

import jax
import jax.numpy as jnp
import numpy as np
from jax import lax
from jax.experimental import pallas as pl
from jax.experimental.pallas import tpu as pltpu

PAD_ID = 0
LENGTH_PENALTY = 2.0   # configs.train.length_penalty


def _round_up(x, m):
    return ((x + m - 1) // m) * m


def _make_kernel(with_probs, exp_in_bf16, log_mode):
    def kernel(hid_ref,      # VMEM (BB, C, Lp, D) bf16 : decoder hidden states (resident over V)
               w_ref,        # VMEM (D, TILE_V)   bf16 : LM-head vocab tile (streamed)
               ids_ref,      # VMEM (BB, C, Lp)  int32 : target ids (shifted; masked positions = PAD)
               tl_ref,       # VMEM (BB, 1)        f32 : (tgt_len - 1) per batch item
               *refs):
        if with_probs:
            probs_ref, scores_ref, m_acc, l_acc, tok_acc = refs
        else:
            probs_ref = None
            scores_ref, m_acc, l_acc, tok_acc = refs

        v = pl.program_id(1)
        num_v = pl.num_programs(1)
        BB, C, Lp, D = hid_ref.shape
        TV = w_ref.shape[1]

        @pl.when(v == 0)
        def _():
            m_acc[...] = jnp.full_like(m_acc, -jnp.inf)
            l_acc[...] = jnp.zeros_like(l_acc)
            tok_acc[...] = jnp.zeros_like(tok_acc)

        # MXU hot path: (BB*C*Lp, D) @ (D, TILE_V), bf16 inputs, f32 accumulation.
        # Lp % 16 == 0 (bf16 sublane pack) -> this reshape is a layout no-op.
        h = hid_ref[...].reshape(BB * C * Lp, D)
        logits2 = jnp.dot(h, w_ref[...], preferred_element_type=jnp.float32)
        logits3 = logits2.reshape(BB, C * Lp, TV)

        if probs_ref is not None:
            # candidate-0 rows are the first Lp rows of each batch item -> contiguous slice.
            probs_ref[...] = logits3[:, :Lp, :].astype(probs_ref.dtype)

        logits = logits3.reshape(BB, C, Lp, TV)

        # ---- online softmax statistics across V tiles ----
        m_old = m_acc[...]
        m_new = jnp.maximum(m_old, jnp.max(logits, axis=-1))
        x = logits - m_new[..., None]
        if exp_in_bf16:
            # bf16 exp on the EUP (v6e/v7x), f32 accumulation of the sum.
            e = jnp.exp(x.astype(jnp.bfloat16)).astype(jnp.float32)
        else:
            e = jnp.exp(x)
        l_acc[...] = l_acc[...] * jnp.exp(m_old - m_new) + jnp.sum(e, axis=-1)
        m_acc[...] = m_new

        # ---- gather the target-token logit if it falls inside this vocab tile ----
        # TODO(synk): ids outside [0, V) silently gather 0.0 (real tokenizer ids are in range).
        # TODO(synk): if profiling shows the XLU (lane reduces) binds on v6e/v7x, fold this
        #             gather into the exp/sum path (accumulate exp(target - m) with the same
        #             rescale and recover the log-prob as log(tok_e) - log(l)).
        ids = ids_ref[...]                                           # (BB, C, Lp)
        col = lax.broadcasted_iota(jnp.int32, (1, 1, 1, TV), 3)
        hit = col == (ids[..., None] - v * TV)
        tok_acc[...] += jnp.sum(jnp.where(hit, logits, 0.0), axis=-1)

        # ---- finalize once per batch block ----
        @pl.when(v == num_v - 1)
        def _():
            lse = m_acc[...] + jnp.log(l_acc[...])
            if log_mode:
                tok = tok_acc[...] - lse                             # log-prob of target token
            else:
                tok = jnp.exp(tok_acc[...] - lse)                    # prob of target token
            mask = (ids != PAD_ID).astype(jnp.float32)               # shift + "drop last" folded in wrapper
            msum = jnp.sum(mask, axis=-1)                            # (BB, C)
            msum_safe = jnp.maximum(msum, 1.0)                       # guard all-PAD rows (torch ref would NaN)
            if LENGTH_PENALTY == 2.0:
                denom = msum_safe * msum_safe                        # avoid exp*log pow on the EUP
            else:
                denom = msum_safe ** LENGTH_PENALTY
            seq_score = jnp.sum(tok * mask, axis=-1) / denom         # (BB, C)

            # length reweighting: 1.5 - sigmoid(sqrt(|cand_len - (tgt_len - 1)|))
            tl = tl_ref[...]                                         # (BB, 1) f32, broadcasts over C
            length = 1.5 - jax.nn.sigmoid(jnp.sqrt(jnp.abs(msum - tl)))
            scores_ref[...] = seq_score * length

    return kernel


def pw_forward(hidden, lm_head_w, candidates, tgt_text, score_mode='log',
               require_gold=True, block_b=None, tile_v=None,
               return_probs=True, probs_dtype=jnp.bfloat16,
               exp_in_bf16=False, hidden_single_buffer=False):
    """hidden: (B, C, L, D); lm_head_w: (D, V); candidates: (B, C, L); tgt_text: (B, L)."""
    B, C, L, D = hidden.shape
    V = lm_head_w.shape[1]

    # ---- batch block (M-dim) selection ----
    if block_b is None:
        # >=2 batch blocks lets the v7x megacore split the "parallel" axis,
        # while BB % 8 keeps the (BB, C)/(BB, 1) blocks sublane-legal.
        if B >= 16 and B % 2 == 0 and (B // 2) % 8 == 0:
            BB = B // 2
        else:
            BB = B
    else:
        BB = block_b
    assert B % BB == 0, "block_b must divide batch"
    assert BB == B or BB % 8 == 0, \
        "block_b must equal B or be a multiple of 8 (scores/tgt_len sublane constraint)"

    # ---- vocab tile selection ----
    if tile_v is None:
        for t in (1024, 512, 256, 128):
            if V % t == 0:
                tile_v = t
                break
        else:
            tile_v = V
    assert V % tile_v == 0, "tile_v must divide vocab (pad vocab at real shapes)"

    # ---- wrapper preprocessing ----
    # Pad L to a multiple of 16 (bf16 sublane pack) so the in-kernel reshape is layout-free.
    Lp = _round_up(L, 16)
    hidden_bf = hidden.astype(jnp.bfloat16)
    if Lp != L:
        hidden_bf = jnp.pad(hidden_bf, ((0, 0), (0, 0), (0, Lp - L), (0, 0)))
    w_bf = lm_head_w.astype(jnp.bfloat16)

    # target ids = candidates shifted left by one; positions >= L-1 (the wrapped last
    # position) and all padding are set to PAD so the in-kernel mask is just ids != PAD.
    ids = jnp.roll(candidates.astype(jnp.int32), shift=-1, axis=-1)
    pos = jnp.arange(L)[None, None, :]
    ids = jnp.where(pos >= L - 1, PAD_ID, ids)
    if Lp != L:
        ids = jnp.pad(ids, ((0, 0), (0, 0), (0, Lp - L)), constant_values=PAD_ID)

    tgt_len_m1 = ((tgt_text != PAD_ID).sum(-1) - 1).astype(jnp.float32).reshape(B, 1)

    grid = (B // BB, V // tile_v)   # V innermost: hidden stays resident, weight streams

    # ---- VMEM budget from actual block sizes (feedback: no fixed 48 MiB) ----
    probs_isz = jnp.dtype(probs_dtype).itemsize
    hid_bytes = BB * C * Lp * D * 2
    w_bytes = D * tile_v * 2
    ids_bytes = BB * C * Lp * 4
    tl_bytes = BB * 1 * 4
    probs_blk = BB * Lp * tile_v * probs_isz if return_probs else 0
    scores_blk = BB * C * 4
    scratch_bytes = 3 * BB * C * Lp * 4
    hid_bufs = 1 if hidden_single_buffer else 2
    need = (hid_bufs * hid_bytes
            + 2 * (w_bytes + ids_bytes + tl_bytes + probs_blk + scores_blk)
            + scratch_bytes)
    # headroom for tile padding / compiler scratch; on v7x (64 MiB/TC) size BB/tile_v
    # so `need` stays <= ~56 MiB (or set hidden_single_buffer=True).
    vmem_limit = int(min(max(need + (8 << 20), 16 << 20), 100 << 20))

    if hidden_single_buffer:
        # v7x: hidden's block index only changes once per bb step; single-buffering it
        # halves its VMEM footprint at the cost of one refetch stall per bb step.
        hid_spec = pl.BlockSpec((BB, C, Lp, D), lambda bb, v: (bb, 0, 0, 0),
                                pipeline_mode=pl.Buffered(1))
    else:
        hid_spec = pl.BlockSpec((BB, C, Lp, D), lambda bb, v: (bb, 0, 0, 0))

    in_specs = [
        hid_spec,
        pl.BlockSpec((D, tile_v), lambda bb, v: (0, v)),
        pl.BlockSpec((BB, C, Lp), lambda bb, v: (bb, 0, 0)),
        pl.BlockSpec((BB, 1), lambda bb, v: (bb, 0)),
    ]
    scores_spec = pl.BlockSpec((BB, C), lambda bb, v: (bb, 0))
    if return_probs:
        out_shape = (jax.ShapeDtypeStruct((B, Lp, V), probs_dtype),
                     jax.ShapeDtypeStruct((B, C), jnp.float32))
        out_specs = [pl.BlockSpec((BB, Lp, tile_v), lambda bb, v: (bb, 0, v)),
                     scores_spec]
    else:
        out_shape = jax.ShapeDtypeStruct((B, C), jnp.float32)
        out_specs = scores_spec

    kernel = _make_kernel(with_probs=return_probs,
                          exp_in_bf16=exp_in_bf16,
                          log_mode=(score_mode == 'log'))

    res = pl.pallas_call(
        kernel,
        out_shape=out_shape,
        grid_spec=pltpu.PrefetchScalarGridSpec(
            num_scalar_prefetch=0,
            grid=grid,
            in_specs=in_specs,
            out_specs=out_specs,
            scratch_shapes=[
                pltpu.VMEM((BB, C, Lp), jnp.float32),   # running max
                pltpu.VMEM((BB, C, Lp), jnp.float32),   # running sum-exp
                pltpu.VMEM((BB, C, Lp), jnp.float32),   # gathered target-token logit
            ],
        ),
        compiler_params=pltpu.CompilerParams(
            dimension_semantics=("parallel", "arbitrary"),
            vmem_limit_bytes=vmem_limit,
        ),
    )(hidden_bf, w_bf, ids, tgt_len_m1)

    if return_probs:
        probs, scores = res
        if Lp != L:
            probs = probs[:, :L]
    else:
        scores = res
        probs = None

    if require_gold:
        out = {"score": scores[:, 1:], "summary_score": scores[:, 0]}
    else:
        out = {"score": scores}
    if probs is not None:
        out["probs"] = probs
    return out


def pw_forward_ref(hidden, w, candidates, tgt_text, require_gold=True):
    """Pure-JAX reference reproducing the PyTorch scoring semantics (same bf16 inputs)."""
    hidden = hidden.astype(jnp.bfloat16)
    w = w.astype(jnp.bfloat16)
    logits = jnp.einsum("bcld,dv->bclv", hidden, w, preferred_element_type=jnp.float32)
    probs = logits[:, 0]
    out = logits[:, :, :-1]
    cand = candidates[:, :, 1:]
    lp = jax.nn.log_softmax(out, axis=-1)
    tok_lp = jnp.take_along_axis(lp, cand[..., None], axis=-1)[..., 0]
    mask = (cand != PAD_ID).astype(jnp.float32)
    msum = mask.sum(-1)
    scores = (tok_lp * mask).sum(-1) / (jnp.maximum(msum, 1.0) ** LENGTH_PENALTY)
    tl = ((tgt_text != PAD_ID).sum(-1) - 1).astype(jnp.float32)
    length = jnp.abs(msum - tl[:, None])
    length = 1.5 - jax.nn.sigmoid(jnp.sqrt(length))
    scores = scores * length
    if require_gold:
        return {"score": scores[:, 1:], "summary_score": scores[:, 0], "probs": probs}
    return {"score": scores, "probs": probs}


if __name__ == "__main__":
    # batch, (gold + 2 candidates), seq, d_model, vocab — small but large enough that the
    # default block_b heuristic kicks in (BB = 8 -> 2 parallel batch blocks).
    B, C, L, D, V = 16, 3, 8, 128, 256

    key = jax.random.PRNGKey(0)
    k_hid, k_w, k_cand, k_tgt = jax.random.split(key, 4)

    # synthetic, deterministic stand-ins for the pretrained model's outputs/params
    hidden = jax.random.normal(k_hid, (B, C, L, D), dtype=jnp.float32) * 0.1
    lm_head_w = jax.random.normal(k_w, (D, V), dtype=jnp.float32) * 0.05

    candidates = jax.random.randint(k_cand, (B, C, L), 1, V, dtype=jnp.int32)
    candidates = candidates.at[:, :, -1].set(PAD_ID)      # trailing padding
    candidates = candidates.at[0, 1, -2].set(PAD_ID)

    tgt_text = jax.random.randint(k_tgt, (B, L), 1, V, dtype=jnp.int32)
    tgt_text = tgt_text.at[:, -2:].set(PAD_ID)

    ref = pw_forward_ref(hidden, lm_head_w, candidates, tgt_text)

    # 1) defaults: auto block_b (=8 -> megacore-splittable), auto tile_v (=256), bf16 probs
    out = pw_forward(hidden, lm_head_w, candidates, tgt_text)
    jax.block_until_ready(out)
    np.testing.assert_allclose(np.asarray(out["score"]), np.asarray(ref["score"]),
                               rtol=1e-4, atol=1e-4)
    np.testing.assert_allclose(np.asarray(out["summary_score"]),
                               np.asarray(ref["summary_score"]), rtol=1e-4, atol=1e-4)
    np.testing.assert_allclose(np.asarray(out["probs"], dtype=np.float32),
                               np.asarray(ref["probs"]), rtol=2e-2, atol=2e-2)

    # 2) multi-tile online softmax (tile_v=128 -> 2 V tiles), probs output skipped
    out2 = pw_forward(hidden, lm_head_w, candidates, tgt_text,
                      tile_v=128, return_probs=False)
    jax.block_until_ready(out2)
    np.testing.assert_allclose(np.asarray(out2["score"]), np.asarray(ref["score"]),
                               rtol=1e-4, atol=1e-4)
    np.testing.assert_allclose(np.asarray(out2["summary_score"]),
                               np.asarray(ref["summary_score"]), rtol=1e-4, atol=1e-4)

    # 3) bf16 exp in the softmax denominator (v6e/v7x EUP relief) — slightly looser tolerance
    out3 = pw_forward(hidden, lm_head_w, candidates, tgt_text,
                      tile_v=128, return_probs=False, exp_in_bf16=True)
    jax.block_until_ready(out3)
    np.testing.assert_allclose(np.asarray(out3["score"]), np.asarray(ref["score"]),
                               rtol=5e-3, atol=5e-3)

    print("KERNEL_OK")
</pallas_src>

<mosaic_0001>
module attributes {stable_mosaic.version = 11 : i64} {
  func.func @kernel(%arg0: i32, %arg1: i32, %arg2: memref<8x3x16x128xbf16, #tpu.memory_space<vmem>>, %arg3: memref<128x256xbf16, #tpu.memory_space<vmem>>, %arg4: memref<8x3x16xi32, #tpu.memory_space<vmem>>, %arg5: memref<8x1xf32, #tpu.memory_space<vmem>>, %arg6: memref<8x16x256xbf16, #tpu.memory_space<vmem>>, %arg7: memref<8x3xf32, #tpu.memory_space<vmem>>, %arg8: memref<8x3x16xf32, #tpu.memory_space<vmem>>, %arg9: memref<8x3x16xf32, #tpu.memory_space<vmem>>, %arg10: memref<8x3x16xf32, #tpu.memory_space<vmem>>) attributes {dimension_semantics = [#tpu.dimension_semantics<parallel>, #tpu.dimension_semantics<arbitrary>], iteration_bounds = array<i64: 2, 1>, scalar_prefetch = 0 : i64, scratch_operands = 3 : i64, tpu.core_type = #tpu.core_type<tc>, window_params = [{transform_indices = @transform_0, window_bounds = array<i64: 8, 3, 16, 128>}, {transform_indices = @transform_1, window_bounds = array<i64: 128, 256>}, {transform_indices = @transform_2, window_bounds = array<i64: 8, 3, 16>}, {transform_indices = @transform_3, window_bounds = array<i64: 8, 1>}, {transform_indices = @transform_4, window_bounds = array<i64: 8, 16, 256>}, {transform_indices = @transform_5, window_bounds = array<i64: 8, 3>}]} {
    %c0_i32 = arith.constant 0 : i32
    %0 = arith.cmpi eq, %arg1, %c0_i32 : i32
    %1 = arith.extui %0 : i1 to i32
    %c0_i32_0 = arith.constant 0 : i32
    %2 = arith.cmpi ne, %1, %c0_i32_0 : i32
    scf.if %2 {
      %cst_36 = arith.constant 0xFF800000 : f32
      %45 = vector.broadcast %cst_36 : f32 to vector<8x3x16xf32>
      %c0_37 = arith.constant 0 : index
      %c0_38 = arith.constant 0 : index
      %c0_39 = arith.constant 0 : index
      %46 = vector.load %arg8[%c0_37, %c0_38, %c0_39] : memref<8x3x16xf32, #tpu.memory_space<vmem>>, vector<8x3x16xf32>
      tpu.vector_store %arg8[%c0_37, %c0_38, %c0_39], %45 {strides = array<i32>} : memref<8x3x16xf32, #tpu.memory_space<vmem>>, vector<8x3x16xf32>,
      %cst_40 = arith.constant 0.000000e+00 : f32
      %47 = vector.broadcast %cst_40 : f32 to vector<8x3x16xf32>
      %c0_41 = arith.constant 0 : index
      %c0_42 = arith.constant 0 : index
      %c0_43 = arith.constant 0 : index
      %48 = vector.load %arg9[%c0_41, %c0_42, %c0_43] : memref<8x3x16xf32, #tpu.memory_space<vmem>>, vector<8x3x16xf32>
      tpu.vector_store %arg9[%c0_41, %c0_42, %c0_43], %47 {strides = array<i32>} : memref<8x3x16xf32, #tpu.memory_space<vmem>>, vector<8x3x16xf32>,
      %cst_44 = arith.constant 0.000000e+00 : f32
      %49 = vector.broadcast %cst_44 : f32 to vector<8x3x16xf32>
      %c0_45 = arith.constant 0 : index
      %c0_46 = arith.constant 0 : index
      %c0_47 = arith.constant 0 : index
      %50 = vector.load %arg10[%c0_45, %c0_46, %c0_47] : memref<8x3x16xf32, #tpu.memory_space<vmem>>, vector<8x3x16xf32>
      tpu.vector_store %arg10[%c0_45, %c0_46, %c0_47], %49 {strides = array<i32>} : memref<8x3x16xf32, #tpu.memory_space<vmem>>, vector<8x3x16xf32>,
    } else {
    }
    %c0 = arith.constant 0 : index
    %c0_1 = arith.constant 0 : index
    %c0_2 = arith.constant 0 : index
    %c0_3 = arith.constant 0 : index
    %3 = vector.load %arg2[%c0, %c0_1, %c0_2, %c0_3] : memref<8x3x16x128xbf16, #tpu.memory_space<vmem>>, vector<8x3x16x128xbf16>
    %4 = vector.shape_cast %3 : vector<8x3x16x128xbf16> to vector<384x128xbf16>
    %c0_4 = arith.constant 0 : index
    %c0_5 = arith.constant 0 : index
    %5 = vector.load %arg3[%c0_4, %c0_5] : memref<128x256xbf16, #tpu.memory_space<vmem>>, vector<128x256xbf16>
    %cst = arith.constant dense<0.000000e+00> : vector<384x256xf32>
    %6 = tpu.matmul %4, %5, %cst {dimension_numbers = #tpu.dot_dimension_numbers<[1], [0], [0], [1], [0, 0, 1, 1], [], []>} : vector<384x128xbf16>, vector<128x256xbf16>, vector<384x256xf32> -> vector<384x256xf32>
    %7 = vector.shape_cast %6 : vector<384x256xf32> to vector<8x48x256xf32>
    %8 = vector.extract_strided_slice %7 {offsets = [0, 0, 0], sizes = [8, 16, 256], strides = [1, 1, 1]} : vector<8x48x256xf32> to vector<8x16x256xf32>
    %9 = arith.truncf %8 : vector<8x16x256xf32> to vector<8x16x256xbf16>
    %c0_6 = arith.constant 0 : index
    %c0_7 = arith.constant 0 : index
    %c0_8 = arith.constant 0 : index
    %10 = vector.load %arg6[%c0_6, %c0_7, %c0_8] : memref<8x16x256xbf16, #tpu.memory_space<vmem>>, vector<8x16x256xbf16>
    tpu.vector_store %arg6[%c0_6, %c0_7, %c0_8], %9 {strides = array<i32>} : memref<8x16x256xbf16, #tpu.memory_space<vmem>>, vector<8x16x256xbf16>,
    %11 = vector.shape_cast %7 : vector<8x48x256xf32> to vector<8x3x16x256xf32>
    %c0_9 = arith.constant 0 : index
    %c0_10 = arith.constant 0 : index
    %c0_11 = arith.constant 0 : index
    %12 = vector.load %arg8[%c0_9, %c0_10, %c0_11] : memref<8x3x16xf32, #tpu.memory_space<vmem>>, vector<8x3x16xf32>
    %cst_12 = arith.constant dense<0xFF800000> : vector<8x3x16xf32>
    %13 = vector.multi_reduction <maximumf>, %11, %cst_12 [3] : vector<8x3x16x256xf32> to vector<8x3x16xf32>
    %14 = arith.maximumf %12, %13 : vector<8x3x16xf32>
    %15 = vector.shape_cast %14 : vector<8x3x16xf32> to vector<8x3x16x1xf32>
    %16 = vector.broadcast %15 : vector<8x3x16x1xf32> to vector<8x3x16x256xf32>
    %17 = arith.subf %11, %16 : vector<8x3x16x256xf32>
    %18 = math.exp %17 : vector<8x3x16x256xf32>
    %c0_13 = arith.constant 0 : index
    %c0_14 = arith.constant 0 : index
    %c0_15 = arith.constant 0 : index
    %19 = vector.load %arg9[%c0_13, %c0_14, %c0_15] : memref<8x3x16xf32, #tpu.memory_space<vmem>>, vector<8x3x16xf32>
    %20 = arith.subf %12, %14 : vector<8x3x16xf32>
    %21 = math.exp %20 : vector<8x3x16xf32>
    %22 = arith.mulf %19, %21 : vector<8x3x16xf32>
    %cst_16 = arith.constant dense<0.000000e+00> : vector<8x3x16xf32>
    %23 = vector.multi_reduction <add>, %18, %cst_16 [3] : vector<8x3x16x256xf32> to vector<8x3x16xf32>
    %24 = arith.addf %22, %23 : vector<8x3x16xf32>
    %c0_17 = arith.constant 0 : index
    %c0_18 = arith.constant 0 : index
    %c0_19 = arith.constant 0 : index
    %25 = vector.load %arg9[%c0_17, %c0_18, %c0_19] : memref<8x3x16xf32, #tpu.memory_space<vmem>>, vector<8x3x16xf32>
    tpu.vector_store %arg9[%c0_17, %c0_18, %c0_19], %24 {strides = array<i32>} : memref<8x3x16xf32, #tpu.memory_space<vmem>>, vector<8x3x16xf32>,
    %c0_20 = arith.constant 0 : index
    %c0_21 = arith.constant 0 : index
    %c0_22 = arith.constant 0 : index
    %26 = vector.load %arg8[%c0_20, %c0_21, %c0_22] : memref<8x3x16xf32, #tpu.memory_space<vmem>>, vector<8x3x16xf32>
    tpu.vector_store %arg8[%c0_20, %c0_21, %c0_22], %14 {strides = array<i32>} : memref<8x3x16xf32, #tpu.memory_space<vmem>>, vector<8x3x16xf32>,
    %c0_23 = arith.constant 0 : index
    %c0_24 = arith.constant 0 : index
    %c0_25 = arith.constant 0 : index
    %27 = vector.load %arg4[%c0_23, %c0_24, %c0_25] : memref<8x3x16xi32, #tpu.memory_space<vmem>>, vector<8x3x16xi32>
    %28 = tpu.iota {dimensions = array<i32: 3>} : vector<1x1x1x256xi32>
    %29 = vector.shape_cast %27 : vector<8x3x16xi32> to vector<8x3x16x1xi32>
    %c256_i32 = arith.constant 256 : i32
    %30 = arith.muli %arg1, %c256_i32 : i32
    %31 = vector.broadcast %30 : i32 to vector<8x3x16x1xi32>
    %32 = arith.subi %29, %31 : vector<8x3x16x1xi32>
    %33 = vector.broadcast %28 : vector<1x1x1x256xi32> to vector<8x3x16x256xi32>
    %34 = vector.broadcast %32 : vector<8x3x16x1xi32> to vector<8x3x16x256xi32>
    %35 = arith.cmpi eq, %33, %34 : vector<8x3x16x256xi32>
    %c0_26 = arith.constant 0 : index
    %c0_27 = arith.constant 0 : index
    %c0_28 = arith.constant 0 : index
    %36 = vector.load %arg10[%c0_26, %c0_27, %c0_28] : memref<8x3x16xf32, #tpu.memory_space<vmem>>, vector<8x3x16xf32>
    %cst_29 = arith.constant 0.000000e+00 : f32
    %37 = vector.broadcast %cst_29 : f32 to vector<8x3x16x256xf32>
    %38 = arith.select %35, %11, %37 : vector<8x3x16x256xi1>, vector<8x3x16x256xf32>
    %cst_30 = arith.constant dense<0.000000e+00> : vector<8x3x16xf32>
    %39 = vector.multi_reduction <add>, %38, %cst_30 [3] : vector<8x3x16x256xf32> to vector<8x3x16xf32>
    %40 = arith.addf %36, %39 : vector<8x3x16xf32>
    %c0_31 = arith.constant 0 : index
    %c0_32 = arith.constant 0 : index
    %c0_33 = arith.constant 0 : index
    %41 = vector.load %arg10[%c0_31, %c0_32, %c0_33] : memref<8x3x16xf32, #tpu.memory_space<vmem>>, vector<8x3x16xf32>
    tpu.vector_store %arg10[%c0_31, %c0_32, %c0_33], %40 {strides = array<i32>} : memref<8x3x16xf32, #tpu.memory_space<vmem>>, vector<8x3x16xf32>,
    %c0_i32_34 = arith.constant 0 : i32
    %42 = arith.cmpi eq, %arg1, %c0_i32_34 : i32
    %43 = arith.extui %42 : i1 to i32
    %c0_i32_35 = arith.constant 0 : i32
    %44 = arith.cmpi ne, %43, %c0_i32_35 : i32
    scf.if %44 {
      %c0_36 = arith.constant 0 : index
      %c0_37 = arith.constant 0 : index
      %c0_38 = arith.constant 0 : index
      %45 = vector.load %arg8[%c0_36, %c0_37, %c0_38] : memref<8x3x16xf32, #tpu.memory_space<vmem>>, vector<8x3x16xf32>
      %c0_39 = arith.constant 0 : index
      %c0_40 = arith.constant 0 : index
      %c0_41 = arith.constant 0 : index
      %46 = vector.load %arg9[%c0_39, %c0_40, %c0_41] : memref<8x3x16xf32, #tpu.memory_space<vmem>>, vector<8x3x16xf32>
      %47 = math.log %46 : vector<8x3x16xf32>
      %48 = arith.addf %45, %47 : vector<8x3x16xf32>
      %c0_42 = arith.constant 0 : index
      %c0_43 = arith.constant 0 : index
      %c0_44 = arith.constant 0 : index
      %49 = vector.load %arg10[%c0_42, %c0_43, %c0_44] : memref<8x3x16xf32, #tpu.memory_space<vmem>>, vector<8x3x16xf32>
      %50 = arith.subf %49, %48 : vector<8x3x16xf32>
      %c0_i32_45 = arith.constant 0 : i32
      %51 = vector.broadcast %c0_i32_45 : i32 to vector<8x3x16xi32>
      %52 = arith.cmpi ne, %27, %51 : vector<8x3x16xi32>
      %53 = arith.extui %52 : vector<8x3x16xi1> to vector<8x3x16xi32>
      %54 = arith.sitofp %53 : vector<8x3x16xi32> to vector<8x3x16xf32>
      %cst_46 = arith.constant dense<0.000000e+00> : vector<8x3xf32>
      %55 = vector.multi_reduction <add>, %54, %cst_46 [2] : vector<8x3x16xf32> to vector<8x3xf32>
      %cst_47 = arith.constant 1.000000e+00 : f32
      %56 = vector.broadcast %cst_47 : f32 to vector<8x3xf32>
      %57 = arith.maximumf %55, %56 : vector<8x3xf32>
      %58 = arith.mulf %57, %57 : vector<8x3xf32>
      %59 = arith.mulf %50, %54 : vector<8x3x16xf32>
      %cst_48 = arith.constant dense<0.000000e+00> : vector<8x3xf32>
      %60 = vector.multi_reduction <add>, %59, %cst_48 [2] : vector<8x3x16xf32> to vector<8x3xf32>
      %61 = arith.divf %60, %58 : vector<8x3xf32>
      %c0_49 = arith.constant 0 : index
      %c0_50 = arith.constant 0 : index
      %62 = vector.load %arg5[%c0_49, %c0_50] : memref<8x1xf32, #tpu.memory_space<vmem>>, vector<8x1xf32>
      %63 = vector.broadcast %62 : vector<8x1xf32> to vector<8x3xf32>
      %64 = arith.subf %55, %63 : vector<8x3xf32>
      %65 = math.absf %64 : vector<8x3xf32>
      %66 = math.sqrt %65 : vector<8x3xf32>
      %67 = arith.negf %66 : vector<8x3xf32>
      %68 = math.exp %67 : vector<8x3xf32>
      %cst_51 = arith.constant 1.000000e+00 : f32
      %69 = vector.broadcast %cst_51 : f32 to vector<8x3xf32>
      %70 = arith.addf %69, %68 : vector<8x3xf32>
      %71 = arith.divf %69, %70 : vector<8x3xf32>
      %cst_52 = arith.constant 1.500000e+00 : f32
      %72 = vector.broadcast %cst_52 : f32 to vector<8x3xf32>
      %73 = arith.subf %72, %71 : vector<8x3xf32>
      %74 = arith.mulf %61, %73 : vector<8x3xf32>
      %c0_53 = arith.constant 0 : index
      %c0_54 = arith.constant 0 : index
      %75 = vector.load %arg7[%c0_53, %c0_54] : memref<8x3xf32, #tpu.memory_space<vmem>>, vector<8x3xf32>
      tpu.vector_store %arg7[%c0_53, %c0_54], %74 {strides = array<i32>} : memref<8x3xf32, #tpu.memory_space<vmem>>, vector<8x3xf32>,
    } else {
    }
    return
  }
  func.func @transform_0(%arg0: i32, %arg1: i32) -> (i32, i32, i32, i32) {
    %c0_i32 = arith.constant 0 : i32
    %c0_i32_0 = arith.constant 0 : i32
    %c0_i32_1 = arith.constant 0 : i32
    %c0_i32_2 = arith.constant 0 : i32
    return %arg0, %c0_i32, %c0_i32_0, %c0_i32_1 : i32, i32, i32, i32
  }
  func.func @transform_1(%arg0: i32, %arg1: i32) -> (i32, i32) {
    %c0_i32 = arith.constant 0 : i32
    %c0_i32_0 = arith.constant 0 : i32
    return %c0_i32, %arg1 : i32, i32
  }
  func.func @transform_2(%arg0: i32, %arg1: i32) -> (i32, i32, i32) {
    %c0_i32 = arith.constant 0 : i32
    %c0_i32_0 = arith.constant 0 : i32
    %c0_i32_1 = arith.constant 0 : i32
    return %arg0, %c0_i32, %c0_i32_0 : i32, i32, i32
  }
  func.func @transform_3(%arg0: i32, %arg1: i32) -> (i32, i32) {
    %c0_i32 = arith.constant 0 : i32
    %c0_i32_0 = arith.constant 0 : i32
    return %arg0, %c0_i32 : i32, i32
  }
  func.func @transform_4(%arg0: i32, %arg1: i32) -> (i32, i32, i32) {
    %c0_i32 = arith.constant 0 : i32
    %c0_i32_0 = arith.constant 0 : i32
    return %arg0, %c0_i32, %arg1 : i32, i32, i32
  }
  func.func @transform_5(%arg0: i32, %arg1: i32) -> (i32, i32) {
    %c0_i32 = arith.constant 0 : i32
    %c0_i32_0 = arith.constant 0 : i32
    return %arg0, %c0_i32 : i32, i32
  }
}

</mosaic_0001>

<bundles_post_ra>
// kernel: tpu_custom_call.1
= control target key start
LH: loop header
LB: loop body
LE: loop exit
PB: predicated region body
PF: predicated region fallthrough
CT: control target
= control target key end

     0   :  { %11 = vsyncpa [#allocation6], 0  ;;  %s7045_s0 = inlined_call_operand.hbm [shape: bf16[16,3,16,128], index: 0, kind: input, shape index: {}]   ;;  %s7046_s1 = inlined_call_operand.vmem [shape: bf16[128,256], index: 1, kind: input, shape index: {}]   ;;  %s7047_s2 = inlined_call_operand.vmem [shape: s32[16,3,16], index: 2, kind: input, shape index: {}]   ;;  %s7048_s3 = inlined_call_operand.vmem [shape: f32[16,1], index: 3, kind: input, shape index: {}]   ;;  %s7049_s4 = inlined_call_operand.hbm [shape: bf16[16,16,256], index: 4, kind: output, shape index: {0}]   ;;  %s7050_s5 = inlined_call_operand.vmem [shape: f32[16,3], index: 5, kind: output, shape index: {1}]  }
   0x1   :  { %13 = vsyncpa [#allocation6 + $0x1], 0 }
   0x2   :  { %14 = vsyncpa [#allocation7], 0 }
   0x3   :  { %16 = vsyncpa [#allocation7 + $0x1], 0  ;;  %s4809_s18 = smov 0   ;;  %s4811_s19 = smov 0  }
   0x4   :  { %s4813_s20 = smov 0   ;;  %s4815_s21 = smov 0  }
   0x5   :  { %s4817_s22 = smov 0   ;;  %s4819_s23 = smov 0  }
   0x6 LB: > { %s4112_s24 = sadd.s32 4294967295, %s4768_s23   ;;  %s4113_s25 = sadd.s32 4294967294, %s4768_s23   ;;  %s4768_s23 = sphi %s4819_s23, %s22_s23   ;;  %s4764_s22 = sphi %s4817_s22, %s7490_s22   ;;  %s4760_s21 = sphi %s4815_s21, %s7489_s21   ;;  %s4756_s20 = sphi %s4813_s20, %s7488_s20   ;;  %s4752_s19 = sphi %s4811_s19, %s7487_s19   ;;  %s4748_s18 = sphi %s4809_s18, %s7486_s18  }
   0x7   : > { %s34_s26 = sadd.s32 1, %s4764_s22  ;;  %s41_s27 = sadd.s32 1, %s4756_s20 }
   0x8   : > { %p36_p0 = scmp.ge.s32.totalorder %s34_s26, 2  ;;  %p48_p1 = scmp.ne.s32.totalorder %s4756_s20, %s4752_s19 }
   0x9   : > { %p49_p2 = scmp.eq.s32.totalorder %s4768_s23, 0  ;;  %p54_p3 = scmp.ne.s32.totalorder %s4752_s19, %s4748_s18 }
   0xa   : > { %s7492_s26 = smov (%p36_p0, %s34_s26), 0  ;;  %p55_p5 = scmp.eq.s32.totalorder %s4112_s24, 0 }
   0xb   : > { %p4850_p4 = por %p49_p2, %p48_p1  ;;  %s38_s29 = ssub.s32 %s4764_s22, %s7492_s26 }
   0xc   : > { %p158_p6 = scmp.eq.s32.totalorder %s4112_s24, 1  ;;  %p39_p7 = scmp.eq.s32.totalorder %s38_s29, 0 }
   0xd   : > { %p4856_p8 = por %p55_p5, %p54_p3  ;;  %p164_p10 = scmp.eq.s32.totalorder %s4113_s25, 1 }
   0xe   : > { %p4860_p9 = por %p158_p6, %p48_p1  ;;  %p4253_p13 = scmp.lt.s32.totalorder %s4768_s23, 2 }
   0xf   : > { %s4865_s7 = scalar_select %p39_p7, %s4756_s20, %s41_s27  }
  0x10   : > { %s7183_s6 = scalar_select %p4860_p9, 1, 0 }
  0x11   : > { %p4867_p11 = por %p164_p10, %p54_p3  ;;  %s219_s9 = sand.u32 1, %s4756_s20  }
  0x12   : > { %s4238_s10 = smul.u32 192, %s219_s9  ;;  %p4877_p0 = pnand %p4253_p13, %p4850_p4 }
  0x13   : > { %s7184_s8 = scalar_select %p4867_p11, 1, 0 }
  0x14   : > { %s4239_s11 = smul.u32 3072, %s4764_s22  ;;  %s223_s16 = scalar_lea.vmem [#allocation5], %s4238_s10 }
  0x15   : > { %s231_s17 = sshll.u32 %s223_s16, 4  ;;  %s4889_s24 = scalar_lea.sflag [#allocation6], %s219_s9  ;;  %s4886_s17 = int_to_ptr.vmem [resolvable:$true] %s231_s17 }
  0x16   : > { %s4884_s15 = scalar_lea.hbm %s7045_s0, %s4239_s11  ;;  %p4658_p3 = pneg %p4877_p0 }
  0x17   : > { %s4656_s25 = scalar_lea.hbm %s4884_s15, 3072  ;;  %s4661_s29 = scalar_lea.hbm %s7045_s0, 6144 }
  0x18   : > { %p4657_p2 = scmp.ne.s32.totalorder %s4884_s15, %s4656_s25  ;;  %p4662_p6 = scmp.lt.u32.totalorder %s4884_s15, %s7045_s0 }
  0x19   : > { %p4663_p7 = scmp.lt.u32.totalorder %s4661_s29, %s4656_s25  ;;  %p4665_p13 = scmp.lt.u32.totalorder %s4656_s25, %s4884_s15 }
  0x1a   : > { %p4659_p4 = pnand %p4658_p3, %p4657_p2 }
  0x1b   : > { %p4664_p10 = por %p4663_p7, %p4662_p6 }
  0x1c   : > { %p4660_p5 = pneg %p4659_p4 }
  0x1d   : > { %p4666_p12 = por %p4665_p13, %p4664_p10 }
  0x1f   : > { %p4667_p1 = pnand %p4666_p12, %p4660_p5 }
  0x21   : > { %4670 = shalt.err (!%p4667_p1)
}
  0x22   : > { %s4671_s9 = scalar_lea.vmem %s4886_s17, 3072  ;;  %s4770_s13 = smov [#allocation5]  }
  0x23   : > { %p4672_p2 = scmp.ne.s32.totalorder %s4886_s17, %s4671_s9  ;;  %s4676_s14 = sshll.u32 %s4770_s13, 4  ;;  %s4677_s14 = int_to_ptr.vmem [resolvable:$false] %s4676_s14 }
  0x24   : > { %s4678_s16 = scalar_lea.vmem %s4677_s14, 6144  ;;  %p4679_p9 = scmp.lt.s32.totalorder %s4886_s17, %s4677_s14 }
  0x25   : > { %p4674_p4 = pnand %p4672_p2, %p4658_p3  ;;  %p4680_p6 = scmp.lt.s32.totalorder %s4678_s16, %s4671_s9 }
  0x27   : > { %p4675_p11 = pneg %p4674_p4  ;;  %p4681_p7 = por %p4680_p6, %p4679_p9 }
  0x29   : > { %p4682_p10 = pnand %p4681_p7, %p4675_p11 }
  0x2b   : > { %4685 = shalt.err (!%p4682_p10)
}
  0x2c   : > { %s4771_s25 = smov 64   ;;  %s4772_s27 = smov 4  }
  0x2d   : > { %4248 = dma.hbm_to_vmem [thread:$0]  (!%p4877_p0), %s4884_s15, 3072, %s4886_s17, %s4889_s24, %s4771_s25, %s4771_s25, %s4772_s27  }
  0x2e   : > { %p255_p12 = scmp.lt.s32.totalorder %s4768_s23, 3  ;;  %p7186_p1 = scmp.ge.s32.totalorder %s4768_s23, 1 }
  0x30   : > { %p256_p3 = pnand %p7186_p1, %p255_p12 }
  0x32   : > { %259 = sbr.rel (%p256_p3) target bundleno = 1244 (0x4dc), region = 36 }
  0x39   : > { %s4921_s28 = sand.u32 1, %s4752_s19  }
  0x3a   : > { %s4240_s29 = smul.u32 192, %s4921_s28  ;;  %s262_s11 = scalar_lea.sflag [#allocation6], %s4921_s28 }
  0x3c   : > { %s4925_s10 = scalar_lea.vmem [#allocation5], %s4240_s29 }
  0x3d   : > { %4739 = dma.done.wait (%p4856_p8), %s262_s11, 3072  }
  0x3e   : > { %4741 = vsyncadd (%p4856_p8), %s262_s11, 4294964224  ;;  %v4773_v0 = vmov 0   ;;  %v4312_v1 = vld [vmem:[%s7046_s1 + $0x4] ss:$8 sps:$4 sm:$0xff]   ;;  %v4314_v2 = vld [vmem:[%s7046_s1] ss:$8 sps:$4 sm:$0xff]   ;;  %v1236_v8 = vlaneseq }
  0x3f   : > { %683 = vmatprep.mubr.bf16.mxu0 %v4773_v0  ;;  %803 = vmatprep.mubr.bf16.mxu1 %v4773_v0  ;;  %v4315_v3 = vld [vmem:[%s7046_s1 + $0x14] ss:$8 sps:$4 sm:$0xff]   ;;  %v4317_v4 = vld [vmem:[%s7046_s1 + $0x10] ss:$8 sps:$4 sm:$0xff]   ;;  %s4122_s16 = sshll.u32 %s4760_s21, 3  ;;  %v4336_v26 = vld [vmem:[%s4925_s10] sm:$0xff]  }
  0x40   : > { %4310 = vset.pattern.permute.xlu1 %v4773_v0  ;;  %4311 = vset.pattern.permute.xlu0 %v4773_v0  ;;  %v4318_v5 = vld [vmem:[%s7046_s1 + $0x24] ss:$8 sps:$4 sm:$0xff]   ;;  %p318_p8 = scmp.lt.s32.totalorder %s4122_s16, 15  ;;  %v4320_v6 = vld [vmem:[%s7046_s1 + $0x20] ss:$8 sps:$4 sm:$0xff]   ;;  %v4964_v11 = vshrl.u32 %v1236_v8, 7 }
  0x41   : > { %651 = vmatprep.subr.bf16.mxu0 %v4312_v1  ;;  %4222 = vmatprep.subr.bf16.mxu1 %v4312_v1  ;;  %v4321_v7 = vld [vmem:[%s7046_s1 + $0x34] ss:$8 sps:$4 sm:$0xff]   ;;  %v4323_v9 = vld [vmem:[%s7046_s1 + $0x30] ss:$8 sps:$4 sm:$0xff]   ;;  %v4324_v10 = vld [vmem:[%s7046_s1 + $0x44] ss:$8 sps:$4 sm:$0xff]  }
  0x42   : > { %652 = vmatpush1.bf16.msra.mxu0 %v4314_v2  ;;  %4230 = vmatpush1.bf16.msra.mxu1 %v4314_v2  ;;  %s7494_s16 = smov (!%p318_p8, %s4122_s16), 15  ;;  %7187 = vst [vmem:[#allocation11_spill] sm:$0xff] %v4964_v11  ;;  %v4326_v12 = vld [vmem:[%s7046_s1 + $0x40] ss:$8 sps:$4 sm:$0xff]   ;;  %v4327_v13 = vld [vmem:[%s7046_s1 + $0x54] ss:$8 sps:$4 sm:$0xff]  }
  0x43   : > { %653 = vmatprep.subr.bf16.mxu0 %v4315_v3  ;;  %4223 = vmatprep.subr.bf16.mxu1 %v4315_v3  ;;  %s4123_s13 = sshll.u32 %s7494_s16, 2  ;;  %v4973_v14 = vsub.s32 0, %v4964_v11  ;;  %v4329_v15 = vld [vmem:[%s7046_s1 + $0x50] ss:$8 sps:$4 sm:$0xff]   ;;  %v4330_v16 = vld [vmem:[%s7046_s1 + $0x64] ss:$8 sps:$4 sm:$0xff]  }
  0x44   : > { %s4981_s17 = scalar_lea.vmem %s7047_s2, %s4123_s13  ;;  %v4987_v17 = vsub.s32 1, %v4964_v11  ;;  %v4332_v19 = vld [vmem:[%s7046_s1 + $0x60] ss:$8 sps:$4 sm:$0xff]   ;;  %v4333_v21 = vld [vmem:[%s7046_s1 + $0x74] ss:$8 sps:$4 sm:$0xff]   ;;  %v5007_v29 = vsub.s32 2, %v4964_v11 }
  0x45   : > { %7188 = vst [vmem:[#allocation12_spill] sm:$0xff] %v4973_v14  ;;  %v2539_v18 = vld [vmem:[%s4981_s17] sm:$0x7]  ;;  %v4335_v23 = vld [vmem:[%s7046_s1 + $0x70] ss:$8 sps:$4 sm:$0xff]   ;;  %v4338_v31 = vld [vmem:[%s4925_s10 + $0x8] sm:$0xff]  }
  0x46   : > { %654 = vmatpush1.bf16.msra.mxu0 %v4317_v4  ;;  %4231 = vmatpush1.bf16.msra.mxu1 %v4317_v4  ;;  %7189 = vst [vmem:[#allocation13_spill] sm:$0xff] %v4987_v17  ;;  %v2551_v20 = vrot.slane %v2539_v18, %v4973_v14  ;;  %v2562_v22 = vrot.slane %v2539_v18, %v4987_v17  ;;  %v2540_v24 = vld [vmem:[%s4981_s17 + $0x4] sm:$0x7]  ;;  %7190 = vst [vmem:[#allocation14_spill] sm:$0xff] %v5007_v29  ;;  %v4339_v32 = vld [vmem:[%s4925_s10 + $0x68] sm:$0xff]   ;;  %p323_p9 = scmp.lt.s32.totalorder %s4760_s21, 1 }
  0x47   : > { %655 = vmatprep.subr.bf16.mxu0 %v4318_v5  ;;  %4224 = vmatprep.subr.bf16.mxu1 %v4318_v5  ;;  %v2584_v25 = vrot.slane %v2540_v24, %v4973_v14  ;;  %v4337_v27 = vld [vmem:[%s4925_s10 + $0x60] sm:$0xff]   ;;  %v2595_v28 = vrot.slane %v2540_v24, %v4987_v17  ;;  %v2573_v30 = vrot.slane %v2539_v18, %v5007_v29  ;;  %v2541_v34 = vld [vmem:[%s4981_s17 + $0x8] sm:$0x7]  ;;  %v4340_v36 = vld [vmem:[%s4925_s10 + $0x10] sm:$0xff]   ;;  %s4221_s30 = sshll.u32 %s4760_s21, 11  ;;  %s3942_s27 = scalar_lea.sflag [#allocation7], %s4921_s28 }
  0x48   : > { %2553 = vbcast.lane.b32.xlu1 %v2551_v20, 256  ;;  %2557 = vbcast.lane.b32.xlu0 %v2551_v20, 264  ;;  %v2606_v33 = vrot.slane %v2540_v24, %v5007_v29  ;;  %v2617_v35 = vrot.slane %v2541_v34, %v4973_v14  ;;  %v4341_v37 = vld [vmem:[%s4925_s10 + $0x70] sm:$0xff]   ;;  %v2628_v38 = vrot.slane %v2541_v34, %v4987_v17  ;;  %v2542_v40 = vld [vmem:[%s4981_s17 + $0xc] sm:$0x7]  ;;  %v4342_v41 = vld [vmem:[%s4925_s10 + $0x18] sm:$0xff]   ;;  %s6978_s13 = scalar_lea.hbm %s7049_s4, %s4221_s30 }
  0x49   : > { %v2639_v39 = vrot.slane %v2541_v34, %v5007_v29  ;;  %v4343_v42 = vld [vmem:[%s4925_s10 + $0x78] sm:$0xff]   ;;  %v2650_v43 = vrot.slane %v2542_v40, %v4973_v14  ;;  %v2661_v44 = vrot.slane %v2542_v40, %v4987_v17  ;;  %v4344_v45 = vld [vmem:[%s4925_s10 + $0x20] sm:$0xff]   ;;  %v2672_v47 = vrot.slane %v2542_v40, %v5007_v29  ;;  %v2543_v48 = vld [vmem:[%s4981_s17 + $0x10] sm:$0x7]  ;;  %s6743_s11 = scalar_select %p323_p9, %s4760_s21, 1 }
  0x4a   : > { %656 = vmatpush1.bf16.msra.mxu0 %v4320_v6  ;;  %4232 = vmatpush1.bf16.msra.mxu1 %v4320_v6  ;;  %v4345_v46 = vld [vmem:[%s4925_s10 + $0x80] sm:$0xff]   ;;  %v2683_v49 = vrot.slane %v2543_v48, %v4973_v14  ;;  %v4346_v50 = vld [vmem:[%s4925_s10 + $0x28] sm:$0xff]   ;;  %v2694_v52 = vrot.slane %v2543_v48, %v4987_v17  ;;  %v2705_v53 = vrot.slane %v2543_v48, %v5007_v29  ;;  %v2544_v54 = vld [vmem:[%s4981_s17 + $0x14] sm:$0x7]  ;;  %p7483_p0 = scmp.ne.s32.totalorder %s7183_s6, 0 }
  0x4b   : > { %657 = vmatprep.subr.bf16.mxu0 %v4321_v7  ;;  %4225 = vmatprep.subr.bf16.mxu1 %v4321_v7  ;;  %v4347_v51 = vld [vmem:[%s4925_s10 + $0x88] sm:$0xff]   ;;  %v4348_v55 = vld [vmem:[%s4925_s10 + $0x30] sm:$0xff]   ;;  %v2716_v57 = vrot.slane %v2544_v54, %v4973_v14  ;;  %v4350_v58 = vld [vmem:[%s4925_s10 + $0x38] sm:$0xff]   ;;  %v2727_v60 = vrot.slane %v2544_v54, %v4987_v17  ;;  %v2738_v61 = vrot.slane %v2544_v54, %v5007_v29  ;;  %s4124_s12 = sshll.u32 %s6743_s11, 3 }
  0x4c   : > { %2564 = vbcast.lane.b32.xlu1 %v2562_v22, 256  ;;  %2590 = vbcast.lane.b32.xlu0 %v2584_v25, 264  ;;  %v4349_v56 = vld [vmem:[%s4925_s10 + $0x90] sm:$0xff]   ;;  %v4351_v59 = vld [vmem:[%s4925_s10 + $0x98] sm:$0xff]   ;;  %v4352_v63 = vld [vmem:[%s4925_s10 + $0x40] sm:$0xff]   ;;  %s326_s24 = scalar_lea.vmem %s7048_s3, %s4124_s12 }
  0x4d   : > { %v2545_v62 = vld [vmem:[%s4981_s17 + $0x18] sm:$0x7]  ;;  %v4353_v1 = vld [vmem:[%s4925_s10 + $0xa0] sm:$0xff]   ;;  %v4354_v4 = vld [vmem:[%s4925_s10 + $0x48] sm:$0xff]  }
  0x4e   : > { %658 = vmatpush1.bf16.msra.mxu0 %v4323_v9  ;;  %4233 = vmatpush1.bf16.msra.mxu1 %v4323_v9  ;;  %v2749_v2 = vrot.slane %v2545_v62, %v4973_v14  ;;  %v2760_v3 = vrot.slane %v2545_v62, %v4987_v17  ;;  %v4355_v5 = vld [vmem:[%s4925_s10 + $0xa8] sm:$0xff]   ;;  %v2771_v6 = vrot.slane %v2545_v62, %v5007_v29  ;;  %v2546_v7 = vld [vmem:[%s4981_s17 + $0x1c] sm:$0x7] }
  0x4f   : > { %659 = vmatprep.subr.bf16.mxu0 %v4324_v10  ;;  %4226 = vmatprep.subr.bf16.mxu1 %v4324_v10  ;;  %v2782_v9 = vrot.slane %v2546_v7, %v4973_v14  ;;  %v4356_v10 = vld [vmem:[%s4925_s10 + $0x50] sm:$0xff]   ;;  %v4359_v18 = vld [vmem:[%s4925_s10 + $0xb8] sm:$0xff]  }
  0x50   : > { %2568 = vbcast.lane.b32.xlu1 %v2562_v22, 264  ;;  %2601 = vbcast.lane.b32.xlu0 %v2595_v28, 264 }
  0x52   : > { %660 = vmatpush1.bf16.msra.mxu0 %v4326_v12  ;;  %4234 = vmatpush1.bf16.msra.mxu1 %v4326_v12  ;;  %v4357_v12 = vld [vmem:[%s4925_s10 + $0xb0] sm:$0xff]  }
  0x53   : > { %661 = vmatprep.subr.bf16.mxu0 %v4327_v13  ;;  %4227 = vmatprep.subr.bf16.mxu1 %v4327_v13  ;;  %v2793_v13 = vrot.slane %v2546_v7, %v4987_v17 }
  0x54   : > { %2586 = vbcast.lane.b32.xlu1 %v2584_v25, 256  ;;  %2579 = vbcast.lane.b32.xlu0 %v2573_v30, 264 }
  0x56   : > { %662 = vmatpush1.bf16.msra.mxu0 %v4329_v15  ;;  %4235 = vmatpush1.bf16.msra.mxu1 %v4329_v15  ;;  %v2804_v15 = vrot.slane %v2546_v7, %v5007_v29 }
  0x57   : > { %663 = vmatprep.subr.bf16.mxu0 %v4330_v16  ;;  %4228 = vmatprep.subr.bf16.mxu1 %v4330_v16  ;;  %v4358_v16 = vld [vmem:[%s4925_s10 + $0x58] sm:$0xff]   ;;  %s4121_s10 = sshll.u32 %s4921_s28, 7 }
  0x58   : > { %2597 = vbcast.lane.b32.xlu1 %v2595_v28, 256  ;;  %2612 = vbcast.lane.b32.xlu0 %v2606_v33, 264  ;;  %s5183_s16 = scalar_lea.vmem [#allocation8], %s4121_s10  ;;  %s4776_s10 = smov [#allocation8]  }
  0x59   : > { %s3962_s25 = sshll.u32 %s5183_s16, 4  ;;  %s4690_s15 = sshll.u32 %s4776_s10, 4  ;;  %s6981_s25 = int_to_ptr.vmem [resolvable:$true] %s3962_s25  ;;  %s4691_s15 = int_to_ptr.vmem [resolvable:$false] %s4690_s15 }
  0x5a   : > { %664 = vmatpush1.bf16.msra.mxu0 %v4332_v19  ;;  %4236 = vmatpush1.bf16.msra.mxu1 %v4332_v19  ;;  %s4686_s29 = scalar_lea.vmem %s6981_s25, 2048  ;;  %s4692_s21 = scalar_lea.vmem %s4691_s15, 4096 }
  0x5b   : > { %665 = vmatprep.subr.bf16.mxu0 %v4333_v21  ;;  %4229 = vmatprep.subr.bf16.mxu1 %v4333_v21  ;;  %p4687_p11 = scmp.ne.s32.totalorder %s6981_s25, %s4686_s29  ;;  %p4693_p2 = scmp.lt.s32.totalorder %s6981_s25, %s4691_s15 }
  0x5c   : > { %2575 = vbcast.lane.b32.xlu1 %v2573_v30, 256  ;;  %2623 = vbcast.lane.b32.xlu0 %v2617_v35, 264  ;;  %p4694_p4 = scmp.lt.s32.totalorder %s4692_s21, %s4686_s29 }
  0x5d   : > { %p4688_p5 = pnand %p4687_p11, %p7483_p0 }
  0x5e   : > { %666 = vmatpush1.bf16.msra.mxu0 %v4335_v23  ;;  %4237 = vmatpush1.bf16.msra.mxu1 %v4335_v23  ;;  %p4695_p6 = por %p4694_p4, %p4693_p2 }
  0x5f   : > { %p4689_p13 = pneg %p4688_p5 }
  0x60   : > { %2608 = vbcast.lane.b32.xlu1 %v2606_v33, 256  ;;  %2634 = vbcast.lane.b32.xlu0 %v2628_v38, 264 }
  0x61   : > { %684 = vmatmul.mubr.bf16.vlgmr.msra.gmra.mrb[0].mxu0 %v4336_v26  ;;  %804 = vmatmul.mubr.bf16.vlgmr.msra.gmra.mrb[0].mxu1 %v4337_v27  ;;  %p4696_p7 = pnand %p4695_p6, %p4689_p13 }
  0x62   : > { %693 = vmatprep.mubr.bf16.mxu0 %v4773_v0  ;;  %813 = vmatprep.mubr.bf16.mxu1 %v4773_v0 }
  0x64   : > { %2619 = vbcast.lane.b32.xlu1 %v2617_v35, 256  ;;  %2645 = vbcast.lane.b32.xlu0 %v2639_v39, 264 }
  0x68   : > { %2630 = vbcast.lane.b32.xlu1 %v2628_v38, 256  ;;  %2656 = vbcast.lane.b32.xlu0 %v2650_v43, 264 }
  0x69   : > { %694 = vmatmul.mubr.bf16.gmra.mrb[4].mxu0 %v4338_v31  ;;  %814 = vmatmul.mubr.bf16.gmra.mrb[4].mxu1 %v4339_v32 }
  0x6a   : > { %703 = vmatprep.mubr.bf16.mxu0 %v4773_v0  ;;  %823 = vmatprep.mubr.bf16.mxu1 %v4773_v0 }
  0x6c   : > { %2641 = vbcast.lane.b32.xlu1 %v2639_v39, 256  ;;  %2667 = vbcast.lane.b32.xlu0 %v2661_v44, 264 }
  0x70   : > { %2652 = vbcast.lane.b32.xlu1 %v2650_v43, 256  ;;  %2678 = vbcast.lane.b32.xlu0 %v2672_v47, 264  ;;  %v5126_v43 = vand.u32 127, %v1236_v8 }
  0x71   : > { %704 = vmatmul.mubr.bf16.gmra.mrb[8].mxu0 %v4340_v36  ;;  %824 = vmatmul.mubr.bf16.gmra.mrb[8].mxu1 %v4341_v37 }
  0x72   : > { %713 = vmatprep.mubr.bf16.mxu0 %v4773_v0  ;;  %833 = vmatprep.mubr.bf16.mxu1 %v4773_v0 }
  0x74   : > { %2663 = vbcast.lane.b32.xlu1 %v2661_v44, 256  ;;  %2689 = vbcast.lane.b32.xlu0 %v2683_v49, 264 }
  0x78   : > { %2674 = vbcast.lane.b32.xlu1 %v2672_v47, 256  ;;  %2700 = vbcast.lane.b32.xlu0 %v2694_v52, 264 }
  0x79   : > { %714 = vmatmul.mubr.bf16.gmra.mrb[12].mxu0 %v4342_v41  ;;  %834 = vmatmul.mubr.bf16.gmra.mrb[12].mxu1 %v4343_v42 }
  0x7a   : > { %723 = vmatprep.mubr.bf16.mxu0 %v4773_v0  ;;  %843 = vmatprep.mubr.bf16.mxu1 %v4773_v0 }
  0x7c   : > { %2685 = vbcast.lane.b32.xlu1 %v2683_v49, 256  ;;  %2711 = vbcast.lane.b32.xlu0 %v2705_v53, 264 }
  0x80   : > { %2696 = vbcast.lane.b32.xlu1 %v2694_v52, 256  ;;  %2722 = vbcast.lane.b32.xlu0 %v2716_v57, 264 }
  0x81   : > { %724 = vmatmul.mubr.bf16.gmra.mrb[16].mxu0 %v4344_v45  ;;  %844 = vmatmul.mubr.bf16.gmra.mrb[16].mxu1 %v4345_v46  ;;  %v5129_v45 = vadd.s32 128, %v5126_v43 }
  0x82   : > { %733 = vmatprep.mubr.bf16.mxu0 %v4773_v0  ;;  %853 = vmatprep.mubr.bf16.mxu1 %v4773_v0 }
  0x84   : > { %2707 = vbcast.lane.b32.xlu1 %v2705_v53, 256  ;;  %2733 = vbcast.lane.b32.xlu0 %v2727_v60, 264 }
  0x88   : > { %2718 = vbcast.lane.b32.xlu1 %v2716_v57, 256  ;;  %2744 = vbcast.lane.b32.xlu0 %v2738_v61, 264 }
  0x89   : > { %734 = vmatmul.mubr.bf16.gmra.mrb[20].mxu0 %v4346_v50  ;;  %854 = vmatmul.mubr.bf16.gmra.mrb[20].mxu1 %v4347_v51 }
  0x8a   : > { %743 = vmatprep.mubr.bf16.mxu0 %v4773_v0  ;;  %863 = vmatprep.mubr.bf16.mxu1 %v4773_v0 }
  0x8c   : > { %2729 = vbcast.lane.b32.xlu1 %v2727_v60, 256  ;;  %2755 = vbcast.lane.b32.xlu0 %v2749_v2, 264 }
  0x90   : > { %2740 = vbcast.lane.b32.xlu1 %v2738_v61, 256  ;;  %2766 = vbcast.lane.b32.xlu0 %v2760_v3, 264 }
  0x91   : > { %744 = vmatmul.mubr.bf16.gmra.mrb[24].mxu0 %v4348_v55  ;;  %864 = vmatmul.mubr.bf16.gmra.mrb[24].mxu1 %v4349_v56 }
  0x92   : > { %753 = vmatprep.mubr.bf16.mxu0 %v4773_v0  ;;  %873 = vmatprep.mubr.bf16.mxu1 %v4773_v0 }
  0x94   : > { %2751 = vbcast.lane.b32.xlu1 %v2749_v2, 256  ;;  %2777 = vbcast.lane.b32.xlu0 %v2771_v6, 264 }
  0x98   : > { %2762 = vbcast.lane.b32.xlu1 %v2760_v3, 256  ;;  %2788 = vbcast.lane.b32.xlu0 %v2782_v9, 264 }
  0x99   : > { %754 = vmatmul.mubr.bf16.gmra.mrb[28].mxu0 %v4350_v58  ;;  %874 = vmatmul.mubr.bf16.gmra.mrb[28].mxu1 %v4351_v59 }
  0x9a   : > { %763 = vmatprep.mubr.bf16.mxu0 %v4773_v0  ;;  %883 = vmatprep.mubr.bf16.mxu1 %v4773_v0 }
  0x9c   : > { %2773 = vbcast.lane.b32.xlu1 %v2771_v6, 256  ;;  %2799 = vbcast.lane.b32.xlu0 %v2793_v13, 264 }
  0xa0   : > { %2784 = vbcast.lane.b32.xlu1 %v2782_v9, 256  ;;  %2810 = vbcast.lane.b32.xlu0 %v2804_v15, 264 }
  0xa1   : > { %764 = vmatmul.mubr.bf16.gmra.mrb[32].mxu0 %v4352_v63  ;;  %884 = vmatmul.mubr.bf16.gmra.mrb[32].mxu1 %v4353_v1 }
  0xa2   : > { %773 = vmatprep.mubr.bf16.mxu0 %v4773_v0  ;;  %893 = vmatprep.mubr.bf16.mxu1 %v4773_v0 }
  0xa4   : > { %2795 = vbcast.lane.b32.xlu1 %v2793_v13, 256 }
  0xa8   : > { %2806 = vbcast.lane.b32.xlu1 %v2804_v15, 256 }
  0xa9   : > { %774 = vmatmul.mubr.bf16.gmra.mrb[36].mxu0 %v4354_v4  ;;  %894 = vmatmul.mubr.bf16.gmra.mrb[36].mxu1 %v4355_v5 }
  0xaa   : > { %783 = vmatprep.mubr.bf16.mxu0 %v4773_v0  ;;  %903 = vmatprep.mubr.bf16.mxu1 %v4773_v0 }
  0xb1   : > { %784 = vmatmul.mubr.bf16.gmra.mrb[40].mxu0 %v4356_v10  ;;  %904 = vmatmul.mubr.bf16.gmra.mrb[40].mxu1 %v4357_v12 }
  0xb2   : > { %793 = vmatprep.mubr.bf16.mxu0 %v4773_v0  ;;  %913 = vmatprep.mubr.bf16.mxu1 %v4773_v0 }
  0xb9   : > { %794 = vmatmul.mubr.bf16.gmra.mrb[44].mxu0 %v4358_v16  ;;  %914 = vmatmul.mubr.bf16.gmra.mrb[44].mxu1 %v4359_v18 }
  0xba   : > { %v2554_v19 = vpop.permute.xlu1 %2553  ;;  %v5083_v22 = vpop.permute.xlu0 %2557 }
  0xbb   : > { %vm2862_vm1 = vcmp.eq.s32.totalorder %v5126_v43, %v2554_v19  ;;  %vm2863_vm3 = vcmp.eq.s32.totalorder %v5129_v45, %v2554_v19  ;;  %vm2864_vm5 = vcmp.eq.s32.totalorder %v5126_v43, %v5083_v22  ;;  %vm2865_vm7 = vcmp.eq.s32.totalorder %v5129_v45, %v5083_v22 }
  0xbe   : > { %v5079_v20 = vpop.permute.xlu1 %2564  ;;  %v5087_v24 = vpop.permute.xlu0 %2590 }
  0xbf   : > { %vm2866_vm12 = vcmp.eq.s32.totalorder %v5126_v43, %v5079_v20  ;;  %vm2867_vm13 = vcmp.eq.s32.totalorder %v5129_v45, %v5079_v20 }
  0xc2   : > { %v5081_v21 = vpop.permute.xlu1 %2568  ;;  %v5091_v0 = vpop.permute.xlu0 %2601 }
  0xc3   : > { %vm2868_vm10 = vcmp.eq.s32.totalorder %v5126_v43, %v5081_v21  ;;  %vm2869_vm14 = vcmp.eq.s32.totalorder %v5129_v45, %v5081_v21 }
  0xc6   : > { %v5085_v23 = vpop.permute.xlu1 %2586  ;;  %v5095_v27 = vpop.permute.xlu0 %2579 }
  0xca   : > { %v5089_v25 = vpop.permute.xlu1 %2597  ;;  %v5099_v30 = vpop.permute.xlu0 %2612 }
  0xce   : > { %v5093_v26 = vpop.permute.xlu1 %2575  ;;  %v5103_v32 = vpop.permute.xlu0 %2623 }
  0xd2   : > { %v5097_v28 = vpop.permute.xlu1 %2608  ;;  %v5107_v34 = vpop.permute.xlu0 %2634 }
  0xd6   : > { %v5101_v31 = vpop.permute.xlu1 %2619  ;;  %v5111_v36 = vpop.permute.xlu0 %2645 }
  0xda   : > { %v5105_v33 = vpop.permute.xlu1 %2630  ;;  %v5115_v38 = vpop.permute.xlu0 %2656 }
  0xde   : > { %v5109_v35 = vpop.permute.xlu1 %2641  ;;  %v5119_v40 = vpop.permute.xlu0 %2667 }
  0xe2   : > { %v5113_v37 = vpop.permute.xlu1 %2652  ;;  %v5123_v42 = vpop.permute.xlu0 %2678 }
  0xe6   : > { %v5117_v39 = vpop.permute.xlu1 %2663  ;;  %v2690_v46 = vpop.permute.xlu0 %2689 }
  0xe7   : > { %vm2912_vm2 = vcmp.eq.s32.totalorder %v5126_v43, %v2690_v46  ;;  %vm2913_vm6 = vcmp.eq.s32.totalorder %v5129_v45, %v2690_v46 }
  0xea   : > { %v5121_v41 = vpop.permute.xlu1 %2674  ;;  %v2701_v12 = vpop.permute.xlu0 %2700 }
  0xeb   : > { %vm2916_vm11 = vcmp.eq.s32.totalorder %v5126_v43, %v2701_v12  ;;  %vm2917_vm15 = vcmp.eq.s32.totalorder %v5129_v45, %v2701_v12 }
  0xee   : > { %v2686_v44 = vpop.permute.xlu1 %2685 }
  0xef   : > { %vm2910_vm0 = vcmp.eq.s32.totalorder %v5126_v43, %v2686_v44  ;;  %vm2911_vm4 = vcmp.eq.s32.totalorder %v5129_v45, %v2686_v44 }
  0xf2   : > { %v5134_v47 = vpop.permute.xlu1 %2696 }
  0xf3   : > { %vm2914_vm8 = vcmp.eq.s32.totalorder %v5126_v43, %v5134_v47  ;;  %vm2915_vm9 = vcmp.eq.s32.totalorder %v5129_v45, %v5134_v47 }
  0xf6   : > { %v2708_v16 = vpop.permute.xlu1 %2707 }
 0x134   : > { %v5136_v48 = vpop.f32.mrb[0].mxu0  ;;  %v5138_v49 = vpop.f32.mrb[0].mxu1 }
 0x135   : > { %7191 = vst [vmem:[#allocation15_spill] sm:$0xff] %v5136_v48  ;;  %7192 = vst [vmem:[#allocation16_spill] sm:$0xff] %v5138_v49  ;;  %v5145_v8 = vpop.f32.mrb[1].mxu0  ;;  %v5147_v50 = vpop.f32.mrb[1].mxu1  ;;  %v2966_v51 = vsel %vm2862_vm1, %v5136_v48, 0.0  ;;  %v3014_v52 = vsel %vm2910_vm0, %v5138_v49, 0.0  ;;  %vm2918_vm0 = vcmp.eq.s32.totalorder %v5126_v43, %v2708_v16  ;;  %vm2919_vm1 = vcmp.eq.s32.totalorder %v5129_v45, %v2708_v16 }
 0x136   : > { %7193 = vst [vmem:[#allocation17_spill] sm:$0xff] %v5145_v8  ;;  %7194 = vst [vmem:[#allocation18_spill] sm:$0xff] %v5147_v50  ;;  %v4204_v53 = vpack.c.bf16 %v5145_v8, %v5136_v48  ;;  %v4212_v54 = vpack.c.bf16 %v5147_v50, %v5138_v49  ;;  %v5158_v55 = vpop.f32.mrb[2].mxu0  ;;  %v5160_v56 = vpop.f32.mrb[2].mxu1  ;;  %v1044_v57 = vmax.f32 %v5136_v48, %v5145_v8  ;;  %v2967_v62 = vsel %vm2863_vm3, %v5145_v8, 0.0 }
 0x137   : > { %7195 = vst [vmem:[#allocation19_spill] sm:$0xff] %v5158_v55  ;;  %7196 = vst [vmem:[#allocation20_spill] sm:$0xff] %v5160_v56  ;;  %v1116_v58 = vmax.f32 %v5138_v49, %v5147_v50  ;;  %v5166_v59 = vpop.f32.mrb[3].mxu0  ;;  %v5168_v60 = vpop.f32.mrb[3].mxu1  ;;  %v3016_v61 = vsel %vm2912_vm2, %v5160_v56, 0.0  ;;  %v3015_v63 = vsel %vm2911_vm4, %v5147_v50, 0.0  ;;  %v3062_v7 = vadd.f32 %v2967_v62, %v2966_v51 }
 0x138   : > { %7197 = vst [vmem:[#allocation21_spill] sm:$0xff] %v5166_v59  ;;  %7198 = vst [vmem:[#allocation22_spill] sm:$0xff] %v5168_v60  ;;  %v2968_v1 = vsel %vm2864_vm5, %v5158_v55, 0.0  ;;  %v4205_v2 = vpack.c.bf16 %v5166_v59, %v5158_v55  ;;  %v4213_v3 = vpack.c.bf16 %v5168_v60, %v5160_v56  ;;  %1045 = vmax.xlane.f32.xlu0 %v1044_v57  ;;  %v3017_v5 = vsel %vm2913_vm6, %v5168_v60, 0.0 }
 0x139   : > { %1020 = vst [vmem:[%s5183_s16] sm:$0xff] %v4204_v53  ;;  %1028 = vst [vmem:[%s5183_s16 + $0x40] sm:$0xff] %v4212_v54  ;;  %v1119_v4 = vmax.f32 %v5160_v56, %v5168_v60  ;;  %v3137_v6 = vadd.f32 %v3017_v5, %v3016_v61  ;;  %v3134_v9 = vadd.f32 %v3015_v63, %v3014_v52  ;;  %v2969_v13 = vsel %vm2865_vm7, %v5166_v59, 0.0 }
 0x13a   : > { %1021 = vst [vmem:[%s5183_s16 + $0x8] sm:$0xff] %v4205_v2  ;;  %1029 = vst [vmem:[%s5183_s16 + $0x48] sm:$0xff] %v4213_v3  ;;  %v5206_v15 = vadd.f32 %v2969_v13, %v2968_v1  ;;  %vm2872_vm2 = vcmp.eq.s32.totalorder %v5126_v43, %v5095_v27  ;;  %vm2873_vm3 = vcmp.eq.s32.totalorder %v5129_v45, %v5095_v27 }
 0x13b   : > { %1120 = vmax.xlane.f32.xlu1 %v1119_v4  ;;  %vm2870_vm5 = vcmp.eq.s32.totalorder %v5126_v43, %v5093_v26  ;;  %vm2871_vm7 = vcmp.eq.s32.totalorder %v5129_v45, %v5093_v26  ;;  %v7215_v16 = vmax.f32 %v5158_v55, %v5166_v59 }
 0x13c   : > { %1117 = vmax.xlane.f32.xlu0 %v1116_v58  ;;  %v5210_v18 = vpop.f32.mrb[4].mxu0  ;;  %v5212_v19 = vpop.f32.mrb[4].mxu1 }
 0x13d   : > { %7199 = vst [vmem:[#allocation23_spill] sm:$0xff] %v5210_v18  ;;  %7200 = vst [vmem:[#allocation24_spill] sm:$0xff] %v5212_v19  ;;  %v5221_v22 = vpop.f32.mrb[5].mxu0  ;;  %v5223_v44 = vpop.f32.mrb[5].mxu1  ;;  %v2970_v46 = vsel %vm2866_vm12, %v5210_v18, 0.0  ;;  %v3018_v51 = vsel %vm2914_vm8, %v5212_v19, 0.0  ;;  %vm2874_vm12 = vcmp.eq.s32.totalorder %v5126_v43, %v5085_v23 }
 0x13e   : > { %7201 = vst [vmem:[#allocation25_spill] sm:$0xff] %v5221_v22  ;;  %7202 = vst [vmem:[#allocation26_spill] sm:$0xff] %v5223_v44  ;;  %v5233_v52 = vpop.f32.mrb[6].mxu0  ;;  %v1050_v20 = vmax.f32 %v5210_v18, %v5221_v22  ;;  %v5237_v53 = vpop.f32.mrb[6].mxu1  ;;  %v2971_v57 = vsel %vm2867_vm13, %v5221_v22, 0.0  ;;  %v3019_v58 = vsel %vm2915_vm9, %v5223_v44, 0.0  ;;  %vm2876_vm9 = vcmp.eq.s32.totalorder %v5126_v43, %v5087_v24 }
 0x13f   : > { %3138 = vadd.xlane.f32.xlu1 %v3137_v6  ;;  %7203 = vst [vmem:[#allocation27_spill] sm:$0xff] %v5233_v52  ;;  %7204 = vst [vmem:[#allocation28_spill] sm:$0xff] %v5237_v53  ;;  %v5246_v61 = vpop.f32.mrb[7].mxu0  ;;  %v5248_v62 = vpop.f32.mrb[7].mxu1  ;;  %v2972_v63 = vsel %vm2868_vm10, %v5233_v52, 0.0  ;;  %v3020_v1 = vsel %vm2916_vm11, %v5237_v53, 0.0  ;;  %v5257_v2 = vadd.f32 %v2971_v57, %v2970_v46  ;;  %v5259_v3 = vadd.f32 %v3019_v58, %v3018_v51 }
 0x140   : > { %7205 = vst [vmem:[#allocation29_spill] sm:$0xff] %v5246_v61  ;;  %7206 = vst [vmem:[#allocation30_spill] sm:$0xff] %v5248_v62  ;;  %3063 = vadd.xlane.f32.xlu0 %v3062_v7  ;;  %v1053_v47 = vmax.f32 %v5233_v52, %v5246_v61  ;;  %v1125_v4 = vmax.f32 %v5237_v53, %v5248_v62  ;;  %v2973_v5 = vsel %vm2869_vm14, %v5246_v61, 0.0  ;;  %v3021_v6 = vsel %vm2917_vm15, %v5248_v62, 0.0  ;;  %v2712_v51 = vpop.permute.xlu0 %2711  ;;  %v5276_v7 = vpop.permute.xlu1 %2718 }
 0x141   : > { %v3071_v13 = vadd.f32 %v2973_v5, %v2972_v63  ;;  %v5272_v46 = vadd.f32 %v3021_v6, %v3020_v1  ;;  %vm2920_vm4 = vcmp.eq.s32.totalorder %v5126_v43, %v2712_v51  ;;  %vm2921_vm6 = vcmp.eq.s32.totalorder %v5129_v45, %v2712_v51 }
 0x142   : > { %vm2922_vm8 = vcmp.eq.s32.totalorder %v5126_v43, %v5276_v7  ;;  %vm2877_vm10 = vcmp.eq.s32.totalorder %v5129_v45, %v5087_v24  ;;  %vm2923_vm13 = vcmp.eq.s32.totalorder %v5129_v45, %v5276_v7  ;;  %vm2875_vm15 = vcmp.eq.s32.totalorder %v5129_v45, %v5085_v23 }
 0x143   : > { %1051 = vmax.xlane.f32.xlu1 %v1050_v20  ;;  %v7224_v22 = vmax.f32 %v5212_v19, %v5223_v44 }
 0x144   : > { %3135 = vadd.xlane.f32.xlu0 %v3134_v9  ;;  %v5278_v57 = vpop.f32.mrb[8].mxu0  ;;  %v5280_v21 = vpop.f32.mrb[8].mxu1 }
 0x145   : > { %7207 = vst [vmem:[#allocation31_spill] sm:$0xff] %v5278_v57  ;;  %7208 = vst [vmem:[#allocation32_spill] sm:$0xff] %v5280_v21  ;;  %v5289_v12 = vpop.f32.mrb[9].mxu0  ;;  %v5291_v20 = vpop.f32.mrb[9].mxu1  ;;  %v2974_v9 = vsel %vm2870_vm5, %v5278_v57, 0.0  ;;  %v3022_v58 = vsel %vm2918_vm0, %v5280_v21, 0.0  ;;  %vm2878_vm5 = vcmp.eq.s32.totalorder %v5126_v43, %v5089_v25 }
 0x146   : > { %7209 = vst [vmem:[#allocation33_spill] sm:$0xff] %v5289_v12  ;;  %7210 = vst [vmem:[#allocation34_spill] sm:$0xff] %v5291_v20  ;;  %v5298_v63 = vpop.f32.mrb[10].mxu0  ;;  %v5300_v1 = vpop.f32.mrb[10].mxu1  ;;  %v2975_v54 = vsel %vm2871_vm7, %v5289_v12, 0.0  ;;  %v3023_v26 = vsel %vm2919_vm1, %v5291_v20, 0.0  ;;  %vm2879_vm7 = vcmp.eq.s32.totalorder %v5129_v45, %v5089_v25 }
 0x147   : > { %1054 = vmax.xlane.f32.xlu1 %v1053_v47  ;;  %7211 = vst [vmem:[#allocation35_spill] sm:$0xff] %v5298_v63  ;;  %7212 = vst [vmem:[#allocation36_spill] sm:$0xff] %v5300_v1  ;;  %v5310_v10 = vpop.f32.mrb[11].mxu0  ;;  %v5312_v62 = vpop.f32.mrb[11].mxu1  ;;  %v2976_v47 = vsel %vm2872_vm2, %v5298_v63, 0.0  ;;  %v3024_v5 = vsel %vm2920_vm4, %v5300_v1, 0.0  ;;  %v5321_v6 = vadd.f32 %v2975_v54, %v2974_v9  ;;  %v5323_v53 = vadd.f32 %v3023_v26, %v3022_v58 }
 0x148   : > { %7213 = vst [vmem:[#allocation37_spill] sm:$0xff] %v5310_v10  ;;  %7214 = vst [vmem:[#allocation38_spill] sm:$0xff] %v5312_v62  ;;  %1048 = vmax.xlane.f32.xlu0 %v7215_v16  ;;  %v2977_v50 = vsel %vm2873_vm3, %v5310_v10, 0.0  ;;  %v3025_v54 = vsel %vm2921_vm6, %v5312_v62, 0.0  ;;  %v2723_v26 = vpop.permute.xlu0 %2722  ;;  %v5347_v16 = vpop.permute.xlu1 %2729  ;;  %vm2880_vm2 = vcmp.eq.s32.totalorder %v5126_v43, %v5091_v0  ;;  %vm2881_vm3 = vcmp.eq.s32.totalorder %v5129_v45, %v5091_v0 }
 0x149   : > { %v5339_v9 = vadd.f32 %v2977_v50, %v2976_v47  ;;  %v5341_v58 = vadd.f32 %v3025_v54, %v3024_v5  ;;  %vm2924_vm11 = vcmp.eq.s32.totalorder %v5126_v43, %v2723_v26  ;;  %vm2925_vm14 = vcmp.eq.s32.totalorder %v5129_v45, %v2723_v26 }
 0x14a   : > { %vm2926_vm0 = vcmp.eq.s32.totalorder %v5126_v43, %v5347_v16  ;;  %vm2927_vm1 = vcmp.eq.s32.totalorder %v5129_v45, %v5347_v16  ;;  %v7229_v26 = vmax.f32 %v5298_v63, %v5310_v10  ;;  %v7235_v0 = vmax.f32 %v5278_v57, %v5289_v12 }
 0x14b   : > { %1126 = vmax.xlane.f32.xlu1 %v1125_v4 }
 0x14c   : > { %3066 = vadd.xlane.f32.xlu0 %v5206_v15  ;;  %v5350_v27 = vpop.f32.mrb[12].mxu0  ;;  %v5352_v51 = vpop.f32.mrb[12].mxu1 }
 0x14d   : > { %7216 = vst [vmem:[#allocation39_spill] sm:$0xff] %v5350_v27  ;;  %7217 = vst [vmem:[#allocation40_spill] sm:$0xff] %v5352_v51  ;;  %v5361_v50 = vpop.f32.mrb[13].mxu0  ;;  %v5363_v4 = vpop.f32.mrb[13].mxu1  ;;  %v2978_v15 = vsel %vm2874_vm12, %v5350_v27, 0.0  ;;  %v3026_v5 = vsel %vm2922_vm8, %v5352_v51, 0.0 }
 0x14e   : > { %7218 = vst [vmem:[#allocation41_spill] sm:$0xff] %v5361_v50  ;;  %7219 = vst [vmem:[#allocation42_spill] sm:$0xff] %v5363_v4  ;;  %v4206_v47 = vpack.c.bf16 %v5361_v50, %v5350_v27  ;;  %v5372_v54 = vpop.f32.mrb[14].mxu0  ;;  %v4214_v56 = vpack.c.bf16 %v5363_v4, %v5352_v51  ;;  %v5376_v60 = vpop.f32.mrb[14].mxu1  ;;  %v2979_v48 = vsel %vm2875_vm15, %v5361_v50, 0.0  ;;  %v3027_v49 = vsel %vm2923_vm13, %v5363_v4, 0.0 }
 0x14f   : > { %3072 = vadd.xlane.f32.xlu1 %v3071_v13  ;;  %7220 = vst [vmem:[#allocation43_spill] sm:$0xff] %v5372_v54  ;;  %7221 = vst [vmem:[#allocation44_spill] sm:$0xff] %v5376_v60  ;;  %v5382_v61 = vpop.f32.mrb[15].mxu0  ;;  %v5384_v52 = vpop.f32.mrb[15].mxu1  ;;  %v2980_v13 = vsel %vm2876_vm9, %v5372_v54, 0.0  ;;  %v3028_v8 = vsel %vm2924_vm11, %v5376_v60, 0.0  ;;  %v5420_v44 = vadd.f32 %v3027_v49, %v3026_v5  ;;  %vm2885_vm11 = vcmp.eq.s32.totalorder %v5129_v45, %v5099_v30 }
 0x150   : > { %7222 = vst [vmem:[#allocation45_spill] sm:$0xff] %v5382_v61  ;;  %7223 = vst [vmem:[#allocation46_spill] sm:$0xff] %v5384_v52  ;;  %v4207_v23 = vpack.c.bf16 %v5382_v61, %v5372_v54  ;;  %1123 = vmax.xlane.f32.xlu0 %v7224_v22  ;;  %v4215_v59 = vpack.c.bf16 %v5384_v52, %v5376_v60  ;;  %v2734_v55 = vpop.permute.xlu0 %2733  ;;  %v3029_v22 = vsel %vm2925_vm14, %v5384_v52, 0.0  ;;  %v2741_v24 = vpop.permute.xlu1 %2740 }
 0x151   : > { %1022 = vst [vmem:[%s5183_s16 + $0x10] sm:$0xff] %v4206_v47  ;;  %1030 = vst [vmem:[%s5183_s16 + $0x50] sm:$0xff] %v4214_v56  ;;  %v2981_v47 = vsel %vm2877_vm10, %v5382_v61, 0.0  ;;  %v5418_v56 = vadd.f32 %v2979_v48, %v2978_v15  ;;  %v5427_v7 = vadd.f32 %v3029_v22, %v3028_v8  ;;  %vm2928_vm4 = vcmp.eq.s32.totalorder %v5126_v43, %v2734_v55 }
 0x152   : > { %1023 = vst [vmem:[%s5183_s16 + $0x18] sm:$0xff] %v4207_v23  ;;  %1031 = vst [vmem:[%s5183_s16 + $0x58] sm:$0xff] %v4215_v59  ;;  %v5425_v18 = vadd.f32 %v2981_v47, %v2980_v13  ;;  %vm2929_vm6 = vcmp.eq.s32.totalorder %v5129_v45, %v2734_v55  ;;  %vm2930_vm8 = vcmp.eq.s32.totalorder %v5126_v43, %v2741_v24 }
 0x153   : > { %3144 = vadd.xlane.f32.xlu1 %v5272_v46  ;;  %vm2931_vm9 = vcmp.eq.s32.totalorder %v5129_v45, %v2741_v24  ;;  %vm2884_vm10 = vcmp.eq.s32.totalorder %v5126_v43, %v5099_v30  ;;  %vm2882_vm13 = vcmp.eq.s32.totalorder %v5126_v43, %v5097_v28  ;;  %vm2883_vm15 = vcmp.eq.s32.totalorder %v5129_v45, %v5097_v28 }
 0x154   : > { %3069 = vadd.xlane.f32.xlu0 %v5257_v2  ;;  %v5434_v48 = vpop.f32.mrb[16].mxu0  ;;  %v5436_v49 = vpop.f32.mrb[16].mxu1  ;;  %v7246_v24 = vmax.f32 %v5280_v21, %v5291_v20 }
 0x155   : > { %7225 = vst [vmem:[#allocation47_spill] sm:$0xff] %v5434_v48  ;;  %7226 = vst [vmem:[#allocation48_spill] sm:$0xff] %v5436_v49  ;;  %v5445_v8 = vpop.f32.mrb[17].mxu0  ;;  %v5447_v59 = vpop.f32.mrb[17].mxu1  ;;  %v2982_v2 = vsel %vm2878_vm5, %v5434_v48, 0.0  ;;  %v3030_v46 = vsel %vm2926_vm0, %v5436_v49, 0.0  ;;  %vm2887_vm5 = vcmp.eq.s32.totalorder %v5129_v45, %v5101_v31 }
 0x156   : > { %7227 = vst [vmem:[#allocation49_spill] sm:$0xff] %v5445_v8  ;;  %7228 = vst [vmem:[#allocation50_spill] sm:$0xff] %v5447_v59  ;;  %v5457_v15 = vpop.f32.mrb[18].mxu0  ;;  %v5459_v5 = vpop.f32.mrb[18].mxu1  ;;  %v2983_v25 = vsel %vm2879_vm7, %v5445_v8, 0.0  ;;  %v3031_v47 = vsel %vm2927_vm1, %v5447_v59, 0.0  ;;  %vm2888_vm1 = vcmp.eq.s32.totalorder %v5126_v43, %v5103_v32 }
 0x157   : > { %1060 = vmax.xlane.f32.xlu1 %v7229_v26  ;;  %7230 = vst [vmem:[#allocation51_spill] sm:$0xff] %v5457_v15  ;;  %7231 = vst [vmem:[#allocation52_spill] sm:$0xff] %v5459_v5  ;;  %v5470_v22 = vpop.f32.mrb[19].mxu0  ;;  %v5472_v26 = vpop.f32.mrb[19].mxu1  ;;  %v2984_v19 = vsel %vm2880_vm2, %v5457_v15, 0.0  ;;  %v3032_v13 = vsel %vm2928_vm4, %v5459_v5, 0.0  ;;  %v5481_v23 = vadd.f32 %v2983_v25, %v2982_v2  ;;  %v5483_v10 = vadd.f32 %v3031_v47, %v3030_v46 }
 0x158   : > { %7232 = vst [vmem:[#allocation53_spill] sm:$0xff] %v5470_v22  ;;  %7233 = vst [vmem:[#allocation54_spill] sm:$0xff] %v5472_v26  ;;  %3141 = vadd.xlane.f32.xlu0 %v5259_v3  ;;  %v2985_v29 = vsel %vm2881_vm3, %v5470_v22, 0.0  ;;  %v3033_v2 = vsel %vm2929_vm6, %v5472_v26, 0.0  ;;  %v2745_v25 = vpop.permute.xlu0 %2744  ;;  %v7234_v3 = vmax.f32 %v5300_v1, %v5312_v62  ;;  %v2752_v63 = vpop.permute.xlu1 %2751  ;;  %vm2889_vm3 = vcmp.eq.s32.totalorder %v5129_v45, %v5103_v32 }
 0x159   : > { %v5497_v46 = vadd.f32 %v2985_v29, %v2984_v19  ;;  %v5499_v47 = vadd.f32 %v3033_v2, %v3032_v13  ;;  %vm2932_vm12 = vcmp.eq.s32.totalorder %v5126_v43, %v2745_v25  ;;  %vm2933_vm14 = vcmp.eq.s32.totalorder %v5129_v45, %v2745_v25 }
 0x15a   : > { %vm2934_vm0 = vcmp.eq.s32.totalorder %v5126_v43, %v2752_v63  ;;  %vm2935_vm2 = vcmp.eq.s32.totalorder %v5129_v45, %v2752_v63  ;;  %vm2886_vm4 = vcmp.eq.s32.totalorder %v5126_v43, %v5101_v31 }
 0x15b   : > { %1132 = vmax.xlane.f32.xlu1 %v7234_v3 }
 0x15c   : > { %1057 = vmax.xlane.f32.xlu0 %v7235_v0  ;;  %v5509_v55 = vpop.f32.mrb[20].mxu0  ;;  %v5511_v16 = vpop.f32.mrb[20].mxu1 }
 0x15d   : > { %7236 = vst [vmem:[#allocation55_spill] sm:$0xff] %v5509_v55  ;;  %7237 = vst [vmem:[#allocation56_spill] sm:$0xff] %v5511_v16  ;;  %v5520_v29 = vpop.f32.mrb[21].mxu0  ;;  %v5522_v19 = vpop.f32.mrb[21].mxu1  ;;  %v2986_v13 = vsel %vm2882_vm13, %v5509_v55, 0.0  ;;  %v3034_v2 = vsel %vm2930_vm8, %v5511_v16, 0.0  ;;  %vm2890_vm13 = vcmp.eq.s32.totalorder %v5126_v43, %v5105_v33 }
 0x15e   : > { %7238 = vst [vmem:[#allocation57_spill] sm:$0xff] %v5520_v29  ;;  %7239 = vst [vmem:[#allocation58_spill] sm:$0xff] %v5522_v19  ;;  %v5530_v3 = vpop.f32.mrb[22].mxu0  ;;  %v5532_v0 = vpop.f32.mrb[22].mxu1  ;;  %v2987_v12 = vsel %vm2883_vm15, %v5520_v29, 0.0  ;;  %v3035_v28 = vsel %vm2931_vm9, %v5522_v19, 0.0  ;;  %vm2891_vm15 = vcmp.eq.s32.totalorder %v5129_v45, %v5105_v33 }
 0x15f   : > { %3078 = vadd.xlane.f32.xlu1 %v5339_v9  ;;  %7240 = vst [vmem:[#allocation59_spill] sm:$0xff] %v5530_v3  ;;  %7241 = vst [vmem:[#allocation60_spill] sm:$0xff] %v5532_v0  ;;  %v5542_v57 = vpop.f32.mrb[23].mxu0  ;;  %v5544_v17 = vpop.f32.mrb[23].mxu1  ;;  %v2988_v9 = vsel %vm2884_vm10, %v5530_v3, 0.0  ;;  %v3036_v62 = vsel %vm2932_vm12, %v5532_v0, 0.0  ;;  %v5553_v1 = vadd.f32 %v2987_v12, %v2986_v13  ;;  %v5555_v14 = vadd.f32 %v3035_v28, %v3034_v2 }
 0x160   : > { %7242 = vst [vmem:[#allocation61_spill] sm:$0xff] %v5542_v57  ;;  %7243 = vst [vmem:[#allocation62_spill] sm:$0xff] %v5544_v17  ;;  %1129 = vmax.xlane.f32.xlu0 %v7246_v24  ;;  %v2989_v16 = vsel %vm2885_vm11, %v5542_v57, 0.0  ;;  %v3037_v12 = vsel %vm2933_vm14, %v5544_v17, 0.0  ;;  %v2756_v13 = vpop.permute.xlu0 %2755  ;;  %v5577_v24 = vpop.permute.xlu1 %2762  ;;  %vm338_vm9 = vcmask 124928   ;;  %vm2892_vm11 = vcmp.eq.s32.totalorder %v5126_v43, %v5107_v34 }
 0x161   : > { %7244 = vst [vmem:[#allocation63_spill] sm:$0xff] %v5553_v1  ;;  %7245 = vst [vmem:[#allocation64_spill] sm:$0xff] %v5555_v14  ;;  %v5571_v2 = vadd.f32 %v2989_v16, %v2988_v9  ;;  %v5573_v28 = vadd.f32 %v3037_v12, %v3036_v62  ;;  %vm2936_vm6 = vcmp.eq.s32.totalorder %v5126_v43, %v2756_v13 }
 0x162   : > { %vm2937_vm7 = vcmp.eq.s32.totalorder %v5129_v45, %v2756_v13  ;;  %vm2938_vm8 = vcmp.eq.s32.totalorder %v5126_v43, %v5577_v24  ;;  %v7252_v12 = vmax.f32 %v5372_v54, %v5382_v61  ;;  %vm2939_vm10 = vcmp.eq.s32.totalorder %v5129_v45, %v5577_v24 }
 0x163   : > { %7247 = vst [vmem:[#allocation65_spill] sm:$0xff] %v5573_v28  ;;  %3150 = vadd.xlane.f32.xlu1 %v5341_v58  ;;  %vm2893_vm12 = vcmp.eq.s32.totalorder %v5129_v45, %v5107_v34  ;;  %v7104_v34 = vmov 0.0  }
 0x164   : > { %3075 = vadd.xlane.f32.xlu0 %v5321_v6  ;;  %v5589_v30 = vpop.f32.mrb[24].mxu0  ;;  %v5591_v62 = vpop.f32.mrb[24].mxu1  ;;  %355 = vst.msk [vmem:[#allocation4] sm:$0x7] %vm338_vm9, %v7104_v34  ;;  %347 = vst.msk [vmem:[#allocation3] sm:$0x7] %vm338_vm9, %v7104_v34 }
 0x165   : > { %7248 = vst [vmem:[#allocation66_spill] sm:$0xff] %v5589_v30  ;;  %7249 = vst [vmem:[#allocation67_spill] sm:$0xff] %v5591_v62  ;;  %v5594_v58 = vpop.f32.mrb[25].mxu0  ;;  %v5596_v16 = vpop.f32.mrb[25].mxu1  ;;  %v3038_v25 = vsel %vm2934_vm0, %v5591_v62, 0.0  ;;  %v2990_v6 = vsel %vm2886_vm4, %v5589_v30, 0.0  ;;  %vm2897_vm4 = vcmp.eq.s32.totalorder %v5129_v45, %v5111_v36 }
 0x166   : > { %7250 = vst [vmem:[#allocation68_spill] sm:$0xff] %v5594_v58  ;;  %7251 = vst [vmem:[#allocation69_spill] sm:$0xff] %v5596_v16  ;;  %v4208_v9 = vpack.c.bf16 %v5594_v58, %v5589_v30  ;;  %v5608_v19 = vpop.f32.mrb[26].mxu0  ;;  %v4216_v11 = vpack.c.bf16 %v5596_v16, %v5591_v62  ;;  %v5612_v20 = vpop.f32.mrb[26].mxu1  ;;  %v3039_v21 = vsel %vm2935_vm2, %v5596_v16, 0.0  ;;  %v2991_v14 = vsel %vm2887_vm5, %v5594_v58, 0.0 }
 0x167   : > { %1066 = vmax.xlane.f32.xlu1 %v7252_v12  ;;  %v5619_v1 = vpop.f32.mrb[27].mxu0  ;;  %v5621_v28 = vpop.f32.mrb[27].mxu1  ;;  %v2992_v12 = vsel %vm2888_vm1, %v5608_v19, 0.0  ;;  %v3040_v63 = vsel %vm2936_vm6, %v5612_v20, 0.0  ;;  %v7253_v16 = vmax.f32 %v5376_v60, %v5384_v52  ;;  %348 = vst.msk [vmem:[#allocation3 + $0x4] sm:$0x7] %vm338_vm9, %v7104_v34  ;;  %vm2894_vm5 = vcmp.eq.s32.totalorder %v5126_v43, %v5109_v35 }
 0x168   : > { %1024 = vst [vmem:[%s5183_s16 + $0x20] sm:$0xff] %v4208_v9  ;;  %v4209_v54 = vpack.c.bf16 %v5619_v1, %v5608_v19  ;;  %3147 = vadd.xlane.f32.xlu0 %v5323_v53  ;;  %1032 = vst [vmem:[%s5183_s16 + $0x60] sm:$0xff] %v4216_v11  ;;  %v4217_v61 = vpack.c.bf16 %v5621_v28, %v5612_v20  ;;  %v2767_v30 = vpop.permute.xlu0 %2766  ;;  %v2993_v31 = vsel %vm2889_vm3, %v5619_v1, 0.0  ;;  %v3041_v53 = vsel %vm2937_vm7, %v5621_v28, 0.0  ;;  %v5669_v32 = vpop.permute.xlu1 %2773 }
 0x169   : > { %v5654_v11 = vadd.f32 %v2991_v14, %v2990_v6  ;;  %v5656_v9 = vadd.f32 %v3039_v21, %v3038_v25  ;;  %v5663_v62 = vadd.f32 %v2993_v31, %v2992_v12  ;;  %v5665_v58 = vadd.f32 %v3041_v53, %v3040_v63  ;;  %349 = vst.msk [vmem:[#allocation3 + $0x8] sm:$0x7] %vm338_vm9, %v7104_v34 }
 0x16a   : > { %1025 = vst [vmem:[%s5183_s16 + $0x28] sm:$0xff] %v4209_v54  ;;  %1033 = vst [vmem:[%s5183_s16 + $0x68] sm:$0xff] %v4217_v61  ;;  %v4774_v14 = vmov -inf   ;;  %v7254_v61 = vmax.f32 %v5350_v27, %v5361_v50  ;;  %vm2940_vm14 = vcmp.eq.s32.totalorder %v5126_v43, %v2767_v30  ;;  %vm2941_vm0 = vcmp.eq.s32.totalorder %v5129_v45, %v2767_v30 }
 0x16b   : > { %1138 = vmax.xlane.f32.xlu1 %v7253_v16  ;;  %339 = vst.msk [vmem:[#allocation2] sm:$0x7] %vm338_vm9, %v4774_v14  ;;  %340 = vst.msk [vmem:[#allocation2 + $0x4] sm:$0x7] %vm338_vm9, %v4774_v14  ;;  %v7256_v27 = vmax.f32 %v5352_v51, %v5363_v4  ;;  %vm2942_vm1 = vcmp.eq.s32.totalorder %v5126_v43, %v5669_v32  ;;  %vm2943_vm2 = vcmp.eq.s32.totalorder %v5129_v45, %v5669_v32 }
 0x16c   : > { %341 = vst.msk [vmem:[#allocation2 + $0x8] sm:$0x7] %vm338_vm9, %v4774_v14  ;;  %342 = vst.msk [vmem:[#allocation2 + $0xc] sm:$0x7] %vm338_vm9, %v4774_v14  ;;  %1063 = vmax.xlane.f32.xlu0 %v7254_v61  ;;  %v5688_v21 = vpop.f32.mrb[28].mxu0  ;;  %v5690_v54 = vpop.f32.mrb[28].mxu1  ;;  %vm2896_vm3 = vcmp.eq.s32.totalorder %v5126_v43, %v5111_v36  ;;  %vm2895_vm7 = vcmp.eq.s32.totalorder %v5129_v45, %v5109_v35  ;;  %v7260_v35 = vmax.f32 %v5457_v15, %v5470_v22 }
 0x16d   : > { %343 = vst.msk [vmem:[#allocation2 + $0x10] sm:$0x7] %vm338_vm9, %v4774_v14  ;;  %344 = vst.msk [vmem:[#allocation2 + $0x14] sm:$0x7] %vm338_vm9, %v4774_v14  ;;  %v2994_v13 = vsel %vm2890_vm13, %v5688_v21, 0.0  ;;  %v5696_v16 = vpop.f32.mrb[29].mxu0  ;;  %v7265_v32 = vmax.f32 %v5459_v5, %v5472_v26  ;;  %vm2901_vm13 = vcmp.eq.s32.totalorder %v5129_v45, %v5115_v38 }
 0x16e   : > { %345 = vst.msk [vmem:[#allocation2 + $0x18] sm:$0x7] %vm338_vm9, %v4774_v14  ;;  %346 = vst.msk [vmem:[#allocation2 + $0x1c] sm:$0x7] %vm338_vm9, %v4774_v14  ;;  %v5698_v25 = vpop.f32.mrb[29].mxu1  ;;  %v3042_v6 = vsel %vm2938_vm8, %v5690_v54, 0.0 }
 0x16f   : > { %7255 = vst [vmem:[#allocation70_spill] sm:$0xff] %v5698_v25  ;;  %v2995_v63 = vsel %vm2891_vm15, %v5696_v16, 0.0  ;;  %3084 = vadd.xlane.f32.xlu1 %v5425_v18  ;;  %v5709_v33 = vpop.f32.mrb[30].mxu0  ;;  %v5713_v53 = vpop.f32.mrb[30].mxu1  ;;  %v3043_v14 = vsel %vm2939_vm10, %v5698_v25, 0.0 }
 0x170   : > { %v2996_v61 = vsel %vm2892_vm11, %v5709_v33, 0.0  ;;  %v5723_v12 = vpop.f32.mrb[31].mxu0  ;;  %v3044_v18 = vsel %vm2940_vm14, %v5713_v53, 0.0  ;;  %v5728_v52 = vpop.f32.mrb[31].mxu1  ;;  %v5730_v31 = vadd.f32 %v2995_v63, %v2994_v13  ;;  %v5732_v60 = vadd.f32 %v3043_v14, %v3042_v6  ;;  %1135 = vmax.xlane.f32.xlu0 %v7256_v27  ;;  %350 = vst.msk [vmem:[#allocation3 + $0xc] sm:$0x7] %vm338_vm9, %v7104_v34 }
 0x171   : > { %v2997_v50 = vsel %vm2893_vm12, %v5723_v12, 0.0  ;;  %v3045_v13 = vsel %vm2941_vm0, %v5728_v52, 0.0  ;;  %v2778_v6 = vpop.permute.xlu0 %2777  ;;  %351 = vst.msk [vmem:[#allocation3 + $0x10] sm:$0x7] %vm338_vm9, %v7104_v34  ;;  %352 = vst.msk [vmem:[#allocation3 + $0x14] sm:$0x7] %vm338_vm9, %v7104_v34  ;;  %v2785_v27 = vpop.permute.xlu1 %2784  ;;  %vm2900_vm12 = vcmp.eq.s32.totalorder %v5126_v43, %v5115_v38  ;;  %vm2898_vm14 = vcmp.eq.s32.totalorder %v5126_v43, %v5113_v37 }
 0x172   : > { %v5748_v63 = vadd.f32 %v2997_v50, %v2996_v61  ;;  %v5750_v14 = vadd.f32 %v3045_v13, %v3044_v18  ;;  %353 = vst.msk [vmem:[#allocation3 + $0x18] sm:$0x7] %vm338_vm9, %v7104_v34  ;;  %354 = vst.msk [vmem:[#allocation3 + $0x1c] sm:$0x7] %vm338_vm9, %v7104_v34  ;;  %vm2944_vm6 = vcmp.eq.s32.totalorder %v5126_v43, %v2778_v6 }
 0x173   : > { %3156 = vadd.xlane.f32.xlu1 %v5427_v7  ;;  %356 = vst.msk [vmem:[#allocation4 + $0x4] sm:$0x7] %vm338_vm9, %v7104_v34  ;;  %357 = vst.msk [vmem:[#allocation4 + $0x8] sm:$0x7] %vm338_vm9, %v7104_v34  ;;  %vm2945_vm8 = vcmp.eq.s32.totalorder %v5129_v45, %v2778_v6  ;;  %vm2946_vm10 = vcmp.eq.s32.totalorder %v5126_v43, %v2785_v27  ;;  %vm2947_vm11 = vcmp.eq.s32.totalorder %v5129_v45, %v2785_v27 }
 0x174   : > { %358 = vst.msk [vmem:[#allocation4 + $0xc] sm:$0x7] %vm338_vm9, %v7104_v34  ;;  %359 = vst.msk [vmem:[#allocation4 + $0x10] sm:$0x7] %vm338_vm9, %v7104_v34  ;;  %3081 = vadd.xlane.f32.xlu0 %v5418_v56  ;;  %v5796_v50 = vpop.f32.mrb[32].mxu0  ;;  %v5798_v7 = vpop.f32.mrb[32].mxu1  ;;  %vm2899_vm0 = vcmp.eq.s32.totalorder %v5129_v45, %v5113_v37 }
 0x175   : > { %360 = vst.msk [vmem:[#allocation4 + $0x14] sm:$0x7] %vm338_vm9, %v7104_v34  ;;  %361 = vst.msk [vmem:[#allocation4 + $0x18] sm:$0x7] %vm338_vm9, %v7104_v34  ;;  %v2998_v30 = vsel %vm2894_vm5, %v5796_v50, 0.0  ;;  %v5804_v61 = vpop.f32.mrb[33].mxu0  ;;  %v5865_v36 = vpop.permute.xlu1 %2795  ;;  %vm2905_vm5 = vcmp.eq.s32.totalorder %v5129_v45, %v5119_v40 }
 0x176   : > { %362 = vst.msk [vmem:[#allocation4 + $0x1c] sm:$0x7] %vm338_vm9, %v7104_v34  ;;  %7257 = vst [vmem:[#allocation71_spill] sm:$0xff] %v5798_v7  ;;  %v5806_v18 = vpop.f32.mrb[33].mxu1  ;;  %v3046_v56 = vsel %vm2942_vm1, %v5798_v7, 0.0  ;;  %v2999_v34 = vsel %vm2895_vm7, %v5804_v61, 0.0 }
 0x177   : > { %7258 = vst [vmem:[#allocation72_spill] sm:$0xff] %v5804_v61  ;;  %7259 = vst [vmem:[#allocation73_spill] sm:$0xff] %v5806_v18  ;;  %1072 = vmax.xlane.f32.xlu1 %v7260_v35  ;;  %v5819_v25 = vpop.f32.mrb[34].mxu0  ;;  %v5823_v4 = vpop.f32.mrb[34].mxu1  ;;  %v3047_v51 = vsel %vm2943_vm2, %v5806_v18, 0.0  ;;  %v5840_v24 = vadd.f32 %v2999_v34, %v2998_v30  ;;  %vm2950_vm2 = vcmp.eq.s32.totalorder %v5126_v43, %v5865_v36 }
 0x178   : > { %v3000_v13 = vsel %vm2896_vm3, %v5819_v25, 0.0  ;;  %v5833_v61 = vpop.f32.mrb[35].mxu0  ;;  %v3048_v35 = vsel %vm2944_vm6, %v5823_v4, 0.0  ;;  %v5838_v22 = vpop.f32.mrb[35].mxu1  ;;  %v5842_v15 = vadd.f32 %v3047_v51, %v3046_v56  ;;  %3153 = vadd.xlane.f32.xlu0 %v5420_v44  ;;  %v7266_v44 = vmax.f32 %v5434_v48, %v5445_v8 }
 0x179   : > { %7261 = vst [vmem:[#allocation74_spill] sm:$0xff] %v5840_v24  ;;  %v3001_v18 = vsel %vm2897_vm4, %v5833_v61, 0.0  ;;  %v3049_v34 = vsel %vm2945_vm8, %v5838_v22, 0.0  ;;  %v2789_v30 = vpop.permute.xlu0 %2788  ;;  %vm2951_vm3 = vcmp.eq.s32.totalorder %v5129_v45, %v5865_v36  ;;  %v2807_v38 = vpop.permute.xlu1 %2806  ;;  %vm2904_vm4 = vcmp.eq.s32.totalorder %v5126_v43, %v5119_v40 }
 0x17a   : > { %7262 = vst [vmem:[#allocation75_spill] sm:$0xff] %v5842_v15  ;;  %v5856_v51 = vadd.f32 %v3001_v18, %v3000_v13  ;;  %v5858_v56 = vadd.f32 %v3049_v34, %v3048_v35  ;;  %vm2948_vm15 = vcmp.eq.s32.totalorder %v5126_v43, %v2789_v30  ;;  %vm2949_vm1 = vcmp.eq.s32.totalorder %v5129_v45, %v2789_v30 }
 0x17b   : > { %1144 = vmax.xlane.f32.xlu1 %v7265_v32  ;;  %vm2902_vm6 = vcmp.eq.s32.totalorder %v5126_v43, %v5117_v39  ;;  %vm2903_vm8 = vcmp.eq.s32.totalorder %v5129_v45, %v5117_v39 }
 0x17c   : > { %7263 = vst [vmem:[#allocation76_spill] sm:$0xff] %v5856_v51  ;;  %7264 = vst [vmem:[#allocation77_spill] sm:$0xff] %v5858_v56  ;;  %1069 = vmax.xlane.f32.xlu0 %v7266_v44  ;;  %v5876_v6 = vpop.f32.mrb[36].mxu0  ;;  %v5878_v18 = vpop.f32.mrb[36].mxu1  ;;  %v7275_v51 = vmax.f32 %v5436_v49, %v5447_v59 }
 0x17d   : > { %7267 = vst [vmem:[#allocation78_spill] sm:$0xff] %v5876_v6  ;;  %7268 = vst [vmem:[#allocation79_spill] sm:$0xff] %v5878_v18  ;;  %v5883_v13 = vpop.f32.mrb[37].mxu0  ;;  %v5885_v35 = vpop.f32.mrb[37].mxu1  ;;  %v3050_v32 = vsel %vm2946_vm10, %v5878_v18, 0.0  ;;  %v3002_v34 = vsel %vm2898_vm14, %v5876_v6, 0.0  ;;  %vm2906_vm14 = vcmp.eq.s32.totalorder %v5126_v43, %v5121_v41 }
 0x17e   : > { %7269 = vst [vmem:[#allocation80_spill] sm:$0xff] %v5883_v13  ;;  %7270 = vst [vmem:[#allocation81_spill] sm:$0xff] %v5885_v35  ;;  %v4210_v44 = vpack.c.bf16 %v5883_v13, %v5876_v6  ;;  %v5893_v7 = vpop.f32.mrb[38].mxu0  ;;  %v4218_v15 = vpack.c.bf16 %v5885_v35, %v5878_v18  ;;  %v5897_v56 = vpop.f32.mrb[38].mxu1  ;;  %v3051_v26 = vsel %vm2947_vm11, %v5885_v35, 0.0  ;;  %v3003_v27 = vsel %vm2899_vm0, %v5883_v13, 0.0 }
 0x17f   : > { %3090 = vadd.xlane.f32.xlu1 %v5497_v46  ;;  %7271 = vst [vmem:[#allocation82_spill] sm:$0xff] %v5893_v7  ;;  %7272 = vst [vmem:[#allocation83_spill] sm:$0xff] %v5897_v56  ;;  %v5904_v8 = vpop.f32.mrb[39].mxu0  ;;  %v5906_v48 = vpop.f32.mrb[39].mxu1  ;;  %v3004_v46 = vsel %vm2900_vm12, %v5893_v7, 0.0  ;;  %v3052_v5 = vsel %vm2948_vm15, %v5897_v56, 0.0  ;;  %v5938_v13 = vadd.f32 %v3003_v27, %v3002_v34  ;;  %v7282_v34 = vmax.f32 %v5530_v3, %v5542_v57 }
 0x180   : > { %7273 = vst [vmem:[#allocation84_spill] sm:$0xff] %v5904_v8  ;;  %7274 = vst [vmem:[#allocation85_spill] sm:$0xff] %v5906_v48  ;;  %v4211_v6 = vpack.c.bf16 %v5904_v8, %v5893_v7  ;;  %1141 = vmax.xlane.f32.xlu0 %v7275_v51  ;;  %v4219_v24 = vpack.c.bf16 %v5906_v48, %v5897_v56  ;;  %v2800_v18 = vpop.permute.xlu0 %2799  ;;  %v5943_v51 = vadd.f32 %v3051_v26, %v3050_v32 }
 0x181   : > { %1026 = vst [vmem:[%s5183_s16 + $0x30] sm:$0xff] %v4210_v44  ;;  %1034 = vst [vmem:[%s5183_s16 + $0x70] sm:$0xff] %v4218_v15  ;;  %v3005_v44 = vsel %vm2901_vm13, %v5904_v8, 0.0  ;;  %v3053_v15 = vsel %vm2949_vm1, %v5906_v48, 0.0  ;;  %vm2952_vm7 = vcmp.eq.s32.totalorder %v5126_v43, %v2800_v18  ;;  %vm2953_vm10 = vcmp.eq.s32.totalorder %v5129_v45, %v2800_v18 }
 0x182   : > { %7276 = vst [vmem:[#allocation86_spill] sm:$0xff] %v5943_v51  ;;  %1027 = vst [vmem:[%s5183_s16 + $0x38] sm:$0xff] %v4211_v6  ;;  %v5950_v35 = vadd.f32 %v3005_v44, %v3004_v46  ;;  %v5952_v37 = vadd.f32 %v3053_v15, %v3052_v5  ;;  %vm2954_vm11 = vcmp.eq.s32.totalorder %v5126_v43, %v2807_v38 }
 0x183   : > { %3162 = vadd.xlane.f32.xlu1 %v5499_v47  ;;  %1035 = vst [vmem:[%s5183_s16 + $0x78] sm:$0xff] %v4219_v24  ;;  %vm2955_vm12 = vcmp.eq.s32.totalorder %v5129_v45, %v2807_v38  ;;  %vm2908_vm13 = vcmp.eq.s32.totalorder %v5126_v43, %v5123_v42  ;;  %vm2907_vm15 = vcmp.eq.s32.totalorder %v5129_v45, %v5121_v41 }
 0x184   : > { %7277 = vst [vmem:[#allocation87_spill] sm:$0xff] %v5952_v37  ;;  %3087 = vadd.xlane.f32.xlu0 %v5481_v23  ;;  %v5963_v26 = vpop.f32.mrb[40].mxu0  ;;  %v5965_v47 = vpop.f32.mrb[40].mxu1  ;;  %vm2909_vm0 = vcmp.eq.s32.totalorder %v5129_v45, %v5123_v42  ;;  %v7306_v42 = vmax.f32 %v5608_v19, %v5619_v1 }
 0x185   : > { %7278 = vst [vmem:[#allocation88_spill] sm:$0xff] %v5963_v26  ;;  %7279 = vst [vmem:[#allocation89_spill] sm:$0xff] %v5965_v47  ;;  %v3006_v5 = vsel %vm2902_vm6, %v5963_v26, 0.0  ;;  %v5971_v24 = vpop.f32.mrb[41].mxu0  ;;  %v5973_v30 = vpop.f32.mrb[41].mxu1  ;;  %v3054_v23 = vsel %vm2950_vm2, %v5965_v47, 0.0 }
 0x186   : > { %7280 = vst [vmem:[#allocation90_spill] sm:$0xff] %v5971_v24  ;;  %7281 = vst [vmem:[#allocation91_spill] sm:$0xff] %v5973_v30  ;;  %v3007_v32 = vsel %vm2903_vm8, %v5971_v24, 0.0  ;;  %v5988_v46 = vpop.f32.mrb[42].mxu0  ;;  %v5990_v27 = vpop.f32.mrb[42].mxu1  ;;  %v3055_v44 = vsel %vm2951_vm3, %v5973_v30, 0.0 }
 0x187   : > { %1078 = vmax.xlane.f32.xlu1 %v7282_v34  ;;  %7283 = vst [vmem:[#allocation92_spill] sm:$0xff] %v5988_v46  ;;  %7284 = vst [vmem:[#allocation93_spill] sm:$0xff] %v5990_v27  ;;  %v3008_v15 = vsel %vm2904_vm4, %v5988_v46, 0.0  ;;  %v6000_v6 = vpop.f32.mrb[43].mxu0  ;;  %v3056_v34 = vsel %vm2952_vm7, %v5990_v27, 0.0  ;;  %v6005_v39 = vpop.f32.mrb[43].mxu1  ;;  %v6007_v51 = vadd.f32 %v3007_v32, %v3006_v5  ;;  %v6009_v37 = vadd.f32 %v3055_v44, %v3054_v23 }
 0x188   : > { %7285 = vst [vmem:[#allocation94_spill] sm:$0xff] %v6000_v6  ;;  %7286 = vst [vmem:[#allocation95_spill] sm:$0xff] %v6005_v39  ;;  %v3009_v59 = vsel %vm2905_vm5, %v6000_v6, 0.0  ;;  %v3057_v57 = vsel %vm2953_vm10, %v6005_v39, 0.0  ;;  %3159 = vadd.xlane.f32.xlu0 %v5483_v10  ;;  %v7289_v32 = vmax.f32 %v5532_v0, %v5544_v17  ;;  %v2811_v44 = vpop.permute.xlu0 %2810  ;;  %v7291_v10 = vmax.f32 %v5509_v55, %v5520_v29 }
 0x189   : > { %7287 = vst [vmem:[#allocation96_spill] sm:$0xff] %v6009_v37  ;;  %v6023_v5 = vadd.f32 %v3009_v59, %v3008_v15  ;;  %v6025_v23 = vadd.f32 %v3057_v57, %v3056_v34  ;;  %vm2956_vm1 = vcmp.eq.s32.totalorder %v5126_v43, %v2811_v44  ;;  %vm2957_vm2 = vcmp.eq.s32.totalorder %v5129_v45, %v2811_v44  ;;  %v7309_v44 = vld [vmem:[#allocation66_spill] sm:$0xff] }
 0x18a   : > { %v7308_v45 = vmax.f32 %v5612_v20, %v5621_v28  ;;  %vm1247_vm3 = vcmask 130112   ;;  %vm1456_vm4 = vcmask 1041409   ;;  %vm1458_vm5 = vcmask 1042434  }
 0x18b   : > { %7288 = vst [vmem:[#allocation97_spill] sm:$0xff] %v6025_v23  ;;  %1150 = vmax.xlane.f32.xlu1 %v7289_v32 }
 0x18c   : > { %v6038_v40 = vpop.f32.mrb[44].mxu1  ;;  %1075 = vmax.xlane.f32.xlu0 %v7291_v10  ;;  %v6043_v57 = vpop.f32.mrb[44].mxu0 }
 0x18d   : > { %7290 = vst [vmem:[#allocation98_spill] sm:$0xff] %v6038_v40  ;;  %7292 = vst [vmem:[#allocation99_spill] sm:$0xff] %v6043_v57  ;;  %v3010_v59 = vsel %vm2906_vm14, %v6043_v57, 0.0  ;;  %v6049_v18 = vpop.f32.mrb[45].mxu0  ;;  %v6051_v15 = vpop.f32.mrb[45].mxu1  ;;  %v3058_v41 = vsel %vm2954_vm11, %v6038_v40, 0.0 }
 0x18e   : > { %7293 = vst [vmem:[#allocation100_spill] sm:$0xff] %v6049_v18  ;;  %7294 = vst [vmem:[#allocation101_spill] sm:$0xff] %v6051_v15  ;;  %v3011_v32 = vsel %vm2907_vm15, %v6049_v18, 0.0  ;;  %v3059_v49 = vsel %vm2955_vm12, %v6051_v15, 0.0  ;;  %v6063_v36 = vpop.f32.mrb[46].mxu1  ;;  %v6066_v37 = vpop.f32.mrb[46].mxu0 }
 0x18f   : > { %7295 = vst [vmem:[#allocation102_spill] sm:$0xff] %v6063_v36  ;;  %3096 = vadd.xlane.f32.xlu1 %v5571_v2  ;;  %7296 = vst [vmem:[#allocation103_spill] sm:$0xff] %v6066_v37  ;;  %v3060_v23 = vsel %vm2956_vm1, %v6063_v36, 0.0  ;;  %v3012_v34 = vsel %vm2908_vm13, %v6066_v37, 0.0  ;;  %v6073_v17 = vpop.f32.mrb[47].mxu0  ;;  %v6075_v10 = vpop.f32.mrb[47].mxu1  ;;  %v6077_v0 = vadd.f32 %v3011_v32, %v3010_v59  ;;  %v6079_v38 = vadd.f32 %v3059_v49, %v3058_v41 }
 0x190   : > { %7297 = vst [vmem:[#allocation104_spill] sm:$0xff] %v6073_v17  ;;  %7298 = vst [vmem:[#allocation105_spill] sm:$0xff] %v6075_v10  ;;  %v1113_v2 = vmax.f32 %v6066_v37, %v6073_v17  ;;  %v3013_v29 = vsel %vm2909_vm0, %v6073_v17, 0.0  ;;  %v1185_v55 = vmax.f32 %v6063_v36, %v6075_v10  ;;  %v3061_v3 = vsel %vm2957_vm2, %v6075_v10, 0.0  ;;  %v7300_v15 = vld [vmem:[#allocation56_spill] sm:$0xff]  ;;  %v7301_v59 = vld [vmem:[#allocation58_spill] sm:$0xff] }
 0x191   : > { %7299 = vst [vmem:[#allocation106_spill] sm:$0xff] %v6079_v38  ;;  %v7302_v32 = vmax.f32 %v7300_v15, %v7301_v59  ;;  %v3131_v49 = vadd.f32 %v3013_v29, %v3012_v34  ;;  %v6095_v41 = vadd.f32 %v3061_v3, %v3060_v23  ;;  %v7304_v38 = vld [vmem:[#allocation65_spill] sm:$0xff]  ;;  %v7305_v37 = vld [vmem:[#allocation63_spill] sm:$0xff]  ;;  %v7307_v36 = vld [vmem:[#allocation64_spill] sm:$0xff] }
 0x192   : > { %v7310_v10 = vld [vmem:[#allocation68_spill] sm:$0xff]  ;;  %v7312_v29 = vld [vmem:[#allocation67_spill] sm:$0xff]  ;;  %v7313_v3 = vld [vmem:[#allocation69_spill] sm:$0xff] }
 0x193   : > { %1147 = vmax.xlane.f32.xlu0 %v7302_v32  ;;  %7303 = vst [vmem:[#allocation56_spill] sm:$0xff] %v6095_v41  ;;  %3168 = vadd.xlane.f32.xlu1 %v7304_v38  ;;  %v7311_v32 = vmax.f32 %v7309_v44, %v7310_v10  ;;  %v7314_v23 = vmax.f32 %v7312_v29, %v7313_v3 }
 0x197   : > { %3093 = vadd.xlane.f32.xlu0 %v7305_v37  ;;  %1084 = vmax.xlane.f32.xlu1 %v7306_v42  ;;  %v7315_v37 = vmax.f32 %v5709_v33, %v5723_v12  ;;  %v7324_v42 = vld [vmem:[#allocation76_spill] sm:$0xff] }
 0x19b   : > { %3165 = vadd.xlane.f32.xlu0 %v7307_v36  ;;  %1156 = vmax.xlane.f32.xlu1 %v7308_v45  ;;  %v7316_v36 = vmax.f32 %v5713_v53, %v5728_v52  ;;  %v7325_v45 = vld [vmem:[#allocation71_spill] sm:$0xff] }
 0x19f   : > { %1081 = vmax.xlane.f32.xlu0 %v7311_v32  ;;  %3102 = vadd.xlane.f32.xlu1 %v5663_v62  ;;  %v7317_v62 = vmax.f32 %v5688_v21, %v5696_v16 }
 0x1a3   : > { %1153 = vmax.xlane.f32.xlu0 %v7314_v23  ;;  %3174 = vadd.xlane.f32.xlu1 %v5665_v58  ;;  %v7318_v58 = vld [vmem:[#allocation70_spill] sm:$0xff] }
 0x1a4   : > { %v7319_v34 = vmax.f32 %v5690_v54, %v7318_v58  ;;  %v7329_v23 = vld [vmem:[#allocation74_spill] sm:$0xff] }
 0x1a7   : > { %3099 = vadd.xlane.f32.xlu0 %v5654_v11  ;;  %1090 = vmax.xlane.f32.xlu1 %v7315_v37  ;;  %v7320_v11 = vmax.f32 %v5819_v25, %v5833_v61  ;;  %v7330_v37 = vmax.f32 %v5897_v56, %v5906_v48 }
 0x1ab   : > { %3171 = vadd.xlane.f32.xlu0 %v5656_v9  ;;  %1162 = vmax.xlane.f32.xlu1 %v7316_v36  ;;  %v7321_v9 = vmax.f32 %v5823_v4, %v5838_v22 }
 0x1af   : > { %1087 = vmax.xlane.f32.xlu0 %v7317_v62  ;;  %3108 = vadd.xlane.f32.xlu1 %v5748_v63  ;;  %v7322_v63 = vld [vmem:[#allocation72_spill] sm:$0xff]  ;;  %v7331_v62 = vld [vmem:[#allocation78_spill] sm:$0xff] }
 0x1b0   : > { %v7323_v38 = vmax.f32 %v5796_v50, %v7322_v63 }
 0x1b3   : > { %1159 = vmax.xlane.f32.xlu0 %v7319_v34  ;;  %3180 = vadd.xlane.f32.xlu1 %v5750_v14  ;;  %v7326_v14 = vld [vmem:[#allocation73_spill] sm:$0xff]  ;;  %v7332_v34 = vld [vmem:[#allocation80_spill] sm:$0xff] }
 0x1b4   : > { %v7327_v32 = vmax.f32 %v7325_v45, %v7326_v14 }
 0x1b7   : > { %3105 = vadd.xlane.f32.xlu0 %v5730_v31  ;;  %1096 = vmax.xlane.f32.xlu1 %v7320_v11  ;;  %v7328_v31 = vmax.f32 %v5893_v7, %v5904_v8  ;;  %v7333_v11 = vmax.f32 %v7331_v62, %v7332_v34 }
 0x1bb   : > { %3177 = vadd.xlane.f32.xlu0 %v5732_v60  ;;  %1168 = vmax.xlane.f32.xlu1 %v7321_v9 }
 0x1bf   : > { %1093 = vmax.xlane.f32.xlu0 %v7323_v38  ;;  %3114 = vadd.xlane.f32.xlu1 %v7324_v42  ;;  %v7334_v42 = vld [vmem:[#allocation79_spill] sm:$0xff] }
 0x1c3   : > { %1165 = vmax.xlane.f32.xlu0 %v7327_v32  ;;  %1102 = vmax.xlane.f32.xlu1 %v7328_v31  ;;  %v7335_v32 = vld [vmem:[#allocation81_spill] sm:$0xff] }
 0x1c4   : > { %v7336_v31 = vmax.f32 %v7334_v42, %v7335_v32  ;;  %v7339_v32 = vmax.f32 %v5963_v26, %v5971_v24 }
 0x1c5   : > { %v1046_v60 = vpop.xlane.xlu0 %1045 }
 0x1c7   : > { %3111 = vadd.xlane.f32.xlu0 %v7329_v23  ;;  %1174 = vmax.xlane.f32.xlu1 %v7330_v37  ;;  %v7337_v37 = vmax.f32 %v5988_v46, %v6000_v6 }
 0x1c8   : > { %v6152_v36 = vpop.xlane.xlu1 %1120 }
 0x1c9   : > { %v6157_v9 = vpop.xlane.xlu0 %1117 }
 0x1cb   : > { %1099 = vmax.xlane.f32.xlu0 %v7333_v11  ;;  %3120 = vadd.xlane.f32.xlu1 %v5950_v35  ;;  %v7338_v35 = vmax.f32 %v5990_v27, %v6005_v39  ;;  %v1242_v39 = vadd.s32 4294967288, %v5126_v43 }
 0x1cc   : > { %v6160_v38 = vpop.xlane.xlu1 %3138 }
 0x1cd   : > { %v6165_v23 = vpop.xlane.xlu0 %3063 }
 0x1cf   : > { %1171 = vmax.xlane.f32.xlu0 %v7336_v31  ;;  %1108 = vmax.xlane.f32.xlu1 %v7337_v37  ;;  %v7340_v37 = vmax.f32 %v5965_v47, %v5973_v30  ;;  %v7342_v30 = vld [vmem:[#allocation11_spill] sm:$0xff] }
 0x1d0   : > { %v1052_v41 = vpop.xlane.xlu1 %1051 }
 0x1d1   : > { %v6171_v11 = vpop.xlane.xlu0 %3135 }
 0x1d3   : > { %3117 = vadd.xlane.f32.xlu0 %v5938_v13  ;;  %1180 = vmax.xlane.f32.xlu1 %v7338_v35 }
 0x1d4   : > { %v1055_v48 = vpop.xlane.xlu1 %1054 }
 0x1d5   : > { %v1049_v31 = vpop.xlane.xlu0 %1048 }
 0x1d7   : > { %1105 = vmax.xlane.f32.xlu0 %v7339_v32  ;;  %3126 = vadd.xlane.f32.xlu1 %v6023_v5  ;;  %v7341_v5 = vmax.f32 %v6043_v57, %v6049_v18 }
 0x1d8   : > { %v1127_v42 = vpop.xlane.xlu1 %1126 }
 0x1d9   : > { %v6183_v13 = vpop.xlane.xlu0 %3066 }
 0x1db   : > { %1177 = vmax.xlane.f32.xlu0 %v7340_v37  ;;  %1114 = vmax.xlane.f32.xlu1 %v1113_v2  ;;  %v6194_v37 = vsub.s32 %v5126_v43, %v7342_v30  ;;  %v6197_v2 = vsub.s32 %v1242_v39, %v7342_v30 }
 0x1dc   : > { %v3073_v56 = vpop.xlane.xlu1 %3072 }
 0x1dd   : > { %v1124_v35 = vpop.xlane.xlu0 %1123  ;;  %7343 = vst [vmem:[#allocation58_spill] sm:$0xff] %v6194_v37  ;;  %7344 = vst [vmem:[#allocation65_spill] sm:$0xff] %v6197_v2  ;;  %v1252_v17 = vrot.slane %v1052_v41, %v6194_v37  ;;  %v1256_v24 = vrot.slane %v1055_v48, %v6197_v2 }
 0x1df   : > { %3123 = vadd.xlane.f32.xlu0 %v6007_v51  ;;  %1186 = vmax.xlane.f32.xlu1 %v1185_v55  ;;  %v7345_v55 = vld [vmem:[#allocation101_spill] sm:$0xff]  ;;  %v1257_v43 = vsel %vm1247_vm3, %v1256_v24, %v1252_v17  ;;  %v6217_v17 = vld [vmem:[#allocation2] sm:$0x7] }
 0x1e0   : > { %v6187_v27 = vpop.xlane.xlu1 %3144  ;;  %v7346_v47 = vmax.f32 %v6038_v40, %v7345_v55  ;;  %7347 = vst [vmem:[#allocation63_spill] sm:$0xff] %v6217_v17 }
 0x1e1   : > { %v3070_v32 = vpop.xlane.xlu0 %3069 }
 0x1e3   : > { %1111 = vmax.xlane.f32.xlu0 %v7341_v5  ;;  %3132 = vadd.xlane.f32.xlu1 %v3131_v49  ;;  %v1246_v5 = vrot.slane %v1049_v31, %v6197_v2  ;;  %v1241_v49 = vrot.slane %v1046_v60, %v6194_v37  ;;  %v1355_v60 = vrot.slane %v6152_v36, %v6197_v2 }
 0x1e4   : > { %v1061_v51 = vpop.xlane.xlu1 %1060  ;;  %v1351_v31 = vrot.slane %v6157_v9, %v6194_v37 }
 0x1e5   : > { %v3142_v18 = vpop.xlane.xlu0 %3141  ;;  %v1248_v39 = vsel %vm1247_vm3, %v1246_v5, %v1241_v49  ;;  %v1265_v41 = vrot.slane %v1061_v51, %v6197_v2  ;;  %v3266_v49 = vrot.slane %v3070_v32, %v6194_v37 }
 0x1e6   : > { %v1457_v5 = vsel %vm1456_vm4, %v1257_v43, %v1248_v39  ;;  %v1356_v40 = vsel %vm1247_vm3, %v1355_v60, %v1351_v31  ;;  %v3261_v43 = vrot.slane %v6183_v13, %v6197_v2  ;;  %v3270_v39 = vrot.slane %v3073_v56, %v6197_v2 }
 0x1e7   : > { %1183 = vmax.xlane.f32.xlu0 %v7346_v47  ;;  %v1360_v47 = vrot.slane %v1124_v35, %v6194_v37  ;;  %v3257_v13 = vrot.slane %v6165_v23, %v6194_v37  ;;  %v3374_v31 = vrot.slane %v3142_v18, %v6194_v37  ;;  %v3378_v23 = vrot.slane %v6187_v27, %v6197_v2 }
 0x1e8   : > { %v1133_v57 = vpop.xlane.xlu1 %1132  ;;  %v3271_v56 = vsel %vm1247_vm3, %v3270_v39, %v3266_v49  ;;  %v2958_v49 = vld [vmem:[#allocation4] sm:$0x7] }
 0x1e9   : > { %v1058_v30 = vpop.xlane.xlu0 %1057  ;;  %v1373_v36 = vrot.slane %v1133_v57, %v6197_v2 }
 0x1ea   : > { %v1261_v48 = vrot.slane %v1058_v30, %v6194_v37 }
 0x1eb   : > { %3129 = vadd.xlane.f32.xlu0 %v6077_v0  ;;  %v1364_v0 = vrot.slane %v1127_v42, %v6197_v2 }
 0x1ec   : > { %v3079_v24 = vpop.xlane.xlu1 %3078  ;;  %v1266_v35 = vsel %vm1247_vm3, %v1265_v41, %v1261_v48  ;;  %v7350_v48 = vld [vmem:[#allocation12_spill] sm:$0xff] }
 0x1ed   : > { %v1365_v51 = vsel %vm1247_vm3, %v1364_v0, %v1360_v47  ;;  %v1459_v30 = vsel %vm1458_vm5, %v1266_v35, %v1457_v5  ;;  %v1130_v55 = vpop.xlane.xlu0 %1129  ;;  %v6233_v47 = vld [vmem:[#allocation2 + $0x10] sm:$0x7]  ;;  %v3279_v5 = vrot.slane %v3079_v24, %v6197_v2 }
 0x1ee   : > { %v6226_v9 = vmax.f32 %v6217_v17, %v1459_v30  ;;  %v1369_v42 = vrot.slane %v1130_v55, %v6194_v37  ;;  %7349 = vst [vmem:[#allocation66_spill] sm:$0xff] %v6233_v47  ;;  %v1466_v41 = vsel %vm1456_vm4, %v1365_v51, %v1356_v40  ;;  %v3365_v30 = vrot.slane %v6171_v11, %v6194_v37  ;;  %v2962_v24 = vld [vmem:[#allocation4 + $0x10] sm:$0x7] }
 0x1ef   : > { %v3369_v11 = vrot.slane %v6160_v38, %v6197_v2 }
 0x1f0   : > { %7348 = vst [vmem:[#allocation64_spill] sm:$0xff] %v6226_v9  ;;  %v3151_v32 = vpop.xlane.xlu1 %3150  ;;  %2531 = vst.msk [vmem:[#allocation2] sm:$0x7] %vm338_vm9, %v6226_v9  ;;  %v1374_v55 = vsel %vm1247_vm3, %v1373_v36, %v1369_v42  ;;  %v1493_v60 = vrot.slane %v6226_v9, %v7350_v48  ;;  %v3262_v36 = vsel %vm1247_vm3, %v3261_v43, %v3257_v13 }
 0x1f1   : > { %v1467_v40 = vsel %vm1458_vm5, %v1374_v55, %v1466_v41  ;;  %v3076_v0 = vpop.xlane.xlu0 %3075  ;;  %v3470_v42 = vsel %vm1456_vm4, %v3271_v56, %v3262_v36  ;;  %v3379_v43 = vsel %vm1247_vm3, %v3378_v23, %v3374_v31  ;;  %v7352_v55 = vld [vmem:[#allocation13_spill] sm:$0xff]  ;;  %v3387_v56 = vrot.slane %v3151_v32, %v6197_v2 }
 0x1f2   : > { %v6250_v35 = vmax.f32 %v6233_v47, %v1467_v40  ;;  %v3275_v51 = vrot.slane %v3076_v0, %v6194_v37  ;;  %v1504_v13 = vrot.slane %v6226_v9, %v7352_v55  ;;  %v3370_v36 = vsel %vm1247_vm3, %v3369_v11, %v3365_v30 }
 0x1f3   : > { %v3478_v38 = vsel %vm1456_vm4, %v3379_v43, %v3370_v36 }
 0x1f4   : > { %7351 = vst [vmem:[#allocation68_spill] sm:$0xff] %v6250_v35  ;;  %v6258_v18 = vpop.xlane.xlu1 %1066  ;;  %1499 = vbcast.lane.b32.xlu1 %v1493_v60, 264  ;;  %2535 = vst.msk [vmem:[#allocation2 + $0x10] sm:$0x7] %vm338_vm9, %v6250_v35  ;;  %v3280_v39 = vsel %vm1247_vm3, %v3279_v5, %v3275_v51 }
 0x1f5   : > { %v3471_v27 = vsel %vm1458_vm5, %v3280_v39, %v3470_v42  ;;  %v3148_v41 = vpop.xlane.xlu0 %3147 }
 0x1f6   : > { %v3494_v40 = vadd.f32 %v3471_v27, %v2958_v49  ;;  %v3383_v0 = vrot.slane %v3148_v41, %v6194_v37  ;;  %v7353_v49 = vld [vmem:[#allocation14_spill] sm:$0xff]  ;;  %v1625_v27 = vrot.slane %v6250_v35, %v7350_v48 }
 0x1f7   : > { %v1515_v39 = vrot.slane %v6226_v9, %v7353_v49  ;;  %v1274_v9 = vrot.slane %v6258_v18, %v6197_v2 }
 0x1f8   : > { %v6275_v5 = vpop.xlane.xlu1 %1138  ;;  %1506 = vbcast.lane.b32.xlu1 %v1504_v13, 256  ;;  %3502 = vst.msk [vmem:[#allocation4] sm:$0x7] %vm338_vm9, %v3494_v40  ;;  %v3388_v31 = vsel %vm1247_vm3, %v3387_v56, %v3383_v0  ;;  %v1647_v40 = vrot.slane %v6250_v35, %v7353_v49 }
 0x1f9   : > { %v3479_v51 = vsel %vm1458_vm5, %v3388_v31, %v3478_v38  ;;  %v1064_v23 = vpop.xlane.xlu0 %1063 }
 0x1fa   : > { %v3498_v42 = vadd.f32 %v3479_v51, %v2962_v24  ;;  %v1270_v57 = vrot.slane %v1064_v23, %v6194_v37 }
 0x1fc   : > { %v6281_v32 = vpop.xlane.xlu1 %3084  ;;  %1510 = vbcast.lane.b32.xlu1 %v1504_v13, 264  ;;  %3506 = vst.msk [vmem:[#allocation4 + $0x10] sm:$0x7] %vm338_vm9, %v3498_v42  ;;  %v1636_v13 = vrot.slane %v6250_v35, %v7352_v55 }
 0x1fd   : > { %v1136_v30 = vpop.xlane.xlu0 %1135 }
 0x1fe   : > { %v1378_v6 = vrot.slane %v1136_v30, %v6194_v37 }
 0x200   : > { %v6286_v11 = vpop.xlane.xlu1 %3156  ;;  %1521 = vbcast.lane.b32.xlu1 %v1515_v39, 264 }
 0x201   : > { %1495 = vbcast.lane.b32.xlu0 %v1493_v60, 256  ;;  %v6288_v43 = vpop.xlane.xlu0 %3081 }
 0x204   : > { %v1073_v24 = vpop.xlane.xlu1 %1072  ;;  %1631 = vbcast.lane.b32.xlu1 %v1625_v27, 264 }
 0x205   : > { %1517 = vbcast.lane.b32.xlu0 %v1515_v39, 256  ;;  %v6292_v41 = vpop.xlane.xlu0 %3153 }
 0x208   : > { %v1145_v56 = vpop.xlane.xlu1 %1144  ;;  %1642 = vbcast.lane.b32.xlu1 %v1636_v13, 264 }
 0x209   : > { %1627 = vbcast.lane.b32.xlu0 %v1625_v27, 256  ;;  %v1070_v60 = vpop.xlane.xlu0 %1069  ;;  %v1283_v27 = vrot.slane %v1073_v24, %v6197_v2  ;;  %v1391_v23 = vrot.slane %v1145_v56, %v6197_v2  ;;  %v6310_v24 = vld [vmem:[#allocation2 + $0x4] sm:$0x7] }
 0x20a   : > { %v1279_v42 = vrot.slane %v1070_v60, %v6194_v37  ;;  %v1275_v60 = vsel %vm1247_vm3, %v1274_v9, %v1270_v57  ;;  %7354 = vst [vmem:[#allocation67_spill] sm:$0xff] %v6310_v24 }
 0x20c   : > { %v3091_v0 = vpop.xlane.xlu1 %3090  ;;  %1653 = vbcast.lane.b32.xlu1 %v1647_v40, 264 }
 0x20d   : > { %1638 = vbcast.lane.b32.xlu0 %v1636_v13, 256  ;;  %v1142_v36 = vpop.xlane.xlu0 %1141  ;;  %v1284_v13 = vsel %vm1247_vm3, %v1283_v27, %v1279_v42 }
 0x20e   : > { %v1387_v35 = vrot.slane %v1142_v36, %v6194_v37  ;;  %v1460_v18 = vsel %vm1456_vm4, %v1284_v13, %v1275_v60  ;;  %v1382_v36 = vrot.slane %v6275_v5, %v6197_v2  ;;  %v3297_v5 = vrot.slane %v3091_v0, %v6197_v2 }
 0x210   : > { %v3163_v38 = vpop.xlane.xlu1 %3162  ;;  %v1383_v13 = vsel %vm1247_vm3, %v1382_v36, %v1378_v6 }
 0x211   : > { %1649 = vbcast.lane.b32.xlu0 %v1647_v40, 256  ;;  %v3088_v31 = vpop.xlane.xlu0 %3087 }
 0x214   : > { %v1079_v51 = vpop.xlane.xlu1 %1078 }
 0x215   : > { %v3160_v39 = vpop.xlane.xlu0 %3159  ;;  %v1292_v40 = vrot.slane %v1079_v51, %v6197_v2  ;;  %v1392_v51 = vsel %vm1247_vm3, %v1391_v23, %v1387_v35  ;;  %v6328_v35 = vld [vmem:[#allocation2 + $0x14] sm:$0x7] }
 0x216   : > { %7356 = vst [vmem:[#allocation70_spill] sm:$0xff] %v6328_v35  ;;  %v3401_v23 = vrot.slane %v3160_v39, %v6194_v37  ;;  %v2959_v39 = vld [vmem:[#allocation4 + $0x4] sm:$0x7] }
 0x218   : > { %v1151_v47 = vpop.xlane.xlu1 %1150 }
 0x219   : > { %v1076_v17 = vpop.xlane.xlu0 %1075  ;;  %v1400_v30 = vrot.slane %v1151_v47, %v6197_v2 }
 0x21a   : > { %v1288_v26 = vrot.slane %v1076_v17, %v6194_v37  ;;  %v3293_v17 = vrot.slane %v3088_v31, %v6194_v37 }
 0x21c   : > { %v3097_v46 = vpop.xlane.xlu1 %3096  ;;  %v1293_v42 = vsel %vm1247_vm3, %v1292_v40, %v1288_v26  ;;  %v3284_v26 = vrot.slane %v6288_v43, %v6194_v37  ;;  %v1468_v40 = vsel %vm1456_vm4, %v1392_v51, %v1383_v13  ;;  %v3288_v43 = vrot.slane %v6281_v32, %v6197_v2 }
 0x21d   : > { %v1461_v9 = vsel %vm1458_vm5, %v1293_v42, %v1460_v18  ;;  %v3298_v0 = vsel %vm1247_vm3, %v3297_v5, %v3293_v17  ;;  %v3306_v36 = vrot.slane %v3097_v46, %v6197_v2  ;;  %v3392_v32 = vrot.slane %v6292_v41, %v6194_v37 }
 0x21e   : > { %v6321_v56 = vmax.f32 %v6310_v24, %v1461_v9  ;;  %v3405_v17 = vrot.slane %v3163_v38, %v6197_v2  ;;  %v3396_v41 = vrot.slane %v6286_v11, %v6197_v2 }
 0x220   : > { %v1148_v57 = vpop.xlane.xlu0 %1147  ;;  %7355 = vst [vmem:[#allocation69_spill] sm:$0xff] %v6321_v56  ;;  %v3169_v31 = vpop.xlane.xlu1 %3168  ;;  %2532 = vst.msk [vmem:[#allocation2 + $0x4] sm:$0x7] %vm338_vm9, %v6321_v56  ;;  %v1526_v6 = vrot.slane %v6321_v56, %v7350_v48  ;;  %v3406_v38 = vsel %vm1247_vm3, %v3405_v17, %v3401_v23  ;;  %v1548_v23 = vrot.slane %v6321_v56, %v7353_v49 }
 0x221   : > { %v1396_v27 = vrot.slane %v1148_v57, %v6194_v37  ;;  %v3289_v57 = vsel %vm1247_vm3, %v3288_v43, %v3284_v26  ;;  %v1537_v26 = vrot.slane %v6321_v56, %v7352_v55 }
 0x222   : > { %1532 = vbcast.lane.b32.xlu1 %v1526_v6, 264  ;;  %1528 = vbcast.lane.b32.xlu0 %v1526_v6, 256 }
 0x223   : > { %v1401_v60 = vsel %vm1247_vm3, %v1400_v30, %v1396_v27  ;;  %v3472_v27 = vsel %vm1456_vm4, %v3298_v0, %v3289_v57  ;;  %v3397_v0 = vsel %vm1247_vm3, %v3396_v41, %v3392_v32 }
 0x224   : > { %v1469_v18 = vsel %vm1458_vm5, %v1401_v60, %v1468_v40  ;;  %v3094_v42 = vpop.xlane.xlu0 %3093  ;;  %v6352_v30 = vpop.xlane.xlu1 %1084  ;;  %v3414_v60 = vrot.slane %v3169_v31, %v6197_v2 }
 0x225   : > { %v6345_v51 = vmax.f32 %v6328_v35, %v1469_v18  ;;  %v3302_v9 = vrot.slane %v3094_v42, %v6194_v37  ;;  %v2963_v18 = vld [vmem:[#allocation4 + $0x14] sm:$0x7] }
 0x226   : > { %1543 = vbcast.lane.b32.xlu1 %v1537_v26, 264  ;;  %1539 = vbcast.lane.b32.xlu0 %v1537_v26, 256 }
 0x227   : > { %7357 = vst [vmem:[#allocation72_spill] sm:$0xff] %v6345_v51  ;;  %2536 = vst.msk [vmem:[#allocation2 + $0x14] sm:$0x7] %vm338_vm9, %v6345_v51  ;;  %v3307_v13 = vsel %vm1247_vm3, %v3306_v36, %v3302_v9  ;;  %v3480_v36 = vsel %vm1456_vm4, %v3406_v38, %v3397_v0  ;;  %v1658_v32 = vrot.slane %v6345_v51, %v7350_v48 }
 0x228   : > { %v3473_v5 = vsel %vm1458_vm5, %v3307_v13, %v3472_v27  ;;  %v3166_v40 = vpop.xlane.xlu0 %3165  ;;  %v1157_v42 = vpop.xlane.xlu1 %1156  ;;  %v1669_v13 = vrot.slane %v6345_v51, %v7352_v55  ;;  %v1680_v38 = vrot.slane %v6345_v51, %v7353_v49 }
 0x229   : > { %v3495_v6 = vadd.f32 %v3473_v5, %v2959_v39  ;;  %v3410_v43 = vrot.slane %v3166_v40, %v6194_v37 }
 0x22a   : > { %1554 = vbcast.lane.b32.xlu1 %v1548_v23, 264  ;;  %1550 = vbcast.lane.b32.xlu0 %v1548_v23, 256 }
 0x22b   : > { %3503 = vst.msk [vmem:[#allocation4 + $0x4] sm:$0x7] %vm338_vm9, %v3495_v6  ;;  %v3415_v11 = vsel %vm1247_vm3, %v3414_v60, %v3410_v43 }
 0x22c   : > { %v3481_v31 = vsel %vm1458_vm5, %v3415_v11, %v3480_v36  ;;  %v1082_v9 = vpop.xlane.xlu0 %1081  ;;  %v6375_v17 = vpop.xlane.xlu1 %3102 }
 0x22d   : > { %v3499_v57 = vadd.f32 %v3481_v31, %v2963_v18  ;;  %v1297_v31 = vrot.slane %v1082_v9, %v6194_v37 }
 0x22e   : > { %1664 = vbcast.lane.b32.xlu1 %v1658_v32, 264  ;;  %1660 = vbcast.lane.b32.xlu0 %v1658_v32, 256 }
 0x22f   : > { %3507 = vst.msk [vmem:[#allocation4 + $0x14] sm:$0x7] %vm338_vm9, %v3499_v57 }
 0x230   : > { %v1154_v39 = vpop.xlane.xlu0 %1153  ;;  %v6380_v27 = vpop.xlane.xlu1 %3174 }
 0x231   : > { %7358 = vst [vmem:[#allocation76_spill] sm:$0xff] %v6380_v27 }
 0x232   : > { %1675 = vbcast.lane.b32.xlu1 %v1669_v13, 264  ;;  %1671 = vbcast.lane.b32.xlu0 %v1669_v13, 256  ;;  %v1301_v13 = vrot.slane %v6352_v30, %v6197_v2 }
 0x234   : > { %v3100_v26 = vpop.xlane.xlu0 %3099  ;;  %v1091_v41 = vpop.xlane.xlu1 %1090 }
 0x235   : > { %v1310_v57 = vrot.slane %v1091_v41, %v6197_v2  ;;  %v6404_v41 = vld [vmem:[#allocation2 + $0x8] sm:$0x7] }
 0x236   : > { %1686 = vbcast.lane.b32.xlu1 %v1680_v38, 264  ;;  %1682 = vbcast.lane.b32.xlu0 %v1680_v38, 256  ;;  %7362 = vst [vmem:[#allocation107_spill] sm:$0xff] %v6404_v41 }
 0x238   : > { %v6386_v5 = vpop.xlane.xlu0 %3171  ;;  %v1163_v40 = vpop.xlane.xlu1 %1162 }
 0x239   : > { %7359 = vst [vmem:[#allocation71_spill] sm:$0xff] %v6386_v5  ;;  %v1405_v5 = vrot.slane %v1154_v39, %v6194_v37  ;;  %v1418_v9 = vrot.slane %v1163_v40, %v6197_v2 }
 0x23c   : > { %v1088_v60 = vpop.xlane.xlu0 %1087  ;;  %v3109_v6 = vpop.xlane.xlu1 %3108 }
 0x23d   : > { %v1306_v11 = vrot.slane %v1088_v60, %v6194_v37  ;;  %v1302_v60 = vsel %vm1247_vm3, %v1301_v13, %v1297_v31 }
 0x23f   : > { %v1311_v38 = vsel %vm1247_vm3, %v1310_v57, %v1306_v11 }
 0x240   : > { %v1160_v43 = vpop.xlane.xlu0 %1159  ;;  %v6388_v0 = vpop.xlane.xlu1 %3180  ;;  %v1462_v30 = vsel %vm1456_vm4, %v1311_v38, %v1302_v60 }
 0x241   : > { %7360 = vst [vmem:[#allocation73_spill] sm:$0xff] %v6388_v0  ;;  %v1414_v46 = vrot.slane %v1160_v43, %v6194_v37  ;;  %v1409_v43 = vrot.slane %v1157_v42, %v6197_v2  ;;  %v3324_v42 = vrot.slane %v3109_v6, %v6197_v2 }
 0x243   : > { %v1419_v57 = vsel %vm1247_vm3, %v1418_v9, %v1414_v46  ;;  %v1410_v38 = vsel %vm1247_vm3, %v1409_v43, %v1405_v5 }
 0x244   : > { %v3106_v18 = vpop.xlane.xlu0 %3105  ;;  %v1097_v36 = vpop.xlane.xlu1 %1096 }
 0x245   : > { %v1319_v27 = vrot.slane %v1097_v36, %v6197_v2  ;;  %v3320_v36 = vrot.slane %v3106_v18, %v6194_v37  ;;  %v1470_v18 = vsel %vm1456_vm4, %v1419_v57, %v1410_v38 }
 0x247   : > { %v3325_v6 = vsel %vm1247_vm3, %v3324_v42, %v3320_v36 }
 0x248   : > { %v6391_v23 = vpop.xlane.xlu0 %3177  ;;  %v1169_v32 = vpop.xlane.xlu1 %1168 }
 0x249   : > { %7361 = vst [vmem:[#allocation74_spill] sm:$0xff] %v6391_v23  ;;  %v1427_v39 = vrot.slane %v1169_v32, %v6197_v2 }
 0x24c   : > { %v1094_v47 = vpop.xlane.xlu0 %1093  ;;  %v3115_v23 = vpop.xlane.xlu1 %3114 }
 0x24d   : > { %v1315_v0 = vrot.slane %v1094_v47, %v6194_v37 }
 0x24f   : > { %v1320_v11 = vsel %vm1247_vm3, %v1319_v27, %v1315_v0  ;;  %v3311_v27 = vrot.slane %v3100_v26, %v6194_v37  ;;  %v6420_v0 = vld [vmem:[#allocation2 + $0x18] sm:$0x7]  ;;  %v3315_v26 = vrot.slane %v6375_v17, %v6197_v2 }
 0x250   : > { %v1463_v47 = vsel %vm1458_vm5, %v1320_v11, %v1462_v30  ;;  %v1166_v31 = vpop.xlane.xlu0 %1165  ;;  %7364 = vst [vmem:[#allocation109_spill] sm:$0xff] %v6420_v0  ;;  %v6422_v46 = vpop.xlane.xlu1 %1102  ;;  %v3333_v11 = vrot.slane %v3115_v23, %v6197_v2 }
 0x251   : > { %v6414_v40 = vmax.f32 %v6404_v41, %v1463_v47  ;;  %v1423_v13 = vrot.slane %v1166_v31, %v6194_v37  ;;  %v3316_v47 = vsel %vm1247_vm3, %v3315_v26, %v3311_v27  ;;  %v2960_v31 = vld [vmem:[#allocation4 + $0x8] sm:$0x7]  ;;  %v6477_v41 = vld [vmem:[#allocation2 + $0xc] sm:$0x7] }
 0x252   : > { %v3474_v17 = vsel %vm1456_vm4, %v3325_v6, %v3316_v47  ;;  %7366 = vst [vmem:[#allocation111_spill] sm:$0xff] %v6477_v41 }
 0x253   : > { %7363 = vst [vmem:[#allocation108_spill] sm:$0xff] %v6414_v40  ;;  %2533 = vst.msk [vmem:[#allocation2 + $0x8] sm:$0x7] %vm338_vm9, %v6414_v40  ;;  %v1428_v60 = vsel %vm1247_vm3, %v1427_v39, %v1423_v13  ;;  %v1559_v5 = vrot.slane %v6414_v40, %v7350_v48  ;;  %v1570_v13 = vrot.slane %v6414_v40, %v7352_v55 }
 0x254   : > { %v1471_v9 = vsel %vm1458_vm5, %v1428_v60, %v1470_v18  ;;  %v3112_v30 = vpop.xlane.xlu0 %3111  ;;  %v1175_v39 = vpop.xlane.xlu1 %1174  ;;  %v1581_v60 = vrot.slane %v6414_v40, %v7353_v49 }
 0x255   : > { %v6438_v43 = vmax.f32 %v6420_v0, %v1471_v9  ;;  %v3329_v57 = vrot.slane %v3112_v30, %v6194_v37  ;;  %1565 = vbcast.lane.b32.xlu1 %v1559_v5, 264  ;;  %1561 = vbcast.lane.b32.xlu0 %v1559_v5, 256 }
 0x257   : > { %7365 = vst [vmem:[#allocation110_spill] sm:$0xff] %v6438_v43  ;;  %2537 = vst.msk [vmem:[#allocation2 + $0x18] sm:$0x7] %vm338_vm9, %v6438_v43  ;;  %v3334_v23 = vsel %vm1247_vm3, %v3333_v11, %v3329_v57  ;;  %v1691_v6 = vrot.slane %v6438_v43, %v7350_v48  ;;  %v1702_v11 = vrot.slane %v6438_v43, %v7352_v55 }
 0x258   : > { %v3475_v38 = vsel %vm1458_vm5, %v3334_v23, %v3474_v17  ;;  %v1100_v42 = vpop.xlane.xlu0 %1099  ;;  %v6451_v27 = vpop.xlane.xlu1 %3120 }
 0x259   : > { %v3496_v18 = vadd.f32 %v3475_v38, %v2960_v31  ;;  %1576 = vbcast.lane.b32.xlu1 %v1570_v13, 264  ;;  %1572 = vbcast.lane.b32.xlu0 %v1570_v13, 256  ;;  %v1713_v31 = vrot.slane %v6438_v43, %v7353_v49 }
 0x25b   : > { %3504 = vst.msk [vmem:[#allocation4 + $0x8] sm:$0x7] %vm338_vm9, %v3496_v18  ;;  %v1324_v18 = vrot.slane %v1100_v42, %v6194_v37  ;;  %v1436_v42 = vrot.slane %v1175_v39, %v6197_v2 }
 0x25c   : > { %v1172_v5 = vpop.xlane.xlu0 %1171  ;;  %v1109_v26 = vpop.xlane.xlu1 %1108 }
 0x25d   : > { %1587 = vbcast.lane.b32.xlu1 %v1581_v60, 264  ;;  %1583 = vbcast.lane.b32.xlu0 %v1581_v60, 256  ;;  %v1337_v60 = vrot.slane %v1109_v26, %v6197_v2  ;;  %v1432_v0 = vrot.slane %v1172_v5, %v6194_v37 }
 0x260   : > { %v6458_v9 = vpop.xlane.xlu0 %3117  ;;  %v1181_v30 = vpop.xlane.xlu1 %1180 }
 0x261   : > { %1697 = vbcast.lane.b32.xlu1 %v1691_v6, 264  ;;  %1693 = vbcast.lane.b32.xlu0 %v1691_v6, 256 }
 0x264   : > { %v1106_v57 = vpop.xlane.xlu0 %1105  ;;  %v3127_v47 = vpop.xlane.xlu1 %3126 }
 0x265   : > { %1708 = vbcast.lane.b32.xlu1 %v1702_v11, 264  ;;  %1704 = vbcast.lane.b32.xlu0 %v1702_v11, 256  ;;  %v1333_v13 = vrot.slane %v1106_v57, %v6194_v37  ;;  %v1328_v11 = vrot.slane %v6422_v46, %v6197_v2 }
 0x267   : > { %v1338_v32 = vsel %vm1247_vm3, %v1337_v60, %v1333_v13  ;;  %v1329_v26 = vsel %vm1247_vm3, %v1328_v11, %v1324_v18 }
 0x268   : > { %v1178_v17 = vpop.xlane.xlu0 %1177  ;;  %v1115_v23 = vpop.xlane.xlu1 %1114  ;;  %v1464_v46 = vsel %vm1456_vm4, %v1338_v32, %v1329_v26  ;;  %v3338_v32 = vrot.slane %v6458_v9, %v6194_v37  ;;  %v7370_v26 = vld [vmem:[#allocation21_spill] sm:$0xff]  ;;  %v3342_v9 = vrot.slane %v6451_v27, %v6197_v2 }
 0x269   : > { %1719 = vbcast.lane.b32.xlu1 %v1713_v31, 264  ;;  %1715 = vbcast.lane.b32.xlu0 %v1713_v31, 256  ;;  %v1441_v36 = vrot.slane %v1178_v17, %v6194_v37  ;;  %v1445_v31 = vrot.slane %v1181_v30, %v6197_v2  ;;  %v1346_v57 = vrot.slane %v1115_v23, %v6197_v2 }
 0x26b   : > { %v1446_v13 = vsel %vm1247_vm3, %v1445_v31, %v1441_v36  ;;  %v3351_v36 = vrot.slane %v3127_v47, %v6197_v2 }
 0x26c   : > { %v3124_v38 = vpop.xlane.xlu0 %3123  ;;  %v1187_v6 = vpop.xlane.xlu1 %1186 }
 0x26d   : > { %v1454_v60 = vrot.slane %v1187_v6, %v6197_v2  ;;  %v3347_v39 = vrot.slane %v3124_v38, %v6194_v37 }
 0x270   : > { %v1112_v43 = vpop.xlane.xlu0 %1111  ;;  %v3133_v17 = vpop.xlane.xlu1 %3132 }
 0x271   : > { %v1342_v40 = vrot.slane %v1112_v43, %v6194_v37  ;;  %v1437_v43 = vsel %vm1247_vm3, %v1436_v42, %v1432_v0  ;;  %v7374_v0 = vld [vmem:[#allocation15_spill] sm:$0xff] }
 0x272   : > { %v1472_v6 = vsel %vm1456_vm4, %v1446_v13, %v1437_v43 }
 0x273   : > { %v1347_v5 = vsel %vm1247_vm3, %v1346_v57, %v1342_v40  ;;  %v6494_v40 = vld [vmem:[#allocation2 + $0x1c] sm:$0x7]  ;;  %v7369_v57 = vld [vmem:[#allocation19_spill] sm:$0xff] }
 0x274   : > { %v1465_v30 = vsel %vm1458_vm5, %v1347_v5, %v1464_v46  ;;  %v1184_v23 = vpop.xlane.xlu0 %1183  ;;  %7368 = vst [vmem:[#allocation113_spill] sm:$0xff] %v6494_v40  ;;  %v1500_v31 = vpop.permute.xlu1 %1499 }
 0x275   : > { %v6487_v18 = vmax.f32 %v6477_v41, %v1465_v30  ;;  %v1450_v11 = vrot.slane %v1184_v23, %v6194_v37  ;;  %v1756_v42 = vsub.f32 %v7369_v57, %v1500_v31  ;;  %v1757_v46 = vsub.f32 %v7370_v26, %v1500_v31 }
 0x276   : > { %v3352_v30 = vsel %vm1247_vm3, %v3351_v36, %v3347_v39  ;;  %v2961_v39 = vld [vmem:[#allocation4 + $0xc] sm:$0x7]  ;;  %v7372_v36 = vld [vmem:[#allocation23_spill] sm:$0xff] }
 0x277   : > { %7367 = vst [vmem:[#allocation112_spill] sm:$0xff] %v6487_v18  ;;  %2534 = vst.msk [vmem:[#allocation2 + $0xc] sm:$0x7] %vm338_vm9, %v6487_v18  ;;  %v1455_v38 = vsel %vm1247_vm3, %v1454_v60, %v1450_v11  ;;  %v1592_v5 = vrot.slane %v6487_v18, %v7350_v48  ;;  %v1854_v43 = vmul.f32 1.442695, %v1756_v42  ;;  %v3360_v11 = vrot.slane %v3133_v17, %v6197_v2  ;;  %v7373_v42 = vld [vmem:[#allocation25_spill] sm:$0xff] }
 0x278   : > { %v1473_v47 = vsel %vm1458_vm5, %v1455_v38, %v1472_v6  ;;  %v3130_v13 = vpop.xlane.xlu0 %3129  ;;  %v1856_v60 = vmul.f32 1.442695, %v1757_v46  ;;  %v1507_v27 = vpop.permute.xlu1 %1506  ;;  %v3343_v6 = vsel %vm1247_vm3, %v3342_v9, %v3338_v32  ;;  %v1603_v32 = vrot.slane %v6487_v18, %v7352_v55 }
 0x279   : > { %v6510_v23 = vmax.f32 %v6494_v40, %v1473_v47  ;;  %v3356_v31 = vrot.slane %v3130_v13, %v6194_v37  ;;  %1598 = vbcast.lane.b32.xlu1 %v1592_v5, 264  ;;  %1594 = vbcast.lane.b32.xlu0 %v1592_v5, 256  ;;  %v1758_v57 = vsub.f32 %v7372_v36, %v1507_v27  ;;  %4360 = vpow2.f32 %v1854_v43  ;;  %v7375_v36 = vld [vmem:[#allocation17_spill] sm:$0xff]  ;;  %v7376_v43 = vld [vmem:[#allocation27_spill] sm:$0xff] }
 0x27a   : > { %v1759_v26 = vsub.f32 %v7373_v42, %v1507_v27  ;;  %v3476_v17 = vsel %vm1456_vm4, %v3352_v30, %v3343_v6  ;;  %4362 = vpow2.f32 %v1856_v60 }
 0x27b   : > { %7371 = vst [vmem:[#allocation19_spill] sm:$0xff] %v6510_v23  ;;  %2538 = vst.msk [vmem:[#allocation2 + $0x1c] sm:$0x7] %vm338_vm9, %v6510_v23  ;;  %v3361_v46 = vsel %vm1247_vm3, %v3360_v11, %v3356_v31  ;;  %v1858_v13 = vmul.f32 1.442695, %v1758_v57  ;;  %v7377_v11 = vld [vmem:[#allocation29_spill] sm:$0xff] }
 0x27c   : > { %v1496_v47 = vpop.permute.xlu0 %1495  ;;  %v3477_v9 = vsel %vm1458_vm5, %v3361_v46, %v3476_v17  ;;  %v1860_v38 = vmul.f32 1.442695, %v1759_v26  ;;  %v1511_v30 = vpop.permute.xlu1 %1510  ;;  %v7378_v26 = vld [vmem:[#allocation31_spill] sm:$0xff]  ;;  %v7379_v46 = vld [vmem:[#allocation33_spill] sm:$0xff] }
 0x27d   : > { %v3497_v5 = vadd.f32 %v3477_v9, %v2961_v39  ;;  %v1754_v40 = vsub.f32 %v7374_v0, %v1496_v47  ;;  %v1755_v41 = vsub.f32 %v7375_v36, %v1496_v47  ;;  %1609 = vbcast.lane.b32.xlu1 %v1603_v32, 264  ;;  %1605 = vbcast.lane.b32.xlu0 %v1603_v32, 256  ;;  %4364 = vpow2.f32 %v1858_v13  ;;  %v7380_v13 = vld [vmem:[#allocation35_spill] sm:$0xff] }
 0x27e   : > { %v1760_v27 = vsub.f32 %v7376_v43, %v1511_v30  ;;  %v1761_v31 = vsub.f32 %v7377_v11, %v1511_v30  ;;  %v1614_v39 = vrot.slane %v6487_v18, %v7353_v49  ;;  %4366 = vpow2.f32 %v1860_v38  ;;  %v7382_v11 = vld [vmem:[#allocation16_spill] sm:$0xff] }
 0x27f   : > { %3505 = vst.msk [vmem:[#allocation4 + $0xc] sm:$0x7] %vm338_vm9, %v3497_v5  ;;  %v1850_v60 = vmul.f32 1.442695, %v1754_v40  ;;  %v1852_v6 = vmul.f32 1.442695, %v1755_v41  ;;  %v1724_v38 = vrot.slane %v6510_v23, %v7350_v48 }
 0x280   : > { %v1518_v42 = vpop.permute.xlu0 %1517  ;;  %v1862_v0 = vmul.f32 1.442695, %v1760_v27  ;;  %v1864_v57 = vmul.f32 1.442695, %v1761_v31  ;;  %v1522_v32 = vpop.permute.xlu1 %1521  ;;  %v7381_v41 = vld [vmem:[#allocation37_spill] sm:$0xff] }
 0x281   : > { %v1762_v17 = vsub.f32 %v7378_v26, %v1518_v42  ;;  %4368 = vpow2.f32 %v1850_v60  ;;  %v1763_v47 = vsub.f32 %v7379_v46, %v1518_v42  ;;  %1620 = vbcast.lane.b32.xlu1 %v1614_v39, 264  ;;  %1616 = vbcast.lane.b32.xlu0 %v1614_v39, 256  ;;  %v1764_v40 = vsub.f32 %v7380_v13, %v1522_v32  ;;  %v7383_v42 = vld [vmem:[#allocation18_spill] sm:$0xff] }
 0x282   : > { %4370 = vpow2.f32 %v1852_v6  ;;  %v1765_v5 = vsub.f32 %v7381_v41, %v1522_v32 }
 0x283   : > { %v1866_v9 = vmul.f32 1.442695, %v1762_v17  ;;  %4372 = vpow2.f32 %v1862_v0  ;;  %v1868_v36 = vmul.f32 1.442695, %v1763_v47  ;;  %v1870_v43 = vmul.f32 1.442695, %v1764_v40  ;;  %v4361_v60 = vpop.eup %4360 }
 0x284   : > { %v1628_v30 = vpop.permute.xlu0 %1627  ;;  %4374 = vpow2.f32 %v1864_v57  ;;  %v1872_v27 = vmul.f32 1.442695, %v1765_v5  ;;  %v1632_v39 = vpop.permute.xlu1 %1631  ;;  %v7384_v17 = vld [vmem:[#allocation20_spill] sm:$0xff]  ;;  %v7385_v47 = vld [vmem:[#allocation22_spill] sm:$0xff]  ;;  %v1735_v40 = vrot.slane %v6510_v23, %v7352_v55 }
 0x285   : > { %v1802_v31 = vsub.f32 %v7382_v11, %v1628_v30  ;;  %4376 = vpow2.f32 %v1866_v9  ;;  %v1803_v6 = vsub.f32 %v7383_v42, %v1628_v30  ;;  %1730 = vbcast.lane.b32.xlu1 %v1724_v38, 264  ;;  %1726 = vbcast.lane.b32.xlu0 %v1724_v38, 256  ;;  %v4363_v26 = vpop.eup %4362  ;;  %v1804_v46 = vsub.f32 %v7384_v17, %v1632_v39  ;;  %v7386_v30 = vld [vmem:[#allocation24_spill] sm:$0xff] }
 0x286   : > { %4378 = vpow2.f32 %v1868_v36  ;;  %v1805_v32 = vsub.f32 %v7385_v47, %v1632_v39  ;;  %v6545_v41 = vadd.f32 %v4363_v26, %v4361_v60  ;;  %v7387_v36 = vld [vmem:[#allocation26_spill] sm:$0xff]  ;;  %v7388_v39 = vld [vmem:[#allocation28_spill] sm:$0xff] }
 0x287   : > { %v1946_v0 = vmul.f32 1.442695, %v1802_v31  ;;  %4380 = vpow2.f32 %v1870_v43  ;;  %v1948_v57 = vmul.f32 1.442695, %v1803_v6  ;;  %v1950_v9 = vmul.f32 1.442695, %v1804_v46  ;;  %v4365_v11 = vpop.eup %4364 }
 0x288   : > { %v1639_v13 = vpop.permute.xlu0 %1638  ;;  %4382 = vpow2.f32 %v1872_v27  ;;  %v1952_v5 = vmul.f32 1.442695, %v1805_v32  ;;  %v1643_v42 = vpop.permute.xlu1 %1642  ;;  %v7389_v47 = vld [vmem:[#allocation30_spill] sm:$0xff]  ;;  %v1746_v32 = vrot.slane %v6510_v23, %v7353_v49 }
 0x289   : > { %v1806_v38 = vsub.f32 %v7386_v30, %v1639_v13  ;;  %4384 = vpow2.f32 %v1946_v0  ;;  %v1807_v31 = vsub.f32 %v7387_v36, %v1639_v13  ;;  %1741 = vbcast.lane.b32.xlu1 %v1735_v40, 264  ;;  %1737 = vbcast.lane.b32.xlu0 %v1735_v40, 256  ;;  %v4367_v43 = vpop.eup %4366  ;;  %v1808_v17 = vsub.f32 %v7388_v39, %v1643_v42  ;;  %v7390_v36 = vld [vmem:[#allocation32_spill] sm:$0xff]  ;;  %v7391_v39 = vld [vmem:[#allocation34_spill] sm:$0xff] }
 0x28a   : > { %4386 = vpow2.f32 %v1948_v57  ;;  %v1809_v60 = vsub.f32 %v7389_v47, %v1643_v42  ;;  %v6553_v0 = vadd.f32 %v4367_v43, %v4365_v11  ;;  %v7392_v11 = vld [vmem:[#allocation36_spill] sm:$0xff]  ;;  %v7393_v49 = vld [vmem:[#allocation38_spill] sm:$0xff] }
 0x28b   : > { %v1954_v6 = vmul.f32 1.442695, %v1806_v38  ;;  %v4369_v26 = vpop.eup %4368  ;;  %4388 = vpow2.f32 %v1950_v9  ;;  %v1956_v27 = vmul.f32 1.442695, %v1807_v31  ;;  %v1958_v40 = vmul.f32 1.442695, %v1808_v17 }
 0x28c   : > { %v1650_v46 = vpop.permute.xlu0 %1649  ;;  %v4371_v13 = vpop.eup %4370  ;;  %4390 = vpow2.f32 %v1952_v5  ;;  %v1960_v30 = vmul.f32 1.442695, %v1809_v60 }
 0x28d   : > { %v1810_v57 = vsub.f32 %v7390_v36, %v1650_v46  ;;  %v4373_v38 = vpop.eup %4372  ;;  %4392 = vpow2.f32 %v1954_v6  ;;  %v1811_v55 = vsub.f32 %v7391_v39, %v1650_v46  ;;  %1752 = vbcast.lane.b32.xlu1 %v1746_v32, 264  ;;  %1748 = vbcast.lane.b32.xlu0 %v1746_v32, 256  ;;  %v1654_v9 = vpop.permute.xlu1 %1653  ;;  %v6557_v31 = vadd.f32 %v4371_v13, %v4369_v26 }
 0x28e   : > { %v4375_v42 = vpop.eup %4374  ;;  %4394 = vpow2.f32 %v1956_v27  ;;  %v1812_v43 = vsub.f32 %v7392_v11, %v1654_v9  ;;  %v1813_v5 = vsub.f32 %v7393_v49, %v1654_v9  ;;  %v7394_v11 = vld [vmem:[#allocation43_spill] sm:$0xff] }
 0x28f   : > { %v1962_v47 = vmul.f32 1.442695, %v1810_v57  ;;  %v4377_v17 = vpop.eup %4376  ;;  %4396 = vpow2.f32 %v1958_v40  ;;  %v1964_v60 = vmul.f32 1.442695, %v1811_v55  ;;  %v6561_v36 = vadd.f32 %v4375_v42, %v4373_v38 }
 0x290   : > { %v4379_v6 = vpop.eup %4378  ;;  %4398 = vpow2.f32 %v1960_v30  ;;  %v1966_v46 = vmul.f32 1.442695, %v1812_v43  ;;  %v1968_v39 = vmul.f32 1.442695, %v1813_v5 }
 0x291   : > { %v4381_v32 = vpop.eup %4380  ;;  %4400 = vpow2.f32 %v1962_v47  ;;  %v6563_v26 = vadd.f32 %v4379_v6, %v4377_v17  ;;  %v7395_v47 = vld [vmem:[#allocation45_spill] sm:$0xff]  ;;  %v7396_v17 = vld [vmem:[#allocation39_spill] sm:$0xff] }
 0x292   : > { %v4383_v13 = vpop.eup %4382  ;;  %4402 = vpow2.f32 %v1964_v60  ;;  %v7397_v60 = vld [vmem:[#allocation41_spill] sm:$0xff] }
 0x293   : > { %v4385_v27 = vpop.eup %4384  ;;  %4404 = vpow2.f32 %v1966_v46  ;;  %v6565_v57 = vadd.f32 %v4383_v13, %v4381_v32 }
 0x294   : > { %v4387_v49 = vpop.eup %4386  ;;  %4406 = vpow2.f32 %v1968_v39  ;;  %v1533_v9 = vpop.permute.xlu1 %1532 }
 0x295   : > { %v4389_v40 = vpop.eup %4388  ;;  %v6567_v55 = vadd.f32 %v4387_v49, %v4385_v27  ;;  %v1529_v30 = vpop.permute.xlu0 %1528  ;;  %v1768_v43 = vsub.f32 %v7394_v11, %v1533_v9  ;;  %v1769_v5 = vsub.f32 %v7395_v47, %v1533_v9  ;;  %v7398_v9 = vld [vmem:[#allocation51_spill] sm:$0xff] }
 0x296   : > { %v4391_v38 = vpop.eup %4390  ;;  %v1766_v6 = vsub.f32 %v7396_v17, %v1529_v30  ;;  %v1767_v48 = vsub.f32 %v7397_v60, %v1529_v30  ;;  %v7399_v17 = vld [vmem:[#allocation53_spill] sm:$0xff]  ;;  %v7400_v30 = vld [vmem:[#allocation47_spill] sm:$0xff] }
 0x297   : > { %v4393_v42 = vpop.eup %4392  ;;  %v6573_v32 = vadd.f32 %v4391_v38, %v4389_v40  ;;  %v1878_v39 = vmul.f32 1.442695, %v1768_v43  ;;  %v1880_v23 = vmul.f32 1.442695, %v1769_v5  ;;  %v7401_v38 = vld [vmem:[#allocation49_spill] sm:$0xff] }
 0x298   : > { %v4395_v46 = vpop.eup %4394  ;;  %v1874_v27 = vmul.f32 1.442695, %v1766_v6  ;;  %v1876_v51 = vmul.f32 1.442695, %v1767_v48  ;;  %v1544_v35 = vpop.permute.xlu1 %1543 }
 0x299   : > { %v4397_v13 = vpop.eup %4396  ;;  %v6575_v49 = vadd.f32 %v4395_v46, %v4393_v42  ;;  %v1540_v56 = vpop.permute.xlu0 %1539  ;;  %4408 = vpow2.f32 %v1878_v39  ;;  %v1772_v47 = vsub.f32 %v7398_v9, %v1544_v35  ;;  %v1773_v24 = vsub.f32 %v7399_v17, %v1544_v35  ;;  %v7402_v35 = vld [vmem:[#allocation59_spill] sm:$0xff] }
 0x29a   : > { %v4399_v18 = vpop.eup %4398  ;;  %v1770_v60 = vsub.f32 %v7400_v30, %v1540_v56  ;;  %4410 = vpow2.f32 %v1880_v23  ;;  %v1771_v43 = vsub.f32 %v7401_v38, %v1540_v56  ;;  %v7403_v23 = vld [vmem:[#allocation61_spill] sm:$0xff]  ;;  %v7404_v56 = vld [vmem:[#allocation55_spill] sm:$0xff] }
 0x29b   : > { %v4401_v11 = vpop.eup %4400  ;;  %v6581_v5 = vadd.f32 %v4399_v18, %v4397_v13  ;;  %4412 = vpow2.f32 %v1874_v27  ;;  %v1886_v6 = vmul.f32 1.442695, %v1772_v47  ;;  %v1888_v48 = vmul.f32 1.442695, %v1773_v24  ;;  %v7405_v13 = vld [vmem:[#allocation57_spill] sm:$0xff] }
 0x29c   : > { %v4403_v40 = vpop.eup %4402  ;;  %v1882_v46 = vmul.f32 1.442695, %v1770_v60  ;;  %4414 = vpow2.f32 %v1876_v51  ;;  %v1884_v39 = vmul.f32 1.442695, %v1771_v43  ;;  %v1555_v2 = vpop.permute.xlu1 %1554  ;;  %v7406_v43 = vld [vmem:[#allocation44_spill] sm:$0xff] }
 0x29d   : > { %v4405_v42 = vpop.eup %4404  ;;  %v1551_v9 = vpop.permute.xlu0 %1550  ;;  %v6583_v34 = vadd.f32 %v4403_v40, %v4401_v11  ;;  %4416 = vpow2.f32 %v1886_v6  ;;  %v1776_v17 = vsub.f32 %v7402_v35, %v1555_v2  ;;  %v1777_v30 = vsub.f32 %v7403_v23, %v1555_v2  ;;  %v7407_v35 = vld [vmem:[#allocation46_spill] sm:$0xff]  ;;  %v7408_v23 = vld [vmem:[#allocation40_spill] sm:$0xff] }
 0x29e   : > { %v4407_v37 = vpop.eup %4406  ;;  %v1774_v18 = vsub.f32 %v7404_v56, %v1551_v9  ;;  %4418 = vpow2.f32 %v1888_v48  ;;  %v1775_v27 = vsub.f32 %v7405_v13, %v1551_v9  ;;  %v7409_v48 = vld [vmem:[#allocation42_spill] sm:$0xff] }
 0x29f   : > { %v6589_v47 = vadd.f32 %v4407_v37, %v4405_v42  ;;  %4420 = vpow2.f32 %v1882_v46  ;;  %v1894_v24 = vmul.f32 1.442695, %v1776_v17  ;;  %v1896_v51 = vmul.f32 1.442695, %v1777_v30 }
 0x2a0   : > { %v1890_v60 = vmul.f32 1.442695, %v1774_v18  ;;  %4422 = vpow2.f32 %v1884_v39  ;;  %v1892_v38 = vmul.f32 1.442695, %v1775_v27  ;;  %v1665_v11 = vpop.permute.xlu1 %1664 }
 0x2a1   : > { %v1661_v40 = vpop.permute.xlu0 %1660  ;;  %4424 = vpow2.f32 %v1894_v24  ;;  %v1816_v6 = vsub.f32 %v7406_v43, %v1665_v11  ;;  %v1817_v2 = vsub.f32 %v7407_v35, %v1665_v11  ;;  %v7410_v24 = vld [vmem:[#allocation52_spill] sm:$0xff]  ;;  %v7411_v11 = vld [vmem:[#allocation54_spill] sm:$0xff] }
 0x2a2   : > { %v1814_v56 = vsub.f32 %v7408_v23, %v1661_v40  ;;  %4426 = vpow2.f32 %v1896_v51  ;;  %v1815_v9 = vsub.f32 %v7409_v48, %v1661_v40  ;;  %v7412_v23 = vld [vmem:[#allocation48_spill] sm:$0xff]  ;;  %v7413_v40 = vld [vmem:[#allocation50_spill] sm:$0xff] }
 0x2a3   : > { %v4409_v37 = vpop.eup %4408  ;;  %4428 = vpow2.f32 %v1890_v60  ;;  %v1974_v42 = vmul.f32 1.442695, %v1816_v6  ;;  %v1976_v46 = vmul.f32 1.442695, %v1817_v2 }
 0x2a4   : > { %v1970_v17 = vmul.f32 1.442695, %v1814_v56  ;;  %v4411_v30 = vpop.eup %4410  ;;  %4430 = vpow2.f32 %v1892_v38  ;;  %v1972_v39 = vmul.f32 1.442695, %v1815_v9  ;;  %v1676_v18 = vpop.permute.xlu1 %1675 }
 0x2a5   : > { %v1672_v13 = vpop.permute.xlu0 %1671  ;;  %v4413_v27 = vpop.eup %4412  ;;  %4432 = vpow2.f32 %v1974_v42  ;;  %v1820_v43 = vsub.f32 %v7410_v24, %v1676_v18  ;;  %v1821_v35 = vsub.f32 %v7411_v11, %v1676_v18  ;;  %v6599_v6 = vadd.f32 %v4411_v30, %v4409_v37  ;;  %v7414_v11 = vld [vmem:[#allocation60_spill] sm:$0xff] }
 0x2a6   : > { %v1818_v51 = vsub.f32 %v7412_v23, %v1672_v13  ;;  %v4415_v62 = vpop.eup %4414  ;;  %4434 = vpow2.f32 %v1976_v46  ;;  %v1819_v60 = vsub.f32 %v7413_v40, %v1672_v13  ;;  %v7415_v23 = vld [vmem:[#allocation62_spill] sm:$0xff] }
 0x2a7   : > { %v4417_v2 = vpop.eup %4416  ;;  %4436 = vpow2.f32 %v1970_v17  ;;  %v1982_v38 = vmul.f32 1.442695, %v1820_v43  ;;  %v1984_v56 = vmul.f32 1.442695, %v1821_v35  ;;  %v6601_v7 = vadd.f32 %v4415_v62, %v4413_v27 }
 0x2a8   : > { %v1978_v48 = vmul.f32 1.442695, %v1818_v51  ;;  %v4419_v9 = vpop.eup %4418  ;;  %4438 = vpow2.f32 %v1972_v39  ;;  %v1980_v42 = vmul.f32 1.442695, %v1819_v60  ;;  %v1687_v8 = vpop.permute.xlu1 %1686 }
 0x2a9   : > { %v1683_v24 = vpop.permute.xlu0 %1682  ;;  %v4421_v18 = vpop.eup %4420  ;;  %4440 = vpow2.f32 %v1982_v38  ;;  %v1824_v46 = vsub.f32 %v7414_v11, %v1687_v8  ;;  %v1825_v13 = vsub.f32 %v7415_v23, %v1687_v8  ;;  %v2109_v39 = vadd.f32 %v4419_v9, %v4417_v2 }
 0x2aa   : > { %v1822_v37 = vsub.f32 %v7300_v15, %v1683_v24  ;;  %v4423_v30 = vpop.eup %4422  ;;  %4442 = vpow2.f32 %v1984_v56  ;;  %v1823_v17 = vsub.f32 %v7301_v59, %v1683_v24 }
 0x2ab   : > { %v4425_v43 = vpop.eup %4424  ;;  %4444 = vpow2.f32 %v1978_v48  ;;  %v1990_v35 = vmul.f32 1.442695, %v1824_v46  ;;  %v1992_v62 = vmul.f32 1.442695, %v1825_v13  ;;  %v2106_v60 = vadd.f32 %v4423_v30, %v4421_v18 }
 0x2ac   : > { %2083 = vadd.xlane.f32.xlu0 %v6557_v31  ;;  %v1986_v27 = vmul.f32 1.442695, %v1822_v37  ;;  %v4427_v51 = vpop.eup %4426  ;;  %4446 = vpow2.f32 %v1980_v42  ;;  %v1988_v40 = vmul.f32 1.442695, %v1823_v17 }
 0x2ad   : > { %v4429_v38 = vpop.eup %4428  ;;  %4448 = vpow2.f32 %v1990_v35  ;;  %v2115_v8 = vadd.f32 %v4427_v51, %v4425_v43 }
 0x2ae   : > { %v4431_v15 = vpop.eup %4430  ;;  %4450 = vpow2.f32 %v1992_v62 }
 0x2af   : > { %v4433_v59 = vpop.eup %4432  ;;  %4452 = vpow2.f32 %v1986_v27  ;;  %v6610_v31 = vadd.f32 %v4431_v15, %v4429_v38 }
 0x2b0   : > { %2089 = vadd.xlane.f32.xlu0 %v6553_v0  ;;  %v4435_v2 = vpop.eup %4434  ;;  %4454 = vpow2.f32 %v1988_v40 }
 0x2b1   : > { %2086 = vadd.xlane.f32.xlu1 %v6545_v41  ;;  %v4437_v56 = vpop.eup %4436  ;;  %v6612_v48 = vadd.f32 %v4435_v2, %v4433_v59 }
 0x2b2   : > { %v4439_v9 = vpop.eup %4438 }
 0x2b3   : > { %v4441_v42 = vpop.eup %4440  ;;  %v6616_v24 = vadd.f32 %v4439_v9, %v4437_v56 }
 0x2b4   : > { %2092 = vadd.xlane.f32.xlu0 %v6561_v36  ;;  %v4443_v0 = vpop.eup %4442 }
 0x2b5   : > { %2098 = vadd.xlane.f32.xlu1 %v6565_v57  ;;  %v4445_v18 = vpop.eup %4444  ;;  %v6618_v11 = vadd.f32 %v4443_v0, %v4441_v42 }
 0x2b6   : > { %v4447_v41 = vpop.eup %4446 }
 0x2b7   : > { %v4449_v46 = vpop.eup %4448  ;;  %v6622_v23 = vadd.f32 %v4447_v41, %v4445_v18 }
 0x2b8   : > { %2095 = vadd.xlane.f32.xlu0 %v6563_v26  ;;  %v4451_v13 = vpop.eup %4450 }
 0x2b9   : > { %2158 = vadd.xlane.f32.xlu1 %v6573_v32  ;;  %v4453_v37 = vpop.eup %4452  ;;  %v6624_v36 = vadd.f32 %v4451_v13, %v4449_v46 }
 0x2ba   : > { %v4455_v30 = vpop.eup %4454 }
 0x2bb   : > { %v6628_v57 = vadd.f32 %v4455_v30, %v4453_v37 }
 0x2bc   : > { %2155 = vadd.xlane.f32.xlu0 %v6567_v55 }
 0x2bd   : > { %2164 = vadd.xlane.f32.xlu1 %v6581_v5 }
 0x2c0   : > { %2161 = vadd.xlane.f32.xlu0 %v6575_v49 }
 0x2c1   : > { %2170 = vadd.xlane.f32.xlu1 %v6589_v47 }
 0x2c4   : > { %2167 = vadd.xlane.f32.xlu0 %v6583_v34 }
 0x2c5   : > { %2104 = vadd.xlane.f32.xlu1 %v6599_v6 }
 0x2c7   : > { %v1566_v26 = vpop.permute.xlu1 %1565  ;;  %v1562_v32 = vpop.permute.xlu0 %1561 }
 0x2c8   : > { %v1780_v17 = vsub.f32 %v5608_v19, %v1566_v26  ;;  %v1781_v43 = vsub.f32 %v5619_v1, %v1566_v26  ;;  %v1778_v55 = vsub.f32 %v7309_v44, %v1562_v32  ;;  %v1779_v5 = vsub.f32 %v7310_v10, %v1562_v32  ;;  %2101 = vadd.xlane.f32.xlu0 %v6601_v7 }
 0x2c9   : > { %2110 = vadd.xlane.f32.xlu1 %v2109_v39 }
 0x2ca   : > { %v1902_v35 = vmul.f32 1.442695, %v1780_v17  ;;  %v1904_v49 = vmul.f32 1.442695, %v1781_v43  ;;  %v1898_v62 = vmul.f32 1.442695, %v1778_v55 }
 0x2cb   : > { %v1900_v47 = vmul.f32 1.442695, %v1779_v5  ;;  %v1577_v34 = vpop.permute.xlu1 %1576  ;;  %v1573_v27 = vpop.permute.xlu0 %1572 }
 0x2cc   : > { %4456 = vpow2.f32 %v1902_v35  ;;  %v1784_v6 = vsub.f32 %v5709_v33, %v1577_v34  ;;  %v1785_v19 = vsub.f32 %v5723_v12, %v1577_v34  ;;  %v1782_v1 = vsub.f32 %v5688_v21, %v1573_v27  ;;  %2107 = vadd.xlane.f32.xlu0 %v2106_v60 }
 0x2cd   : > { %4458 = vpow2.f32 %v1904_v49  ;;  %v1783_v44 = vsub.f32 %v5696_v16, %v1573_v27  ;;  %2116 = vadd.xlane.f32.xlu1 %v2115_v8 }
 0x2ce   : > { %4460 = vpow2.f32 %v1898_v62  ;;  %v1910_v7 = vmul.f32 1.442695, %v1784_v6  ;;  %v1912_v10 = vmul.f32 1.442695, %v1785_v19  ;;  %v1906_v51 = vmul.f32 1.442695, %v1782_v1 }
 0x2cf   : > { %4462 = vpow2.f32 %v1900_v47  ;;  %v1908_v39 = vmul.f32 1.442695, %v1783_v44  ;;  %v1588_v40 = vpop.permute.xlu1 %1587  ;;  %v1584_v38 = vpop.permute.xlu0 %1583 }
 0x2d0   : > { %4464 = vpow2.f32 %v1910_v7  ;;  %v1788_v33 = vsub.f32 %v5819_v25, %v1588_v40  ;;  %v1789_v12 = vsub.f32 %v5833_v61, %v1588_v40  ;;  %v1786_v21 = vsub.f32 %v5796_v50, %v1584_v38  ;;  %2113 = vadd.xlane.f32.xlu0 %v6610_v31 }
 0x2d1   : > { %4466 = vpow2.f32 %v1912_v10  ;;  %v1787_v16 = vsub.f32 %v7322_v63, %v1584_v38  ;;  %2176 = vadd.xlane.f32.xlu1 %v6612_v48 }
 0x2d2   : > { %4468 = vpow2.f32 %v1906_v51  ;;  %v1918_v60 = vmul.f32 1.442695, %v1788_v33  ;;  %v1920_v15 = vmul.f32 1.442695, %v1789_v12  ;;  %v1914_v8 = vmul.f32 1.442695, %v1786_v21 }
 0x2d3   : > { %4470 = vpow2.f32 %v1908_v39  ;;  %v1916_v59 = vmul.f32 1.442695, %v1787_v16  ;;  %v1698_v2 = vpop.permute.xlu1 %1697  ;;  %v1694_v56 = vpop.permute.xlu0 %1693 }
 0x2d4   : > { %4472 = vpow2.f32 %v1918_v60  ;;  %v1828_v25 = vsub.f32 %v5612_v20, %v1698_v2  ;;  %v1829_v50 = vsub.f32 %v5621_v28, %v1698_v2  ;;  %v1826_v61 = vsub.f32 %v7312_v29, %v1694_v56  ;;  %2173 = vadd.xlane.f32.xlu0 %v6616_v24 }
 0x2d5   : > { %4474 = vpow2.f32 %v1920_v15  ;;  %v1827_v63 = vsub.f32 %v7313_v3, %v1694_v56  ;;  %2182 = vadd.xlane.f32.xlu1 %v6618_v11 }
 0x2d6   : > { %v4457_v31 = vpop.eup %4456  ;;  %4476 = vpow2.f32 %v1914_v8  ;;  %v1998_v9 = vmul.f32 1.442695, %v1828_v25  ;;  %v2000_v48 = vmul.f32 1.442695, %v1829_v50  ;;  %v1994_v42 = vmul.f32 1.442695, %v1826_v61 }
 0x2d7   : > { %v4459_v0 = vpop.eup %4458  ;;  %4478 = vpow2.f32 %v1916_v59  ;;  %v1996_v18 = vmul.f32 1.442695, %v1827_v63  ;;  %v1709_v20 = vpop.permute.xlu1 %1708  ;;  %v7416_v50 = vld [vmem:[#allocation82_spill] sm:$0xff]  ;;  %v7417_v63 = vld [vmem:[#allocation84_spill] sm:$0xff] }
 0x2d8   : > { %v1705_v41 = vpop.permute.xlu0 %1704  ;;  %v4461_v28 = vpop.eup %4460  ;;  %4480 = vpow2.f32 %v1998_v9  ;;  %v1832_v29 = vsub.f32 %v5713_v53, %v1709_v20  ;;  %v1833_v3 = vsub.f32 %v5728_v52, %v1709_v20  ;;  %2179 = vadd.xlane.f32.xlu0 %v6622_v23  ;;  %v2121_v11 = vadd.f32 %v4459_v0, %v4457_v31  ;;  %v7418_v9 = vld [vmem:[#allocation78_spill] sm:$0xff] }
 0x2d9   : > { %v1830_v24 = vsub.f32 %v5690_v54, %v1705_v41  ;;  %v4463_v46 = vpop.eup %4462  ;;  %4482 = vpow2.f32 %v2000_v48  ;;  %v1831_v13 = vsub.f32 %v7318_v58, %v1705_v41  ;;  %2188 = vadd.xlane.f32.xlu1 %v6624_v36 }
 0x2da   : > { %v4465_v37 = vpop.eup %4464  ;;  %4484 = vpow2.f32 %v1994_v42  ;;  %v2006_v30 = vmul.f32 1.442695, %v1832_v29  ;;  %v2008_v26 = vmul.f32 1.442695, %v1833_v3  ;;  %v2118_v54 = vadd.f32 %v4463_v46, %v4461_v28  ;;  %v7419_v42 = vld [vmem:[#allocation80_spill] sm:$0xff] }
 0x2db   : > { %v2002_v32 = vmul.f32 1.442695, %v1830_v24  ;;  %v4467_v17 = vpop.eup %4466  ;;  %4486 = vpow2.f32 %v1996_v18  ;;  %v2004_v53 = vmul.f32 1.442695, %v1831_v13  ;;  %v1720_v52 = vpop.permute.xlu1 %1719  ;;  %v7420_v46 = vld [vmem:[#allocation92_spill] sm:$0xff] }
 0x2dc   : > { %v1716_v43 = vpop.permute.xlu0 %1715  ;;  %v4469_v55 = vpop.eup %4468  ;;  %4488 = vpow2.f32 %v2006_v30  ;;  %v1836_v58 = vsub.f32 %v5823_v4, %v1720_v52  ;;  %v1837_v23 = vsub.f32 %v5838_v22, %v1720_v52  ;;  %2185 = vadd.xlane.f32.xlu0 %v6628_v57  ;;  %v2127_v36 = vadd.f32 %v4467_v17, %v4465_v37  ;;  %v7422_v30 = vld [vmem:[#allocation88_spill] sm:$0xff] }
 0x2dd   : > { %v1834_v5 = vsub.f32 %v7325_v45, %v1716_v43  ;;  %v4471_v35 = vpop.eup %4470  ;;  %4490 = vpow2.f32 %v2008_v26  ;;  %v1835_v49 = vsub.f32 %v7326_v14, %v1716_v43  ;;  %2122 = vadd.xlane.f32.xlu1 %v2121_v11  ;;  %v7421_v11 = vld [vmem:[#allocation94_spill] sm:$0xff] }
 0x2de   : > { %v4473_v62 = vpop.eup %4472  ;;  %4492 = vpow2.f32 %v2002_v32  ;;  %v2014_v47 = vmul.f32 1.442695, %v1836_v58  ;;  %v2016_v34 = vmul.f32 1.442695, %v1837_v23  ;;  %v2124_v19 = vadd.f32 %v4471_v35, %v4469_v55  ;;  %v7423_v32 = vld [vmem:[#allocation90_spill] sm:$0xff]  ;;  %v7424_v23 = vld [vmem:[#allocation103_spill] sm:$0xff] }
 0x2df   : > { %v2010_v27 = vmul.f32 1.442695, %v1834_v5  ;;  %v4475_v6 = vpop.eup %4474  ;;  %4494 = vpow2.f32 %v2004_v53  ;;  %v2012_v4 = vmul.f32 1.442695, %v1835_v49  ;;  %v7425_v35 = vld [vmem:[#allocation104_spill] sm:$0xff] }
 0x2e0   : > { %v4477_v22 = vpop.eup %4476  ;;  %4496 = vpow2.f32 %v2014_v47  ;;  %v2133_v45 = vadd.f32 %v4475_v6, %v4473_v62  ;;  %2119 = vadd.xlane.f32.xlu0 %v2118_v54  ;;  %v7427_v47 = vld [vmem:[#allocation100_spill] sm:$0xff] }
 0x2e1   : > { %v4479_v1 = vpop.eup %4478  ;;  %4498 = vpow2.f32 %v2016_v34  ;;  %2128 = vadd.xlane.f32.xlu1 %v2127_v36  ;;  %v7426_v36 = vld [vmem:[#allocation99_spill] sm:$0xff] }
 0x2e2   : > { %v4481_v14 = vpop.eup %4480  ;;  %4500 = vpow2.f32 %v2010_v27  ;;  %v2130_v57 = vadd.f32 %v4479_v1, %v4477_v22  ;;  %v7428_v1 = vld [vmem:[#allocation83_spill] sm:$0xff] }
 0x2e3   : > { %v4483_v44 = vpop.eup %4482  ;;  %4502 = vpow2.f32 %v2012_v4 }
 0x2e4   : > { %v4485_v7 = vpop.eup %4484  ;;  %v2193_v10 = vadd.f32 %v4483_v44, %v4481_v14  ;;  %2125 = vadd.xlane.f32.xlu0 %v2124_v19 }
 0x2e5   : > { %v4487_v51 = vpop.eup %4486  ;;  %2134 = vadd.xlane.f32.xlu1 %v2133_v45 }
 0x2e6   : > { %v4489_v39 = vpop.eup %4488  ;;  %v2190_v40 = vadd.f32 %v4487_v51, %v4485_v7  ;;  %v7430_v7 = vld [vmem:[#allocation79_spill] sm:$0xff]  ;;  %v7431_v51 = vld [vmem:[#allocation81_spill] sm:$0xff] }
 0x2e7   : > { %v4491_v38 = vpop.eup %4490 }
 0x2e8   : > { %v4493_v33 = vpop.eup %4492  ;;  %v2199_v12 = vadd.f32 %v4491_v38, %v4489_v39  ;;  %2131 = vadd.xlane.f32.xlu0 %v2130_v57  ;;  %v7429_v57 = vld [vmem:[#allocation85_spill] sm:$0xff] }
 0x2e9   : > { %v4495_v21 = vpop.eup %4494  ;;  %2194 = vadd.xlane.f32.xlu1 %v2193_v10 }
 0x2ea   : > { %v4497_v16 = vpop.eup %4496  ;;  %v2196_v60 = vadd.f32 %v4495_v21, %v4493_v33 }
 0x2eb   : > { %v4499_v15 = vpop.eup %4498  ;;  %v1599_v59 = vpop.permute.xlu1 %1598 }
 0x2ec   : > { %v4501_v8 = vpop.eup %4500  ;;  %v1595_v2 = vpop.permute.xlu0 %1594  ;;  %v2205_v56 = vadd.f32 %v4499_v15, %v4497_v16  ;;  %v1792_v61 = vsub.f32 %v7416_v50, %v1599_v59  ;;  %v1793_v31 = vsub.f32 %v7417_v63, %v1599_v59  ;;  %2191 = vadd.xlane.f32.xlu0 %v2190_v40  ;;  %v7432_v59 = vld [vmem:[#allocation93_spill] sm:$0xff] }
 0x2ed   : > { %v4503_v25 = vpop.eup %4502  ;;  %v1790_v48 = vsub.f32 %v7418_v9, %v1595_v2  ;;  %v1791_v0 = vsub.f32 %v7419_v42, %v1595_v2  ;;  %2200 = vadd.xlane.f32.xlu1 %v2199_v12  ;;  %v7434_v50 = vld [vmem:[#allocation89_spill] sm:$0xff] }
 0x2ee   : > { %v2202_v18 = vadd.f32 %v4503_v25, %v4501_v8  ;;  %v1926_v20 = vmul.f32 1.442695, %v1792_v61  ;;  %v1928_v41 = vmul.f32 1.442695, %v1793_v31  ;;  %v7435_v31 = vld [vmem:[#allocation91_spill] sm:$0xff] }
 0x2ef   : > { %v1922_v28 = vmul.f32 1.442695, %v1790_v48  ;;  %v1924_v29 = vmul.f32 1.442695, %v1791_v0  ;;  %v1610_v3 = vpop.permute.xlu1 %1609 }
 0x2f0   : > { %v1606_v24 = vpop.permute.xlu0 %1605  ;;  %4504 = vpow2.f32 %v1926_v20  ;;  %v1796_v13 = vsub.f32 %v7420_v46, %v1610_v3  ;;  %v1797_v37 = vsub.f32 %v7421_v11, %v1610_v3  ;;  %2197 = vadd.xlane.f32.xlu0 %v2196_v60 }
 0x2f1   : > { %v1794_v26 = vsub.f32 %v7422_v30, %v1606_v24  ;;  %4506 = vpow2.f32 %v1928_v41  ;;  %v1795_v17 = vsub.f32 %v7423_v32, %v1606_v24  ;;  %2206 = vadd.xlane.f32.xlu1 %v2205_v56  ;;  %v7433_v56 = vld [vmem:[#allocation95_spill] sm:$0xff] }
 0x2f2   : > { %4508 = vpow2.f32 %v1922_v28  ;;  %v1934_v53 = vmul.f32 1.442695, %v1796_v13  ;;  %v1936_v52 = vmul.f32 1.442695, %v1797_v37  ;;  %v7436_v13 = vld [vmem:[#allocation102_spill] sm:$0xff]  ;;  %v7437_v37 = vld [vmem:[#allocation105_spill] sm:$0xff] }
 0x2f3   : > { %v1930_v43 = vmul.f32 1.442695, %v1794_v26  ;;  %4510 = vpow2.f32 %v1924_v29  ;;  %v1932_v54 = vmul.f32 1.442695, %v1795_v17  ;;  %v1621_v55 = vpop.permute.xlu1 %1620  ;;  %v7438_v26 = vld [vmem:[#allocation98_spill] sm:$0xff] }
 0x2f4   : > { %v1617_v58 = vpop.permute.xlu0 %1616  ;;  %4512 = vpow2.f32 %v1934_v53  ;;  %v1800_v5 = vsub.f32 %v7424_v23, %v1621_v55  ;;  %v1801_v49 = vsub.f32 %v7425_v35, %v1621_v55  ;;  %2203 = vadd.xlane.f32.xlu0 %v2202_v18  ;;  %v7439_v53 = vld [vmem:[#allocation101_spill] sm:$0xff] }
 0x2f5   : > { %v1798_v62 = vsub.f32 %v7426_v36, %v1617_v58  ;;  %4514 = vpow2.f32 %v1936_v52  ;;  %v1799_v34 = vsub.f32 %v7427_v47, %v1617_v58 }
 0x2f6   : > { %4516 = vpow2.f32 %v1930_v43  ;;  %v1942_v27 = vmul.f32 1.442695, %v1800_v5  ;;  %v1944_v6 = vmul.f32 1.442695, %v1801_v49 }
 0x2f7   : > { %v1938_v4 = vmul.f32 1.442695, %v1798_v62  ;;  %4518 = vpow2.f32 %v1932_v54  ;;  %v1940_v19 = vmul.f32 1.442695, %v1799_v34  ;;  %v1731_v22 = vpop.permute.xlu1 %1730 }
 0x2f8   : > { %v1727_v45 = vpop.permute.xlu0 %1726  ;;  %4520 = vpow2.f32 %v1942_v27  ;;  %v1840_v14 = vsub.f32 %v7428_v1, %v1731_v22  ;;  %v1841_v44 = vsub.f32 %v7429_v57, %v1731_v22 }
 0x2f9   : > { %v1838_v10 = vsub.f32 %v7430_v7, %v1727_v45  ;;  %4522 = vpow2.f32 %v1944_v6  ;;  %v1839_v39 = vsub.f32 %v7431_v51, %v1727_v45 }
 0x2fa   : > { %v4505_v40 = vpop.eup %4504  ;;  %4524 = vpow2.f32 %v1938_v4  ;;  %v2022_v38 = vmul.f32 1.442695, %v1840_v14  ;;  %v2024_v33 = vmul.f32 1.442695, %v1841_v44 }
 0x2fb   : > { %v2018_v12 = vmul.f32 1.442695, %v1838_v10  ;;  %v4507_v21 = vpop.eup %4506  ;;  %4526 = vpow2.f32 %v1940_v19  ;;  %v2020_v16 = vmul.f32 1.442695, %v1839_v39  ;;  %v1742_v60 = vpop.permute.xlu1 %1741 }
 0x2fc   : > { %v1738_v15 = vpop.permute.xlu0 %1737  ;;  %v4509_v8 = vpop.eup %4508  ;;  %4528 = vpow2.f32 %v2022_v38  ;;  %v1844_v2 = vsub.f32 %v7432_v59, %v1742_v60  ;;  %v1845_v25 = vsub.f32 %v7433_v56, %v1742_v60  ;;  %v2139_v48 = vadd.f32 %v4507_v21, %v4505_v40  ;;  %v7440_v21 = vld [vmem:[#allocation77_spill] sm:$0xff]  ;;  %v7442_v60 = vld [vmem:[#allocation87_spill] sm:$0xff]  ;;  %v7445_v56 = vld [vmem:[#allocation96_spill] sm:$0xff] }
 0x2fd   : > { %v1842_v61 = vsub.f32 %v7434_v50, %v1738_v15  ;;  %v4511_v63 = vpop.eup %4510  ;;  %4530 = vpow2.f32 %v2024_v33  ;;  %v1843_v9 = vsub.f32 %v7435_v31, %v1738_v15  ;;  %v7443_v15 = vld [vmem:[#allocation86_spill] sm:$0xff]  ;;  %v7444_v59 = vld [vmem:[#allocation97_spill] sm:$0xff] }
 0x2fe   : > { %v4513_v42 = vpop.eup %4512  ;;  %4532 = vpow2.f32 %v2018_v12  ;;  %v2030_v0 = vmul.f32 1.442695, %v1844_v2  ;;  %v2032_v18 = vmul.f32 1.442695, %v1845_v25  ;;  %2140 = vadd.xlane.f32.xlu1 %v2139_v48  ;;  %v2136_v29 = vadd.f32 %v4511_v63, %v4509_v8  ;;  %v4648_v8 = vld [vmem:[%s4981_s17 + $0x4] sm:$0x7] }
 0x2ff   : > { %v2026_v20 = vmul.f32 1.442695, %v1842_v61  ;;  %v4515_v41 = vpop.eup %4514  ;;  %4534 = vpow2.f32 %v2020_v16  ;;  %v2028_v28 = vmul.f32 1.442695, %v1843_v9  ;;  %v1753_v3 = vpop.permute.xlu1 %1752  ;;  %v7441_v16 = vld [vmem:[#allocation75_spill] sm:$0xff]  ;;  %vm3570_vm6 = vcmp.ne.s32.totalorder %v4648_v8, 0 }
 0x300   : > { %v1749_v24 = vpop.permute.xlu0 %1748  ;;  %v4517_v46 = vpop.eup %4516  ;;  %4536 = vpow2.f32 %v2030_v0  ;;  %v1848_v11 = vsub.f32 %v7436_v13, %v1753_v3  ;;  %v1849_v30 = vsub.f32 %v7437_v37, %v1753_v3  ;;  %2137 = vadd.xlane.f32.xlu0 %v2136_v29  ;;  %v2145_v43 = vadd.f32 %v4515_v41, %v4513_v42  ;;  %v4649_v2 = vld [vmem:[%s4981_s17] sm:$0x7]  ;;  %v4650_v61 = vld [vmem:[%s4981_s17 + $0xc] sm:$0x7]  ;;  %v4651_v48 = vld [vmem:[%s4981_s17 + $0x8] sm:$0x7] }
 0x301   : > { %v1846_v32 = vsub.f32 %v7438_v26, %v1749_v24  ;;  %v4519_v17 = vpop.eup %4518  ;;  %4538 = vpow2.f32 %v2032_v18  ;;  %v1847_v52 = vsub.f32 %v7439_v53, %v1749_v24  ;;  %vm3569_vm7 = vcmp.ne.s32.totalorder %v4649_v2, 0  ;;  %v7447_v63 = vld [vmem:[#allocation56_spill] sm:$0xff]  ;;  %v7448_v42 = vld [vmem:[#allocation106_spill] sm:$0xff]  ;;  %v4652_v18 = vld [vmem:[%s4981_s17 + $0x14] sm:$0x7] }
 0x302   : > { %v4521_v54 = vpop.eup %4520  ;;  %4540 = vpow2.f32 %v2026_v20  ;;  %v2038_v55 = vmul.f32 1.442695, %v1848_v11  ;;  %v2040_v58 = vmul.f32 1.442695, %v1849_v30  ;;  %2146 = vadd.xlane.f32.xlu1 %v2145_v43  ;;  %v2142_v49 = vadd.f32 %v4519_v17, %v4517_v46  ;;  %v4653_v29 = vld [vmem:[%s4981_s17 + $0x10] sm:$0x7] }
 0x303   : > { %v2034_v23 = vmul.f32 1.442695, %v1846_v32  ;;  %v4523_v5 = vpop.eup %4522  ;;  %4542 = vpow2.f32 %v2028_v28  ;;  %v2036_v35 = vmul.f32 1.442695, %v1847_v52  ;;  %v7446_v25 = vmov 0.0   ;;  %v7449_v52 = vld [vmem:[#allocation63_spill] sm:$0xff] }
 0x304   : > { %v4525_v36 = vpop.eup %4524  ;;  %4544 = vpow2.f32 %v2038_v55  ;;  %v2151_v62 = vadd.f32 %v4523_v5, %v4521_v54  ;;  %2143 = vadd.xlane.f32.xlu0 %v2142_v49  ;;  %v6699_v50 = vsel %vm3570_vm6, 1.0, %v7446_v25  ;;  %vm3572_vm8 = vcmp.ne.s32.totalorder %v4650_v61, 0  ;;  %v4654_v11 = vld [vmem:[%s4981_s17 + $0x18] sm:$0x7]  ;;  %v4655_v26 = vld [vmem:[%s4981_s17 + $0x1c] sm:$0x7] }
 0x305   : > { %v4527_v47 = vpop.eup %4526  ;;  %4546 = vpow2.f32 %v2040_v58  ;;  %v6704_v31 = vsel %vm3569_vm7, 1.0, %v7446_v25  ;;  %v3596_v9 = vsel %vm338_vm9, %v6699_v50, 0.0  ;;  %vm3571_vm10 = vcmp.ne.s32.totalorder %v4651_v48, 0  ;;  %v7450_v43 = vld [vmem:[#allocation64_spill] sm:$0xff]  ;;  %v3681_v5 = vld [vmem:[%s326_s24] sm:$0xff] }
 0x306   : > { %v4529_v34 = vpop.eup %4528  ;;  %4548 = vpow2.f32 %v2034_v23  ;;  %v2148_v27 = vadd.f32 %v4527_v47, %v4525_v36  ;;  %2152 = vadd.xlane.f32.xlu1 %v2151_v62  ;;  %v6711_v0 = vsel %vm3572_vm8, 1.0, %v7446_v25  ;;  %vm3574_vm11 = vcmp.ne.s32.totalorder %v4652_v18, 0  ;;  %v7452_v36 = vld [vmem:[#allocation65_spill] sm:$0xff] }
 0x307   : > { %v4531_v6 = vpop.eup %4530  ;;  %4550 = vpow2.f32 %v2036_v35  ;;  %v3593_v20 = vsel %vm338_vm9, %v6704_v31, 0.0  ;;  %v6717_v41 = vsel %vm3571_vm10, 1.0, %v7446_v25  ;;  %v3602_v28 = vsel %vm338_vm9, %v6711_v0, 0.0 }
 0x308   : > { %v4533_v4 = vpop.eup %4532  ;;  %v2211_v19 = vadd.f32 %v4531_v6, %v4529_v34  ;;  %2149 = vadd.xlane.f32.xlu0 %v2148_v27  ;;  %vm3573_vm12 = vcmp.ne.s32.totalorder %v4653_v29, 0  ;;  %v6723_v3 = vsel %vm3574_vm11, 1.0, %v7446_v25  ;;  %v3599_v24 = vsel %vm338_vm9, %v6717_v41, 0.0  ;;  %v7453_v34 = vld [vmem:[#allocation66_spill] sm:$0xff]  ;;  %v7454_v27 = vld [vmem:[#allocation68_spill] sm:$0xff] }
 0x309   : > { %v4535_v22 = vpop.eup %4534  ;;  %v6728_v46 = vsel %vm3573_vm12, 1.0, %v7446_v25  ;;  %v3608_v13 = vsel %vm338_vm9, %v6723_v3, 0.0  ;;  %vm3575_vm13 = vcmp.ne.s32.totalorder %v4654_v11, 0  ;;  %vm3576_vm14 = vcmp.ne.s32.totalorder %v4655_v26, 0 }
 0x30a   : > { %v4537_v45 = vpop.eup %4536  ;;  %v2208_v1 = vadd.f32 %v4535_v22, %v4533_v4  ;;  %2212 = vadd.xlane.f32.xlu1 %v2211_v19  ;;  %v3605_v37 = vsel %vm338_vm9, %v6728_v46, 0.0  ;;  %v6737_v30 = vsel %vm3575_vm13, 1.0, %v7446_v25  ;;  %v6746_v17 = vsel %vm3576_vm14, 1.0, %v7446_v25  ;;  %v7456_v19 = vld [vmem:[#allocation58_spill] sm:$0xff]  ;;  %v7458_v25 = vld [vmem:[#allocation69_spill] sm:$0xff] }
 0x30b   : > { %v4539_v14 = vpop.eup %4538  ;;  %v3611_v32 = vsel %vm338_vm9, %v6737_v30, 0.0  ;;  %v3614_v53 = vsel %vm338_vm9, %v6746_v17, 0.0  ;;  %v7451_v54 = vsub.f32 %v7449_v52, %v7450_v43  ;;  %v7455_v6 = vsub.f32 %v7453_v34, %v7454_v27 }
 0x30c   : > { %v4541_v57 = vpop.eup %4540  ;;  %v2217_v44 = vadd.f32 %v4539_v14, %v4537_v45  ;;  %2209 = vadd.xlane.f32.xlu0 %v2208_v1 }
 0x30d   : > { %v4543_v7 = vpop.eup %4542  ;;  %v2058_v55 = vmul.f32 1.442695, %v7451_v54  ;;  %v2066_v4 = vmul.f32 1.442695, %v7455_v6 }
 0x30e   : > { %v4545_v10 = vpop.eup %4544  ;;  %v2214_v51 = vadd.f32 %v4543_v7, %v4541_v57  ;;  %2218 = vadd.xlane.f32.xlu1 %v2217_v44  ;;  %v2042_v44 = vld [vmem:[#allocation3] sm:$0x7] }
 0x30f   : > { %v4547_v39 = vpop.eup %4546  ;;  %4552 = vpow2.f32 %v2058_v55 }
 0x310   : > { %v4549_v40 = vpop.eup %4548  ;;  %v2223_v38 = vadd.f32 %v4547_v39, %v4545_v10  ;;  %2215 = vadd.xlane.f32.xlu0 %v2214_v51  ;;  %4554 = vpow2.f32 %v2066_v4 }
 0x311   : > { %v4551_v33 = vpop.eup %4550 }
 0x312   : > { %v2220_v12 = vadd.f32 %v4551_v33, %v4549_v40  ;;  %3186 = vadd.xlane.f32.xlu1 %v7440_v21 }
 0x314   : > { %2221 = vadd.xlane.f32.xlu0 %v2220_v12 }
 0x316   : > { %2224 = vadd.xlane.f32.xlu1 %v2223_v38 }
 0x318   : > { %3183 = vadd.xlane.f32.xlu0 %v7441_v16 }
 0x319   : > { %v4553_v1 = vpop.eup %4552 }
 0x31a   : > { %3192 = vadd.xlane.f32.xlu1 %v7442_v60  ;;  %v2074_v33 = vmul.f32 %v4553_v1, %v2042_v44  ;;  %v2043_v1 = vld [vmem:[#allocation3 + $0x4] sm:$0x7] }
 0x31c   : > { %3189 = vadd.xlane.f32.xlu0 %v7443_v15 }
 0x31e   : > { %3198 = vadd.xlane.f32.xlu1 %v7444_v59 }
 0x320   : > { %3195 = vadd.xlane.f32.xlu0 %v7445_v56  ;;  %v7457_v56 = vld [vmem:[#allocation67_spill] sm:$0xff] }
 0x321   : > { %v7459_v61 = vsub.f32 %v7457_v56, %v7458_v25 }
 0x322   : > { %3204 = vadd.xlane.f32.xlu1 %v7447_v63 }
 0x323   : > { %v2060_v63 = vmul.f32 1.442695, %v7459_v61 }
 0x324   : > { %3201 = vadd.xlane.f32.xlu0 %v7448_v42  ;;  %v4555_v42 = vpop.eup %4554 }
 0x325   : > { %4556 = vpow2.f32 %v2060_v63 }
 0x326   : > { %3597 = vadd.xlane.f32.xlu1 %v3596_v9 }
 0x328   : > { %3594 = vadd.xlane.f32.xlu0 %v3593_v20 }
 0x32a   : > { %3603 = vadd.xlane.f32.xlu1 %v3602_v28  ;;  %v2046_v28 = vld [vmem:[#allocation3 + $0x10] sm:$0x7] }
 0x32c   : > { %3600 = vadd.xlane.f32.xlu0 %v3599_v24 }
 0x32e   : > { %3609 = vadd.xlane.f32.xlu1 %v3608_v13 }
 0x32f   : > { %v4557_v4 = vpop.eup %4556 }
 0x330   : > { %3606 = vadd.xlane.f32.xlu0 %v3605_v37 }
 0x334   : > { %3612 = vadd.xlane.f32.xlu0 %v3611_v32 }
 0x338   : > { %3615 = vadd.xlane.f32.xlu0 %v3614_v53  ;;  %v2078_v53 = vmul.f32 %v4555_v42, %v2046_v28 }
 0x339   : > { %v2084_v58 = vpop.xlane.xlu0 %2083 }
 0x33a   : > { %v2277_v14 = vrot.slane %v2084_v58, %v7456_v19 }
 0x33d   : > { %v2090_v23 = vpop.xlane.xlu0 %2089 }
 0x33e   : > { %v2087_v35 = vpop.xlane.xlu1 %2086  ;;  %v2286_v22 = vrot.slane %v2090_v23, %v7456_v19 }
 0x33f   : > { %3684 = vperm.xlu1 %4310, %v3681_v5   ;;  %v2281_v45 = vrot.slane %v2087_v35, %v7452_v36 }
 0x341   : > { %v2093_v49 = vpop.xlane.xlu0 %2092  ;;  %v2282_v40 = vsel %vm1247_vm3, %v2281_v45, %v2277_v14 }
 0x342   : > { %v2290_v62 = vrot.slane %v2093_v49, %v7452_v36  ;;  %v2099_v47 = vpop.xlane.xlu1 %2098  ;;  %v7460_v49 = vld [vmem:[#allocation70_spill] sm:$0xff] }
 0x343   : > { %v2299_v10 = vrot.slane %v2099_v47, %v7452_v36 }
 0x344   : > { %v2291_v57 = vsel %vm1247_vm3, %v2290_v62, %v2286_v22  ;;  %v7461_v62 = vld [vmem:[#allocation72_spill] sm:$0xff] }
 0x345   : > { %v2096_v7 = vpop.xlane.xlu0 %2095  ;;  %v2490_v38 = vsel %vm1456_vm4, %v2291_v57, %v2282_v40  ;;  %v7462_v47 = vsub.f32 %v7460_v49, %v7461_v62 }
 0x346   : > { %v2295_v51 = vrot.slane %v2096_v7, %v7456_v19  ;;  %v2159_v39 = vpop.xlane.xlu1 %2158 }
 0x347   : > { %v2389_v18 = vrot.slane %v2159_v39, %v7452_v36  ;;  %v2068_v34 = vmul.f32 1.442695, %v7462_v47 }
 0x348   : > { %v2300_v12 = vsel %vm1247_vm3, %v2299_v10, %v2295_v51 }
 0x349   : > { %v2491_v21 = vsel %vm1458_vm5, %v2300_v12, %v2490_v38  ;;  %v2156_v16 = vpop.xlane.xlu0 %2155  ;;  %v2075_v38 = vmul.f32 %v4557_v4, %v2043_v1  ;;  %v3513_v12 = vld [vmem:[#allocation2] sm:$0x7] }
 0x34a   : > { %v2514_v60 = vadd.f32 %v2491_v21, %v2074_v33  ;;  %v2165_v15 = vpop.xlane.xlu1 %2164  ;;  %v2385_v9 = vrot.slane %v2156_v16, %v7456_v19 }
 0x34b   : > { %v2398_v48 = vrot.slane %v2165_v15, %v7452_v36 }
 0x34c   : > { %2523 = vst.msk [vmem:[#allocation3] sm:$0x7] %vm338_vm9, %v2514_v60  ;;  %v2390_v37 = vsel %vm1247_vm3, %v2389_v18, %v2385_v9  ;;  %v7463_v9 = vld [vmem:[#allocation107_spill] sm:$0xff] }
 0x34d   : > { %v2162_v8 = vpop.xlane.xlu0 %2161 }
 0x34e   : > { %v2394_v59 = vrot.slane %v2162_v8, %v7456_v19  ;;  %v2171_v2 = vpop.xlane.xlu1 %2170 }
 0x34f   : > { %v2407_v24 = vrot.slane %v2171_v2, %v7452_v36 }
 0x350   : > { %v2399_v20 = vsel %vm1247_vm3, %v2398_v48, %v2394_v59  ;;  %v3553_v59 = vld [vmem:[#allocation4] sm:$0x7]  ;;  %v7464_v48 = vld [vmem:[#allocation108_spill] sm:$0xff] }
 0x351   : > { %v2168_v29 = vpop.xlane.xlu0 %2167  ;;  %v2498_v32 = vsel %vm1456_vm4, %v2399_v20, %v2390_v37  ;;  %v7465_v42 = vsub.f32 %v7463_v9, %v7464_v48 }
 0x352   : > { %v2403_v13 = vrot.slane %v2168_v29, %v7456_v19  ;;  %v2105_v11 = vpop.xlane.xlu1 %2104 }
 0x353   : > { %v3521_v26 = vld [vmem:[#allocation3] sm:$0x7]  ;;  %v2308_v22 = vrot.slane %v2105_v11, %v7452_v36  ;;  %v2062_v18 = vmul.f32 1.442695, %v7465_v42 }
 0x354   : > { %v2408_v52 = vsel %vm1247_vm3, %v2407_v24, %v2403_v13  ;;  %4558 = vlog2.f32 %v3521_v26 }
 0x355   : > { %v2499_v43 = vsel %vm1458_vm5, %v2408_v52, %v2498_v32  ;;  %v2102_v54 = vpop.xlane.xlu0 %2101  ;;  %4560 = vpow2.f32 %v2068_v34 }
 0x356   : > { %v2518_v55 = vadd.f32 %v2499_v43, %v2078_v53  ;;  %v2111_v58 = vpop.xlane.xlu1 %2110  ;;  %v2304_v27 = vrot.slane %v2102_v54, %v7456_v19  ;;  %4562 = vpow2.f32 %v2062_v18 }
 0x357   : > { %v2317_v6 = vrot.slane %v2111_v58, %v7452_v36 }
 0x358   : > { %2527 = vst.msk [vmem:[#allocation3 + $0x10] sm:$0x7] %vm338_vm9, %v2518_v55  ;;  %v2309_v51 = vsel %vm1247_vm3, %v2308_v22, %v2304_v27  ;;  %v7466_v27 = vld [vmem:[#allocation109_spill] sm:$0xff] }
 0x359   : > { %v2108_v23 = vpop.xlane.xlu0 %2107 }
 0x35a   : > { %v2313_v5 = vrot.slane %v2108_v23, %v7456_v19  ;;  %v2117_v35 = vpop.xlane.xlu1 %2116 }
 0x35b   : > { %v2326_v44 = vrot.slane %v2117_v35, %v7452_v36 }
 0x35c   : > { %v2318_v45 = vsel %vm1247_vm3, %v2317_v6, %v2313_v5  ;;  %v7467_v6 = vld [vmem:[#allocation110_spill] sm:$0xff] }
 0x35d   : > { %v2114_v14 = vpop.xlane.xlu0 %2113  ;;  %v2492_v40 = vsel %vm1456_vm4, %v2318_v45, %v2309_v51  ;;  %v7468_v4 = vsub.f32 %v7466_v27, %v7467_v6 }
 0x35e   : > { %v4559_v57 = vpop.eup %4558  ;;  %v2322_v7 = vrot.slane %v2114_v14, %v7456_v19  ;;  %v2177_v10 = vpop.xlane.xlu1 %2176 }
 0x35f   : > { %v3530_v39 = vmul.f32 0.6931472, %v4559_v57  ;;  %v4561_v24 = vpop.eup %4560  ;;  %v2416_v13 = vrot.slane %v2177_v10, %v7452_v36  ;;  %v2070_v22 = vmul.f32 1.442695, %v7468_v4  ;;  %v3525_v9 = vld [vmem:[#allocation3 + $0x10] sm:$0x7] }
 0x360   : > { %v2327_v33 = vsel %vm1247_vm3, %v2326_v44, %v2322_v7  ;;  %v4563_v14 = vpop.eup %4562  ;;  %v2044_v7 = vld [vmem:[#allocation3 + $0x8] sm:$0x7] }
 0x361   : > { %v2493_v21 = vsel %vm1458_vm5, %v2327_v33, %v2492_v40  ;;  %v2174_v16 = vpop.xlane.xlu0 %2173  ;;  %v3545_v60 = vadd.f32 %v3530_v39, %v3513_v12 }
 0x362   : > { %v2515_v15 = vadd.f32 %v2493_v21, %v2075_v38  ;;  %v2183_v8 = vpop.xlane.xlu1 %2182  ;;  %v2412_v20 = vrot.slane %v2174_v16, %v7456_v19  ;;  %v2076_v16 = vmul.f32 %v4563_v14, %v2044_v7 }
 0x363   : > { %v3561_v2 = vsub.f32 %v3553_v59, %v3545_v60  ;;  %v2425_v28 = vrot.slane %v2183_v8, %v7452_v36 }
 0x364   : > { %2524 = vst.msk [vmem:[#allocation3 + $0x4] sm:$0x7] %vm338_vm9, %v2515_v15  ;;  %v2417_v52 = vsel %vm1247_vm3, %v2416_v13, %v2412_v20  ;;  %v3514_v15 = vld [vmem:[#allocation2 + $0x4] sm:$0x7] }
 0x365   : > { %v2180_v56 = vpop.xlane.xlu0 %2179  ;;  %v3633_v25 = vmul.f32 %v6704_v31, %v3561_v2  ;;  %v2047_v31 = vld [vmem:[#allocation3 + $0x14] sm:$0x7] }
 0x366   : > { %v2421_v61 = vrot.slane %v2180_v56, %v7456_v19  ;;  %v2189_v63 = vpop.xlane.xlu1 %2188  ;;  %v2079_v55 = vmul.f32 %v4561_v24, %v2047_v31 }
 0x367   : > { %v3641_v29 = vsel %vm338_vm9, %v3633_v25, 0.0  ;;  %v2434_v26 = vrot.slane %v2189_v63, %v7452_v36 }
 0x368   : > { %3642 = vadd.xlane.f32.xlu0 %v3641_v29  ;;  %v2426_v11 = vsel %vm1247_vm3, %v2425_v28, %v2421_v61  ;;  %v3554_v61 = vld [vmem:[#allocation4 + $0x4] sm:$0x7] }
 0x369   : > { %v2186_v37 = vpop.xlane.xlu0 %2185  ;;  %v2500_v54 = vsel %vm1456_vm4, %v2426_v11, %v2417_v52 }
 0x36a   : > { %v2430_v32 = vrot.slane %v2186_v37, %v7456_v19  ;;  %v2123_v53 = vpop.xlane.xlu1 %2122 }
 0x36b   : > { %v3522_v43 = vld [vmem:[#allocation3 + $0x4] sm:$0x7]  ;;  %v2335_v57 = vrot.slane %v2123_v53, %v7452_v36 }
 0x36c   : > { %v2435_v58 = vsel %vm1247_vm3, %v2434_v26, %v2430_v32  ;;  %4564 = vlog2.f32 %v3522_v43  ;;  %v2048_v26 = vld [vmem:[#allocation3 + $0x18] sm:$0x7] }
 0x36d   : > { %v2501_v23 = vsel %vm1458_vm5, %v2435_v58, %v2500_v54  ;;  %v2120_v5 = vpop.xlane.xlu0 %2119  ;;  %4566 = vpow2.f32 %v2070_v22 }
 0x36e   : > { %v2519_v35 = vadd.f32 %v2501_v23, %v2079_v55  ;;  %v2129_v49 = vpop.xlane.xlu1 %2128  ;;  %v2331_v45 = vrot.slane %v2120_v5, %v7456_v19  ;;  %4568 = vlog2.f32 %v3525_v9 }
 0x36f   : > { %v2344_v1 = vrot.slane %v2129_v49, %v7452_v36  ;;  %v7469_v49 = vld [vmem:[#allocation111_spill] sm:$0xff] }
 0x370   : > { %2528 = vst.msk [vmem:[#allocation3 + $0x14] sm:$0x7] %vm338_vm9, %v2519_v35  ;;  %v2336_v33 = vsel %vm1247_vm3, %v2335_v57, %v2331_v45 }
 0x371   : > { %v2126_v62 = vpop.xlane.xlu0 %2125 }
 0x372   : > { %v2340_v47 = vrot.slane %v2126_v62, %v7456_v19  ;;  %v2135_v34 = vpop.xlane.xlu1 %2134  ;;  %v7470_v62 = vld [vmem:[#allocation112_spill] sm:$0xff] }
 0x373   : > { %v2353_v39 = vrot.slane %v2135_v34, %v7452_v36 }
 0x374   : > { %v2345_v44 = vsel %vm1247_vm3, %v2344_v1, %v2340_v47  ;;  %v7471_v47 = vsub.f32 %v7469_v49, %v7470_v62  ;;  %v3517_v1 = vld [vmem:[#allocation2 + $0x10] sm:$0x7] }
 0x375   : > { %v2132_v10 = vpop.xlane.xlu0 %2131  ;;  %v2494_v21 = vsel %vm1456_vm4, %v2345_v44, %v2336_v33  ;;  %v3557_v33 = vld [vmem:[#allocation4 + $0x10] sm:$0x7] }
 0x376   : > { %v4565_v51 = vpop.eup %4564  ;;  %v2349_v40 = vrot.slane %v2132_v10, %v7456_v19  ;;  %v2195_v38 = vpop.xlane.xlu1 %2194  ;;  %v2064_v34 = vmul.f32 1.442695, %v7471_v47  ;;  %v3515_v10 = vld [vmem:[#allocation2 + $0x8] sm:$0x7]  ;;  %v7475_v47 = vld [vmem:[#allocation74_spill] sm:$0xff] }
 0x377   : > { %v3532_v12 = vmul.f32 0.6931472, %v4565_v51  ;;  %v3526_v13 = vld [vmem:[#allocation3 + $0x14] sm:$0x7]  ;;  %v4567_v11 = vpop.eup %4566  ;;  %v2443_v31 = vrot.slane %v2195_v38, %v7452_v36  ;;  %v3555_v38 = vld [vmem:[#allocation4 + $0x8] sm:$0x7] }
 0x378   : > { %v2354_v60 = vsel %vm1247_vm3, %v2353_v39, %v2349_v40  ;;  %4570 = vlog2.f32 %v3526_v13  ;;  %v2080_v55 = vmul.f32 %v4567_v11, %v2048_v26  ;;  %v4569_v35 = vpop.eup %4568 }
 0x379   : > { %v2495_v8 = vsel %vm1458_vm5, %v2354_v60, %v2494_v21  ;;  %v2192_v59 = vpop.xlane.xlu0 %2191  ;;  %v3546_v2 = vadd.f32 %v3532_v12, %v3514_v15  ;;  %v3538_v27 = vmul.f32 0.6931472, %v4569_v35  ;;  %v3518_v12 = vld [vmem:[#allocation2 + $0x14] sm:$0x7] }
 0x37a   : > { %v2516_v56 = vadd.f32 %v2495_v8, %v2076_v16  ;;  %v2201_v25 = vpop.xlane.xlu1 %2200  ;;  %v2439_v20 = vrot.slane %v2192_v59, %v7456_v19 }
 0x37b   : > { %v3562_v63 = vsub.f32 %v3554_v61, %v3546_v2  ;;  %v2452_v28 = vrot.slane %v2201_v25, %v7452_v36  ;;  %v3549_v57 = vadd.f32 %v3538_v27, %v3517_v1  ;;  %v7473_v25 = vld [vmem:[#allocation19_spill] sm:$0xff] }
 0x37c   : > { %2525 = vst.msk [vmem:[#allocation3 + $0x8] sm:$0x7] %vm338_vm9, %v2516_v56  ;;  %v2444_v52 = vsel %vm1247_vm3, %v2443_v31, %v2439_v20  ;;  %v7472_v56 = vld [vmem:[#allocation113_spill] sm:$0xff]  ;;  %v2045_v20 = vld [vmem:[#allocation3 + $0xc] sm:$0x7] }
 0x37d   : > { %v2198_v48 = vpop.xlane.xlu0 %2197  ;;  %v3634_v42 = vmul.f32 %v6699_v50, %v3562_v63  ;;  %v3565_v60 = vsub.f32 %v3557_v33, %v3549_v57  ;;  %v7474_v61 = vsub.f32 %v7472_v56, %v7473_v25  ;;  %v2964_v25 = vld [vmem:[#allocation4 + $0x18] sm:$0x7] }
 0x37e   : > { %v2448_v18 = vrot.slane %v2198_v48, %v7456_v19  ;;  %v2207_v29 = vpop.xlane.xlu1 %2206 }
 0x37f   : > { %v3644_v24 = vsel %vm338_vm9, %v3634_v42, 0.0  ;;  %v2461_v50 = vrot.slane %v2207_v29, %v7452_v36  ;;  %v2072_v63 = vmul.f32 1.442695, %v7474_v61  ;;  %v3558_v29 = vld [vmem:[#allocation4 + $0x14] sm:$0x7]  ;;  %v3637_v11 = vmul.f32 %v6728_v46, %v3565_v60 }
 0x380   : > { %3645 = vadd.xlane.f32.xlu0 %v3644_v24  ;;  %v2453_v37 = vsel %vm1247_vm3, %v2452_v28, %v2448_v18 }
 0x381   : > { %v2204_v32 = vpop.xlane.xlu0 %2203  ;;  %v2502_v54 = vsel %vm1456_vm4, %v2453_v37, %v2444_v52 }
 0x382   : > { %v2457_v53 = vrot.slane %v2204_v32, %v7456_v19  ;;  %v4571_v6 = vpop.eup %4570 }
 0x383   : > { %v3523_v43 = vld [vmem:[#allocation3 + $0x8] sm:$0x7]  ;;  %v3540_v44 = vmul.f32 0.6931472, %v4571_v6 }
 0x384   : > { %v2462_v58 = vsel %vm1247_vm3, %v2461_v50, %v2457_v53  ;;  %4572 = vlog2.f32 %v3523_v43 }
 0x385   : > { %v2503_v23 = vsel %vm1458_vm5, %v2462_v58, %v2502_v54  ;;  %4574 = vpow2.f32 %v2064_v34  ;;  %v3550_v15 = vadd.f32 %v3540_v44, %v3518_v12  ;;  %v3653_v54 = vsel %vm338_vm9, %v3637_v11, 0.0 }
 0x386   : > { %v2520_v5 = vadd.f32 %v2503_v23, %v2080_v55  ;;  %4576 = vpow2.f32 %v2072_v63  ;;  %v3428_v34 = vrot.slane %v7475_v47, %v7456_v19 }
 0x387   : > { %v3566_v31 = vsub.f32 %v3558_v29, %v3550_v15 }
 0x388   : > { %2529 = vst.msk [vmem:[#allocation3 + $0x18] sm:$0x7] %vm338_vm9, %v2520_v5 }
 0x389   : > { %v3638_v55 = vmul.f32 %v6723_v3, %v3566_v31 }
 0x38b   : > { %v2141_v4 = vpop.xlane.xlu1 %2140  ;;  %v3656_v23 = vsel %vm338_vm9, %v3638_v55, 0.0 }
 0x38c   : > { %v2362_v8 = vrot.slane %v2141_v4, %v7452_v36 }
 0x38d   : > { %v2138_v45 = vpop.xlane.xlu0 %2137 }
 0x38e   : > { %v4573_v22 = vpop.eup %4572  ;;  %v2358_v59 = vrot.slane %v2138_v45, %v7456_v19  ;;  %v7476_v45 = vld [vmem:[#allocation71_spill] sm:$0xff] }
 0x38f   : > { %v3534_v14 = vmul.f32 0.6931472, %v4573_v22  ;;  %v2147_v7 = vpop.xlane.xlu1 %2146  ;;  %v4575_v42 = vpop.eup %4574  ;;  %v3527_v5 = vld [vmem:[#allocation3 + $0x18] sm:$0x7]  ;;  %v2049_v22 = vld [vmem:[#allocation3 + $0x1c] sm:$0x7]  ;;  %v3419_v1 = vrot.slane %v7476_v45, %v7456_v19 }
 0x390   : > { %v2371_v39 = vrot.slane %v2147_v7, %v7452_v36  ;;  %v2363_v37 = vsel %vm1247_vm3, %v2362_v8, %v2358_v59  ;;  %v2077_v32 = vmul.f32 %v4575_v42, %v2045_v20  ;;  %4578 = vlog2.f32 %v3527_v5  ;;  %v4577_v4 = vpop.eup %4576  ;;  %v3556_v5 = vld [vmem:[#allocation4 + $0xc] sm:$0x7] }
 0x391   : > { %v3547_v51 = vadd.f32 %v3534_v14, %v3515_v10  ;;  %v2144_v40 = vpop.xlane.xlu0 %2143  ;;  %v7477_v14 = vld [vmem:[#allocation73_spill] sm:$0xff] }
 0x392   : > { %v2367_v21 = vrot.slane %v2144_v40, %v7456_v19  ;;  %v3432_v57 = vrot.slane %v7477_v14, %v7452_v36  ;;  %v7478_v40 = vld [vmem:[#allocation76_spill] sm:$0xff] }
 0x393   : > { %v3563_v16 = vsub.f32 %v3555_v38, %v3547_v51  ;;  %v2153_v2 = vpop.xlane.xlu1 %2152  ;;  %v3423_v38 = vrot.slane %v7478_v40, %v7452_v36 }
 0x394   : > { %v2380_v9 = vrot.slane %v2153_v2, %v7452_v36  ;;  %v2372_v18 = vsel %vm1247_vm3, %v2371_v39, %v2367_v21  ;;  %v3433_v33 = vsel %vm1247_vm3, %v3432_v57, %v3428_v34  ;;  %v2081_v21 = vmul.f32 %v4577_v4, %v2049_v22 }
 0x395   : > { %v3635_v48 = vmul.f32 %v6717_v41, %v3563_v16  ;;  %v2150_v28 = vpop.xlane.xlu0 %2149  ;;  %v2496_v41 = vsel %vm1456_vm4, %v2372_v18, %v2363_v37  ;;  %v3424_v2 = vsel %vm1247_vm3, %v3423_v38, %v3419_v1 }
 0x396   : > { %v2376_v24 = vrot.slane %v2150_v28, %v7456_v19  ;;  %v3482_v63 = vsel %vm1456_vm4, %v3433_v33, %v3424_v2 }
 0x397   : > { %v3647_v13 = vsel %vm338_vm9, %v3635_v48, 0.0  ;;  %v2213_v26 = vpop.xlane.xlu1 %2212 }
 0x398   : > { %3648 = vadd.xlane.f32.xlu0 %v3647_v13  ;;  %v2381_v50 = vsel %vm1247_vm3, %v2380_v9, %v2376_v24  ;;  %v2470_v27 = vrot.slane %v2213_v26, %v7452_v36 }
 0x399   : > { %v2497_v53 = vsel %vm1458_vm5, %v2381_v50, %v2496_v41  ;;  %v2210_v52 = vpop.xlane.xlu0 %2209 }
 0x39a   : > { %v2517_v43 = vadd.f32 %v2497_v53, %v2077_v32  ;;  %v2466_v3 = vrot.slane %v2210_v52, %v7456_v19  ;;  %v4579_v28 = vpop.eup %4578  ;;  %v3516_v52 = vld [vmem:[#allocation2 + $0xc] sm:$0x7] }
 0x39b   : > { %v2219_v46 = vpop.xlane.xlu1 %2218  ;;  %v3542_v37 = vmul.f32 0.6931472, %v4579_v28 }
 0x39c   : > { %3654 = vadd.xlane.f32.xlu0 %v3653_v54  ;;  %2526 = vst.msk [vmem:[#allocation3 + $0xc] sm:$0x7] %vm338_vm9, %v2517_v43  ;;  %v2479_v35 = vrot.slane %v2219_v46, %v7452_v36  ;;  %v2471_v12 = vsel %vm1247_vm3, %v2470_v27, %v2466_v3  ;;  %v3519_v46 = vld [vmem:[#allocation2 + $0x18] sm:$0x7] }
 0x39d   : > { %v2216_v58 = vpop.xlane.xlu0 %2215 }
 0x39e   : > { %v2475_v49 = vrot.slane %v2216_v58, %v7456_v19 }
 0x39f   : > { %v3187_v62 = vpop.xlane.xlu1 %3186 }
 0x3a0   : > { %3657 = vadd.xlane.f32.xlu0 %v3656_v23  ;;  %v2480_v44 = vsel %vm1247_vm3, %v2479_v35, %v2475_v49  ;;  %v3441_v15 = vrot.slane %v3187_v62, %v7452_v36  ;;  %v3551_v35 = vadd.f32 %v3542_v37, %v3519_v46  ;;  %v2965_v62 = vld [vmem:[#allocation4 + $0x1c] sm:$0x7] }
 0x3a1   : > { %v2222_v6 = vpop.xlane.xlu0 %2221  ;;  %v2504_v60 = vsel %vm1456_vm4, %v2480_v44, %v2471_v12  ;;  %v7479_v12 = vld [vmem:[#allocation12_spill] sm:$0xff] }
 0x3a2   : > { %v2484_v51 = vrot.slane %v2222_v6, %v7456_v19 }
 0x3a3   : > { %v2225_v7 = vpop.xlane.xlu1 %2224  ;;  %v3524_v10 = vld [vmem:[#allocation3 + $0xc] sm:$0x7] }
 0x3a4   : > { %v2488_v39 = vrot.slane %v2225_v7, %v7452_v36  ;;  %4580 = vlog2.f32 %v3524_v10 }
 0x3a5   : > { %v3184_v16 = vpop.xlane.xlu0 %3183 }
 0x3a6   : > { %v2489_v8 = vsel %vm1247_vm3, %v2488_v39, %v2484_v51  ;;  %v3437_v59 = vrot.slane %v3184_v16, %v7456_v19  ;;  %v3520_v39 = vld [vmem:[#allocation2 + $0x1c] sm:$0x7] }
 0x3a7   : > { %v2505_v56 = vsel %vm1458_vm5, %v2489_v8, %v2504_v60  ;;  %v3193_v61 = vpop.xlane.xlu1 %3192 }
 0x3a8   : > { %v2521_v9 = vadd.f32 %v2505_v56, %v2081_v21  ;;  %v3442_v48 = vsel %vm1247_vm3, %v3441_v15, %v3437_v59  ;;  %v3450_v26 = vrot.slane %v3193_v61, %v7452_v36 }
 0x3a9   : > { %v3483_v42 = vsel %vm1458_vm5, %v3442_v48, %v3482_v63  ;;  %v3190_v18 = vpop.xlane.xlu0 %3189  ;;  %v7480_v48 = vld [vmem:[#allocation11_spill] sm:$0xff] }
 0x3aa   : > { %2530 = vst.msk [vmem:[#allocation3 + $0x1c] sm:$0x7] %vm338_vm9, %v2521_v9  ;;  %v3500_v20 = vadd.f32 %v3483_v42, %v2964_v25  ;;  %v3446_v41 = vrot.slane %v3190_v18, %v7456_v19  ;;  %v3704_v42 = vsub.s32 4, %v7480_v48 }
 0x3ab   : > { %v3199_v29 = vpop.xlane.xlu1 %3198 }
 0x3ac   : > { %3508 = vst.msk [vmem:[#allocation4 + $0x18] sm:$0x7] %vm338_vm9, %v3500_v20  ;;  %v3459_v24 = vrot.slane %v3199_v29, %v7452_v36  ;;  %v3451_v49 = vsel %vm1247_vm3, %v3450_v26, %v3446_v41  ;;  %v3708_v20 = vsub.s32 5, %v7480_v48 }
 0x3ad   : > { %v3196_v13 = vpop.xlane.xlu0 %3195 }
 0x3ae   : > { %v4581_v11 = vpop.eup %4580  ;;  %v3455_v31 = vrot.slane %v3196_v13, %v7456_v19 }
 0x3af   : > { %v3205_v32 = vpop.xlane.xlu1 %3204  ;;  %v3536_v50 = vmul.f32 0.6931472, %v4581_v11  ;;  %v7481_v11 = vld [vmem:[#allocation13_spill] sm:$0xff] }
 0x3b0   : > { %v3468_v53 = vrot.slane %v3205_v32, %v7452_v36  ;;  %v3460_v43 = vsel %vm1247_vm3, %v3459_v24, %v3455_v31 }
 0x3b1   : > { %v3202_v54 = vpop.xlane.xlu0 %3201  ;;  %v3548_v55 = vadd.f32 %v3536_v50, %v3516_v52  ;;  %v3528_v58 = vld [vmem:[#allocation3 + $0x1c] sm:$0x7]  ;;  %v3484_v36 = vsel %vm1456_vm4, %v3460_v43, %v3451_v49 }
 0x3b2   : > { %v3464_v23 = vrot.slane %v3202_v54, %v7456_v19  ;;  %4582 = vlog2.f32 %v3528_v58 }
 0x3b3   : > { %v3564_v47 = vsub.f32 %v3556_v5, %v3548_v55  ;;  %v3559_v34 = vld [vmem:[#allocation4 + $0x18] sm:$0x7]  ;;  %v6910_v27 = vpop.xlane.xlu1 %3597 }
 0x3b4   : > { %v3469_v3 = vsel %vm1247_vm3, %v3468_v53, %v3464_v23  ;;  %v3567_v6 = vsub.f32 %v3559_v34, %v3551_v35  ;;  %v7482_v53 = vld [vmem:[#allocation14_spill] sm:$0xff] }
 0x3b5   : > { %v3485_v4 = vsel %vm1458_vm5, %v3469_v3, %v3484_v36  ;;  %v3636_v22 = vmul.f32 %v6711_v0, %v3564_v47  ;;  %v3700_v3 = vsub.s32 3, %v7480_v48 }
 0x3b6   : > { %v3501_v45 = vadd.f32 %v3485_v4, %v2965_v62  ;;  %v3639_v1 = vmul.f32 %v6737_v30, %v3567_v6  ;;  %v3595_v30 = vpop.xlane.xlu0 %3594 }
 0x3b7   : > { %v3650_v14 = vsel %vm338_vm9, %v3636_v22, 0.0  ;;  %v6918_v57 = vpop.xlane.xlu1 %3603 }
 0x3b8   : > { %3509 = vst.msk [vmem:[#allocation4 + $0x1c] sm:$0x7] %vm338_vm9, %v3501_v45  ;;  %3651 = vadd.xlane.f32.xlu1 %v3650_v14  ;;  %v3659_v44 = vsel %vm338_vm9, %v3639_v1, 0.0 }
 0x3b9   : > { %3660 = vadd.xlane.f32.xlu0 %v3659_v44 }
 0x3ba   : > { %v6930_v9 = vpop.xlane.xlu0 %3600 }
 0x3bb   : > { %v6922_v7 = vpop.xlane.xlu1 %3609 }
 0x3bc   : > { %v4583_v10 = vpop.eup %4582 }
 0x3bd   : > { %v3544_v51 = vmul.f32 0.6931472, %v4583_v10 }
 0x3be   : > { %v6935_v29 = vpop.xlane.xlu0 %3606 }
 0x3bf   : > { %v3552_v40 = vadd.f32 %v3544_v51, %v3520_v39  ;;  %v6924_v0 = vpop.permute.xlu1 %3684  ;;  %v3560_v38 = vld [vmem:[#allocation4 + $0x1c] sm:$0x7]  ;;  %v3712_v39 = vsub.s32 6, %v7480_v48 }
 0x3c0   : > { %v3689_v21 = vrot.slane %v6924_v0, %v7479_v12  ;;  %v3705_v28 = vrot.slane %v6924_v0, %v3704_v42  ;;  %v3693_v31 = vrot.slane %v6924_v0, %v7481_v11  ;;  %v3709_v37 = vrot.slane %v6924_v0, %v3708_v20 }
 0x3c1   : > { %v3568_v33 = vsub.f32 %v3560_v38, %v3552_v40  ;;  %v3697_v52 = vrot.slane %v6924_v0, %v7482_v53  ;;  %v3701_v45 = vrot.slane %v6924_v0, %v3700_v3  ;;  %v3716_v42 = vsub.s32 7, %v7480_v48 }
 0x3c2   : > { %v3726_v60 = vsub.f32 %v3595_v30, %v3689_v21  ;;  %v3730_v26 = vsub.f32 %v6935_v29, %v3705_v28  ;;  %v6941_v41 = vpop.xlane.xlu0 %3612  ;;  %v3727_v32 = vsub.f32 %v6910_v27, %v3693_v31  ;;  %v3731_v50 = vsub.f32 %v6922_v7, %v3709_v37 }
 0x3c3   : > { %v3640_v16 = vmul.f32 %v6746_v17, %v3568_v33  ;;  %v3617_v17 = vmax.f32 %v3595_v30, 1.0  ;;  %v3728_v46 = vsub.f32 %v6930_v9, %v3697_v52  ;;  %v3729_v12 = vsub.f32 %v6918_v57, %v3701_v45 }
 0x3c4   : > { %v3734_v8 = vand.u32 2147483647, %v3726_v60  ;;  %v3738_v43 = vand.u32 2147483647, %v3730_v26  ;;  %v3735_v54 = vand.u32 2147483647, %v3727_v32  ;;  %v3713_v60 = vrot.slane %v6924_v0, %v3712_v39 }
 0x3c5   : > { %v3662_v15 = vsel %vm338_vm9, %v3640_v16, 0.0  ;;  %v3625_v13 = vmul.f32 %v3617_v17, %v3617_v17  ;;  %v3739_v55 = vand.u32 2147483647, %v3731_v50  ;;  %v3736_v35 = vand.u32 2147483647, %v3728_v46 }
 0x3c6   : > { %3663 = vadd.xlane.f32.xlu0 %v3662_v15  ;;  %4584 = vrsqrt.f32 %v3734_v8  ;;  %vm3744_vm15 = vcmp.eq.f32.partialorder %v3734_v8, inf  ;;  %v3747_v2 = vand.u32 2147483648, %v3734_v8  ;;  %vm3746_vm0 = vcmp.eq.f32.partialorder %v3734_v8, 0.0  ;;  %v6948_v58 = vpop.xlane.xlu0 %3615 }
 0x3c7   : > { %vm3772_vm9 = vcmp.eq.f32.partialorder %v3738_v43, inf  ;;  %v3775_v14 = vand.u32 2147483648, %v3738_v43  ;;  %vm3751_vm1 = vcmp.eq.f32.partialorder %v3735_v54, inf  ;;  %vm3774_vm2 = vcmp.eq.f32.partialorder %v3738_v43, 0.0 }
 0x3c8   : > { %vm3779_vm3 = vcmp.eq.f32.partialorder %v3739_v55, inf  ;;  %v3754_v40 = vand.u32 2147483648, %v3735_v54  ;;  %vm3753_vm6 = vcmp.eq.f32.partialorder %v3735_v54, 0.0  ;;  %v3782_v33 = vand.u32 2147483648, %v3739_v55 }
 0x3c9   : > { %vm3781_vm7 = vcmp.eq.f32.partialorder %v3739_v55, 0.0  ;;  %vm3758_vm8 = vcmp.eq.f32.partialorder %v3736_v35, inf  ;;  %vm3760_vm10 = vcmp.eq.f32.partialorder %v3736_v35, 0.0  ;;  %v3717_v28 = vrot.slane %v6924_v0, %v3716_v42 }
 0x3ca   : > { %v3618_v31 = vmax.f32 %v6910_v27, 1.0  ;;  %v3621_v37 = vmax.f32 %v6935_v29, 1.0  ;;  %v3622_v0 = vmax.f32 %v6922_v7, 1.0  ;;  %v3619_v29 = vmax.f32 %v6930_v9, 1.0 }
 0x3cc   : > { %v3626_v52 = vmul.f32 %v3618_v31, %v3618_v31  ;;  %v3623_v31 = vmax.f32 %v6941_v41, 1.0 }
 0x3d0   : > { %v4585_v59 = vpop.eup %4584 }
 0x3d1   : > { %v3743_v56 = vmul.f32 %v4585_v59, %v3734_v8  ;;  %v3761_v59 = vand.u32 2147483648, %v3736_v35 }
 0x3d3   : > { %v3745_v25 = vsel %vm3744_vm15, %v3734_v8, %v3743_v56  ;;  %v3737_v56 = vand.u32 2147483647, %v3729_v12 }
 0x3d4   : > { %v3748_v61 = vsel %vm3746_vm0, %v3747_v2, %v3745_v25 }
 0x3d5   : > { %v4190_v63 = vmul.f32 -1.442695, %v3748_v61  ;;  %v3732_v61 = vsub.f32 %v6941_v41, %v3713_v60  ;;  %vm3765_vm11 = vcmp.eq.f32.partialorder %v3737_v56, inf  ;;  %vm3767_vm12 = vcmp.eq.f32.partialorder %v3737_v56, 0.0 }
 0x3d7   : > { %4586 = vpow2.f32 %v4190_v63  ;;  %v3740_v20 = vand.u32 2147483647, %v3732_v61 }
 0x3d9   : > { %vm3786_vm13 = vcmp.eq.f32.partialorder %v3740_v20, inf  ;;  %v3789_v3 = vand.u32 2147483648, %v3740_v20  ;;  %vm3788_vm14 = vcmp.eq.f32.partialorder %v3740_v20, 0.0 }
 0x3e1   : > { %v4587_v18 = vpop.eup %4586 }
 0x3e2   : > { %v3822_v24 = vadd.f32 1.0, %v4587_v18 }
 0x3e4   : > { %4588 = vrcp.f32 %v3822_v24 }
 0x3e5   : > { %4590 = vrcp.f32 %v3625_v13  ;;  %v3733_v13 = vsub.f32 %v6948_v58, %v3717_v28 }
 0x3e6   : > { %4592 = vrsqrt.f32 %v3738_v43 }
 0x3e7   : > { %4594 = vrsqrt.f32 %v3735_v54  ;;  %v6961_v26 = vand.u32 2147483647, %v3733_v13  ;;  %v3620_v13 = vmax.f32 %v6918_v57, 1.0 }
 0x3e8   : > { %4596 = vrsqrt.f32 %v3739_v55 }
 0x3e9   : > { %4598 = vrsqrt.f32 %v3736_v35  ;;  %vm3793_vm15 = vcmp.eq.f32.partialorder %v6961_v26, inf  ;;  %vm3795_vm0 = vcmp.eq.f32.partialorder %v6961_v26, 0.0 }
 0x3ee   : > { %v4589_v23 = vpop.eup %4588 }
 0x3ef   : > { %v4591_v5 = vpop.eup %4590  ;;  %v3846_v49 = vsub.f32 1.5, %v4589_v23 }
 0x3f0   : > { %v4593_v36 = vpop.eup %4592 }
 0x3f1   : > { %v4595_v6 = vpop.eup %4594  ;;  %v3771_v4 = vmul.f32 %v4593_v36, %v3738_v43 }
 0x3f2   : > { %v4597_v22 = vpop.eup %4596  ;;  %v3750_v1 = vmul.f32 %v4595_v6, %v3735_v54 }
 0x3f3   : > { %v3773_v44 = vsel %vm3772_vm9, %v3738_v43, %v3771_v4  ;;  %v3778_v10 = vmul.f32 %v4597_v22, %v3739_v55  ;;  %v4599_v51 = vpop.eup %4598  ;;  %v3629_v43 = vmul.f32 %v3621_v37, %v3621_v37 }
 0x3f4   : > { %v3752_v38 = vsel %vm3751_vm1, %v3735_v54, %v3750_v1  ;;  %v3776_v30 = vsel %vm3774_vm2, %v3775_v14, %v3773_v44  ;;  %v3757_v21 = vmul.f32 %v4599_v51, %v3736_v35 }
 0x3f5   : > { %v3643_v62 = vpop.xlane.xlu0 %3642  ;;  %v3780_v16 = vsel %vm3779_vm3, %v3739_v55, %v3778_v10  ;;  %v3755_v15 = vsel %vm3753_vm6, %v3754_v40, %v3752_v38  ;;  %v4194_v8 = vmul.f32 -1.442695, %v3776_v30 }
 0x3f6   : > { %v3666_v47 = vmul.f32 %v4591_v5, %v3643_v62  ;;  %v3783_v2 = vsel %vm3781_vm7, %v3782_v33, %v3780_v16  ;;  %v3759_v25 = vsel %vm3758_vm8, %v3736_v35, %v3757_v21  ;;  %v4191_v63 = vmul.f32 -1.442695, %v3755_v15 }
 0x3f7   : > { %4600 = vpow2.f32 %v4194_v8  ;;  %v4195_v17 = vmul.f32 -1.442695, %v3783_v2  ;;  %v3762_v18 = vsel %vm3760_vm10, %v3761_v59, %v3759_v25  ;;  %v3630_v5 = vmul.f32 %v3622_v0, %v3622_v0 }
 0x3f8   : > { %v3854_v34 = vmul.f32 %v3846_v49, %v3666_v47  ;;  %4602 = vrsqrt.f32 %v3737_v56  ;;  %v4192_v24 = vmul.f32 -1.442695, %v3762_v18  ;;  %v3768_v35 = vand.u32 2147483648, %v3737_v56 }
 0x3f9   : > { %4604 = vpow2.f32 %v4191_v63  ;;  %v3627_v47 = vmul.f32 %v3619_v29, %v3619_v29  ;;  %v3796_v21 = vand.u32 2147483648, %v6961_v26 }
 0x3fa   : > { %3871 = vperm.xlu0 %4311, %v3854_v34   ;;  %4606 = vpow2.f32 %v4195_v17 }
 0x3fb   : > { %4608 = vrsqrt.f32 %v3740_v20 }
 0x3fc   : > { %4610 = vpow2.f32 %v4192_v24 }
 0x3fd   : > { %4612 = vrsqrt.f32 %v6961_v26 }
 0x401   : > { %v4601_v11 = vpop.eup %4600 }
 0x402   : > { %v4603_v48 = vpop.eup %4602  ;;  %v3826_v50 = vadd.f32 1.0, %v4601_v11 }
 0x403   : > { %v4605_v32 = vpop.eup %4604  ;;  %v3764_v23 = vmul.f32 %v4603_v48, %v3737_v56 }
 0x404   : > { %v4607_v53 = vpop.eup %4606  ;;  %v3823_v54 = vadd.f32 1.0, %v4605_v32  ;;  %4614 = vrcp.f32 %v3826_v50  ;;  %v3631_v32 = vmul.f32 %v3623_v31, %v3623_v31 }
 0x405   : > { %v4609_v55 = vpop.eup %4608  ;;  %v3827_v46 = vadd.f32 1.0, %v4607_v53  ;;  %4616 = vrcp.f32 %v3626_v52  ;;  %v3766_v7 = vsel %vm3765_vm11, %v3737_v56, %v3764_v23  ;;  %v3624_v52 = vmax.f32 %v6948_v58, 1.0 }
 0x406   : > { %v4611_v27 = vpop.eup %4610  ;;  %4618 = vrcp.f32 %v3629_v43  ;;  %v3785_v62 = vmul.f32 %v4609_v55, %v3740_v20  ;;  %v3769_v36 = vsel %vm3767_vm12, %v3768_v35, %v3766_v7 }
 0x407   : > { %4620 = vrcp.f32 %v3823_v54  ;;  %v3824_v49 = vadd.f32 1.0, %v4611_v27  ;;  %v4613_v4 = vpop.eup %4612  ;;  %v4193_v45 = vmul.f32 -1.442695, %v3769_v36  ;;  %v3632_v54 = vmul.f32 %v3624_v52, %v3624_v52 }
 0x408   : > { %4622 = vrcp.f32 %v3827_v46  ;;  %v3787_v6 = vsel %vm3786_vm13, %v3740_v20, %v3785_v62  ;;  %v3792_v10 = vmul.f32 %v4613_v4, %v6961_v26 }
 0x409   : > { %4624 = vrcp.f32 %v3630_v5  ;;  %v3790_v14 = vsel %vm3788_vm14, %v3789_v3, %v3787_v6 }
 0x40a   : > { %4626 = vrcp.f32 %v3824_v49  ;;  %v4196_v30 = vmul.f32 -1.442695, %v3790_v14  ;;  %v3794_v12 = vsel %vm3793_vm15, %v6961_v26, %v3792_v10  ;;  %v3628_v26 = vmul.f32 %v3620_v13, %v3620_v13 }
 0x40b   : > { %4628 = vrcp.f32 %v3627_v47  ;;  %v3797_v63 = vsel %vm3795_vm0, %v3796_v21, %v3794_v12 }
 0x40c   : > { %4630 = vpow2.f32 %v4193_v45  ;;  %v4197_v24 = vmul.f32 -1.442695, %v3797_v63 }
 0x40d   : > { %v3646_v34 = vpop.xlane.xlu0 %3645  ;;  %4632 = vpow2.f32 %v4196_v30 }
 0x40e   : > { %v4615_v9 = vpop.eup %4614  ;;  %4634 = vpow2.f32 %v4197_v24 }
 0x40f   : > { %v4617_v1 = vpop.eup %4616  ;;  %v3850_v39 = vsub.f32 1.5, %v4615_v9 }
 0x410   : > { %v4619_v44 = vpop.eup %4618  ;;  %v3668_v15 = vmul.f32 %v4617_v1, %v3646_v34 }
 0x411   : > { %v4621_v51 = vpop.eup %4620 }
 0x412   : > { %v4623_v40 = vpop.eup %4622  ;;  %v3847_v60 = vsub.f32 1.5, %v4621_v51 }
 0x413   : > { %v4625_v16 = vpop.eup %4624  ;;  %v3851_v59 = vsub.f32 1.5, %v4623_v40 }
 0x414   : > { %v4627_v2 = vpop.eup %4626  ;;  %v3855_v42 = vmul.f32 %v3847_v60, %v3668_v15 }
 0x415   : > { %v4629_v61 = vpop.eup %4628  ;;  %v3848_v17 = vsub.f32 1.5, %v4627_v2 }
 0x416   : > { %v4631_v28 = vpop.eup %4630 }
 0x417   : > { %v3825_v37 = vadd.f32 1.0, %v4631_v28  ;;  %v4633_v48 = vpop.eup %4632 }
 0x418   : > { %v3828_v50 = vadd.f32 1.0, %v4633_v48  ;;  %v4635_v53 = vpop.eup %4634 }
 0x419   : > { %4636 = vrcp.f32 %v3825_v37  ;;  %v3829_v0 = vadd.f32 1.0, %v4635_v53 }
 0x41a   : > { %4638 = vrcp.f32 %v3628_v26 }
 0x41b   : > { %4640 = vrcp.f32 %v3631_v32 }
 0x41c   : > { %4642 = vrcp.f32 %v3828_v50 }
 0x41d   : > { %4644 = vrcp.f32 %v3829_v0 }
 0x41e   : > { %4646 = vrcp.f32 %v3632_v54 }
 0x423   : > { %v4637_v43 = vpop.eup %4636 }
 0x424   : > { %v4639_v57 = vpop.eup %4638  ;;  %v3849_v46 = vsub.f32 1.5, %v4637_v43 }
 0x425   : > { %v3649_v22 = vpop.xlane.xlu0 %3648  ;;  %v4641_v41 = vpop.eup %4640 }
 0x426   : > { %v3670_v18 = vmul.f32 %v4629_v61, %v3649_v22  ;;  %v4643_v29 = vpop.eup %4642 }
 0x427   : > { %v3852_v49 = vsub.f32 1.5, %v4643_v29  ;;  %v4645_v7 = vpop.eup %4644 }
 0x428   : > { %v3856_v11 = vmul.f32 %v3848_v17, %v3670_v18  ;;  %v4647_v62 = vpop.eup %4646  ;;  %v3853_v34 = vsub.f32 1.5, %v4645_v7 }
 0x429   : > { %v3655_v38 = vpop.xlane.xlu0 %3654 }
 0x42a   : > { %v3674_v33 = vmul.f32 %v4619_v44, %v3655_v38 }
 0x42c   : > { %v3858_v8 = vmul.f32 %v3850_v39, %v3674_v33 }
 0x42d   : > { %v3658_v56 = vpop.xlane.xlu0 %3657 }
 0x42e   : > { %v3676_v25 = vmul.f32 %v4625_v16, %v3658_v56  ;;  %3883 = vperm.xlu1 %4310, %v3858_v8  }
 0x430   : > { %v3859_v20 = vmul.f32 %v3851_v59, %v3676_v25 }
 0x432   : > { %3874 = vperm.xlu1 %4310, %v3855_v42   ;;  %3886 = vperm.xlu0 %4311, %v3859_v20  }
 0x436   : > { %3877 = vperm.xlu1 %4310, %v3856_v11  }
 0x445   : > { %v3652_v55 = vpop.xlane.xlu1 %3651 }
 0x446   : > { %v3672_v23 = vmul.f32 %v4639_v57, %v3652_v55  ;;  %v3661_v27 = vpop.xlane.xlu0 %3660 }
 0x447   : > { %v3678_v35 = vmul.f32 %v4641_v41, %v3661_v27 }
 0x448   : > { %v3857_v5 = vmul.f32 %v3849_v46, %v3672_v23 }
 0x449   : > { %v3860_v58 = vmul.f32 %v3852_v49, %v3678_v35 }
 0x44a   : > { %3880 = vperm.xlu1 %4310, %v3857_v5  }
 0x44e   : > { %3889 = vperm.xlu1 %4310, %v3860_v58  }
 0x453   : > { %v3664_v47 = vpop.xlane.xlu0 %3663 }
 0x454   : > { %v3680_v36 = vmul.f32 %v4647_v62, %v3664_v47 }
 0x456   : > { %v3861_v3 = vmul.f32 %v3853_v34, %v3680_v36 }
 0x458   : > { %3892 = vperm.xlu0 %4311, %v3861_v3  }
 0x459   : > { %4699 = shalt.err (!%p4696_p7)
}
 0x45a   : > { %s4700_s16 = scalar_lea.hbm %s6978_s13, 2048  ;;  %s4704_s30 = scalar_lea.hbm %s7049_s4, 4096 }
 0x45b   : > { %p4701_p10 = scmp.ne.s32.totalorder %s6978_s13, %s4700_s16  ;;  %p4705_p3 = scmp.lt.u32.totalorder %s6978_s13, %s7049_s4 }
 0x45c   : > { %p4706_p8 = scmp.lt.u32.totalorder %s4704_s30, %s4700_s16  ;;  %p4708_p11 = scmp.lt.u32.totalorder %s4700_s16, %s6978_s13 }
 0x45d   : > { %p4702_p12 = pnand %p4701_p10, %p7483_p0 }
 0x45e   : > { %p4707_p9 = por %p4706_p8, %p4705_p3 }
 0x45f   : > { %p4703_p1 = pneg %p4702_p12 }
 0x460   : > { %p4709_p5 = por %p4708_p11, %p4707_p9 }
 0x462   : > { %p4710_p13 = pnand %p4709_p5, %p4703_p1 }
 0x464   : > { %4713 = shalt.err (!%p4710_p13)
}
 0x465   : > { %s4777_s29 = smov 128   ;;  %s4778_s10 = smov 8   ;;  %vm3928_vm9 = vcmask 1043459   ;;  %vm3930_vm1 = vcmask 1044484   ;;  %vm3932_vm2 = vcmask 1045509   ;;  %vm3934_vm3 = vcmask 1046534  }
 0x466   : > { %4243 = dma.vmem_to_hbm [thread:$0]  (%p7483_p0), %s6981_s25, 2048, %s6978_s13, %s3942_s27, %s4777_s29, %s4777_s29, %s4778_s10   ;;  %vm3936_vm6 = vcmask 1047559  }
 0x467   : > { %s332_s13 = scalar_lea.vmem %s7050_s5, %s4124_s12 }
 0x479   : > { %v3872_v22 = vpop.permute.xlu0 %3871 }
 0x47a   : > { %v3897_v44 = vrot.slane %v3872_v22, %v7456_v19 }
 0x4ad   : > { %v3884_v6 = vpop.permute.xlu1 %3883 }
 0x4ae   : > { %v3913_v38 = vrot.slane %v3884_v6, %v7456_v19 }
 0x4b1   : > { %v3875_v4 = vpop.permute.xlu1 %3874  ;;  %v3887_v30 = vpop.permute.xlu0 %3886 }
 0x4b2   : > { %v3901_v1 = vrot.slane %v3875_v4, %v7456_v19  ;;  %v3917_v21 = vrot.slane %v3887_v30, %v7456_v19 }
 0x4b4   : > { %v3926_v51 = vsel %vm1456_vm4, %v3901_v1, %v3897_v44  ;;  %vm3939_vm4 = vcmask 23552  }
 0x4b5   : > { %v3878_v9 = vpop.permute.xlu1 %3877 }
 0x4b6   : > { %v3905_v14 = vrot.slane %v3878_v9, %v7456_v19 }
 0x4b8   : > { %v3927_v39 = vsel %vm1458_vm5, %v3905_v14, %v3926_v51 }
 0x4c9   : > { %v3881_v45 = vpop.permute.xlu1 %3880 }
 0x4ca   : > { %v3909_v10 = vrot.slane %v3881_v45, %v7456_v19 }
 0x4cc   : > { %v3929_v40 = vsel %vm3928_vm9, %v3909_v10, %v3927_v39 }
 0x4cd   : > { %v3890_v33 = vpop.permute.xlu1 %3889  ;;  %v3931_v12 = vsel %vm3930_vm1, %v3913_v38, %v3929_v40 }
 0x4ce   : > { %v3921_v16 = vrot.slane %v3890_v33, %v7456_v19  ;;  %v3933_v60 = vsel %vm3932_vm2, %v3917_v21, %v3931_v12 }
 0x4d0   : > { %v3935_v59 = vsel %vm3934_vm3, %v3921_v16, %v3933_v60 }
 0x4d7   : > { %v3893_v15 = vpop.permute.xlu0 %3892 }
 0x4d8   : > { %v3925_v8 = vrot.slane %v3893_v15, %v7456_v19 }
 0x4da   : > { %v3937_v2 = vsel %vm3936_vm6, %v3925_v8, %v3935_v59 }
 0x4db   : > { %3940 = vst.msk [vmem:[%s332_s13] sm:$0xff] %vm3939_vm4, %v3937_v2 }
 0x4dc PF: > { %s3980_s25 = sand.u32 1, %s4748_s18   ;;  %p7484_p0 = scmp.ne.s32.totalorder %s7184_s8, 0 }
 0x4dd   : > { %p7485_p2 = scmp.ge.s32.totalorder %s4768_s23, 2  ;;  %s3981_s27 = scalar_lea.sflag [#allocation7], %s3980_s25 }
 0x4df   : > { %p4250_p4 = pnand %p7485_p2, %p7484_p0 }
 0x4e1   : > { %4743 = dma.done.wait (!%p4250_p4), %s3981_s27, 2048  }
 0x4e2   : > { %4745 = vsyncadd (!%p4250_p4), %s3981_s27, 4294965248  ;;  %s22_s23 = sadd.s32 1, %s4768_s23   ;;  %s7486_s18 = smov %s4752_s19 }
 0x4e3   : > { %p19_p6 = scmp.ge.s32.totalorder %s22_s23, 4   ;;  %s7487_s19 = smov %s4756_s20 }
 0x4e4   : > { %s7488_s20 = smov %s4865_s7  ;;  %s7489_s21 = smov %s4764_s22 }
 0x4e5   : > { %s7490_s22 = smov %s7492_s26  ;;  %21 = sbr.rel (!%p19_p6) target bundleno = 6 (0x6), region = 110 }
 0x4ec   :  { %3993 = vsyncpa [#allocation6], 1 }
 0x4ed   :  { %3995 = vsyncpa [#allocation6 + $0x1], 1 }
 0x4ee   :  { %3996 = vsyncpa [#allocation7], 1 }
 0x4ef   :  { %3998 = vsyncpa [#allocation7 + $0x1], 1 }

</bundles_post_ra>
